<compile_context>
chip_gen: v5e
topology: v5e:2x2
jax: 0.10.0
libtpu: 0.0.40
codegen_flags: <defaults>
</compile_context>

<pallas_src>
import functools

import jax
import jax.numpy as jnp
from jax import lax
from jax.experimental import pallas as pl
from jax.experimental.pallas import tpu as pltpu


# ----------------------------------------------------------------------------
# Fused kernel:  [BN scale/shift + ReLU] -> depthwise3x3 -> pointwise1x1
#                [-> ReLU] [-> residual - result]  (+ optional BN statistics)
# Horizontal conv structure is pre-folded into the 3 banded weight matrices.
# ----------------------------------------------------------------------------
def _make_fused_kernel(B, H, pre_affine, post_relu, with_stats, with_residual):
    def kernel(*refs):
        it = iter(refs)
        y_ref = next(it)                               # (B, H, K)   K = W*Cin
        ss_ref = next(it) if pre_affine else None      # (2, K)  scale/shift rows
        w_ref = next(it)                               # (3, K, Nout) banded taps
        b_ref = next(it)                               # (1, Nout) bias row
        res_ref = next(it) if with_residual else None  # (B, H, Nout)
        o_ref = next(it)                               # (B, H, Nout)
        stats_ref = next(it) if with_stats else None   # (1, 2, Nout)
        zp_ref = next(it)                              # VMEM (B*(H+2), K)

        K = y_ref.shape[-1]
        Nout = o_ref.shape[-1]

        # Hoisted loads (don't rely on CSE inside the unrolled image loop).
        w_up, w_mid, w_dn = w_ref[0], w_ref[1], w_ref[2]   # (K, Nout) each
        bias = b_ref[...]                                   # (1, Nout)
        if pre_affine:
            sc = ss_ref[0:1, :]                              # (1, K)
            sh = ss_ref[1:2, :]                              # (1, K)
        zero_row = jnp.zeros((1, K), jnp.float32)

        if with_stats:
            s_sum = jnp.zeros((1, Nout), jnp.float32)
            sq_sum = jnp.zeros((1, Nout), jnp.float32)

        for i in range(B):                  # static unroll; B is small
            base = i * (H + 2)
            z = y_ref[i]                    # (H, K)
            if pre_affine:
                # train-mode BatchNorm folded to scale/shift, then ReLU (f32)
                z = jnp.maximum(z * sc + sh, 0.0)

            # Per-image vertical zero halo (2 rows only) + interior rows.
            zp_ref[pl.ds(base, 1), :] = zero_row
            zp_ref[pl.ds(base + H + 1, 1), :] = zero_row
            zp_ref[pl.ds(base + 1, H), :] = z

            # Three banded matmuls: out[h] = b + sum_dy z[h+dy] @ M_dy.
            # The horizontal taps + left/right zero padding live inside M_dy,
            # so no lane masks / iotas; only shifted row reads of the scratch.
            acc = jnp.dot(z, w_mid, preferred_element_type=jnp.float32)
            acc = acc + jnp.dot(zp_ref[pl.ds(base, H), :], w_up,
                                preferred_element_type=jnp.float32)
            acc = acc + jnp.dot(zp_ref[pl.ds(base + 2, H), :], w_dn,
                                preferred_element_type=jnp.float32)
            acc = acc + bias

            if post_relu:
                acc = jnp.maximum(acc, 0.0)
            if with_stats:
                # fused per-channel sum / sum-sq for the next BatchNorm
                s_sum = s_sum + jnp.sum(acc, axis=0, keepdims=True)
                sq_sum = sq_sum + jnp.sum(acc * acc, axis=0, keepdims=True)
            if with_residual:
                acc = res_ref[i] - acc      # x - sequential(x)

            o_ref[i] = acc.astype(o_ref.dtype)

        if with_stats:
            stats_ref[0] = jnp.concatenate([s_sum, sq_sum], axis=0)

    return kernel


def _pick_batch_block(N, max_images=8):
    """Largest divisor of N that is <= max_images (images per grid step).
    TODO(synk): on v7x prefer a B that keeps the grid a multiple of 2 once N
    is large enough, so both TensorCores stay loaded."""
    for b in range(min(N, max_images), 0, -1):
        if N % b == 0:
            return b
    return 1


def fused_conv_pair(y, w, b_row, *, B, scale_shift=None, residual=None,
                    post_relu=False, with_stats=True):
    """One pallas_call for a fused (BN+ReLU)->depthwise3x3->1x1 pair."""
    N, H, K = y.shape
    Nout = w.shape[-1]
    assert N % B == 0
    NB = N // B
    pre_affine = scale_shift is not None
    with_residual = residual is not None

    kernel = _make_fused_kernel(B, H, pre_affine, post_relu, with_stats,
                                with_residual)

    inputs = [y]
    in_specs = [pl.BlockSpec((B, H, K), lambda n: (n, 0, 0))]
    if pre_affine:
        inputs.append(scale_shift)
        in_specs.append(pl.BlockSpec((2, K), lambda n: (0, 0)))
    inputs += [w, b_row]
    in_specs += [pl.BlockSpec((3, K, Nout), lambda n: (0, 0, 0)),
                 pl.BlockSpec((1, Nout), lambda n: (0, 0))]
    if with_residual:
        inputs.append(residual)
        in_specs.append(pl.BlockSpec((B, H, Nout), lambda n: (n, 0, 0)))

    out_shape = [jax.ShapeDtypeStruct((N, H, Nout), jnp.float32)]
    out_specs = [pl.BlockSpec((B, H, Nout), lambda n: (n, 0, 0))]
    if with_stats:
        out_shape.append(jax.ShapeDtypeStruct((NB, 2, Nout), jnp.float32))
        out_specs.append(pl.BlockSpec((1, 2, Nout), lambda n: (n, 0, 0)))

    outs = pl.pallas_call(
        kernel,
        out_shape=tuple(out_shape),
        grid=(NB,),
        in_specs=in_specs,
        out_specs=tuple(out_specs),
        scratch_shapes=[pltpu.VMEM((B * (H + 2), K), jnp.float32)],
        compiler_params=pltpu.CompilerParams(
            dimension_semantics=("parallel",)),      # batch over TensorCores
    )(*inputs)

    if with_stats:
        return outs[0], outs[1]
    return outs[0]


# ----------------------------------------------------------------------------
# Weight folding (tiny XLA ops, hoisted out of the per-forward hot path)
# ----------------------------------------------------------------------------
def _dw9(w_pt):   # depthwise weight (Ch,1,3,3) -> (3,3,Ch), [ky,kx,c]
    return jnp.transpose(w_pt[:, 0], (1, 2, 0))


def _pw(w_pt):    # pointwise weight (Cout,Cin,1,1) -> (Cin,Cout)
    return jnp.transpose(w_pt[:, :, 0, 0], (1, 0))


def _fold_dw_pw(wd, bd, wp, bp):
    """depthwise(groups=Ch)+bias then 1x1+bias -> (3,3,Cin,Cout) taps, (Cout,) bias."""
    w9 = _dw9(wd)                                     # (3,3,Ch)
    pw = _pw(wp)                                      # (Ch,Cout)
    wt = w9[:, :, :, None] * pw[None, None, :, :]     # (3,3,Ch,Cout)
    b = bd @ pw + bp                                  # (Cout,)
    return wt, b


def _fold_grouped_in(wd, bd, wp, bp, C, m):
    """Entry conv (groups=C, m outs/group: out ch j reads in ch j//m) folded
    with the following 1x1; channel replication absorbed into the taps."""
    Cm = C * m
    w9 = _dw9(wd)                                     # (3,3,Cm)
    pw = _pw(wp)                                      # (Cm,Cm)
    expand = (jnp.arange(Cm)[None, :] // m ==
              jnp.arange(C)[:, None]).astype(jnp.float32)   # (C,Cm)
    wt = jnp.einsum("ij,yxj,jk->yxik", expand, w9, pw)      # (3,3,C,Cm)
    b = bd @ pw + bp                                  # (Cm,)
    return wt, b


def _band_matrices(wt, W):
    """Fold the horizontal 3-tap structure (+ left/right zero pad) of the 3x3
    conv into 3 banded matrices: (3, W*Cin, W*Cout), lane layout w*C + c."""
    Cin, Cout = wt.shape[2], wt.shape[3]
    dxm = jnp.arange(W)[:, None] - jnp.arange(W)[None, :]   # w' - w
    valid = (jnp.abs(dxm) <= 1).astype(wt.dtype)
    dx_idx = jnp.clip(dxm + 1, 0, 2)
    M = wt[:, dx_idx]                        # (3, W, W, Cin, Cout) [dy,w',w,ci,co]
    M = M * valid[None, :, :, None, None]
    M = jnp.transpose(M, (0, 1, 3, 2, 4)).reshape(3, W * Cin, W * Cout)
    return M


def prepare_params(params, C, m, W):
    """Fold all static weights ONCE (outside the jit'd hot path)."""
    wt_in, b_in = _fold_grouped_in(params["wd_in"], params["bd_in"],
                                   params["wp_in"], params["bp_in"], C, m)
    wt_out, b_out = _fold_dw_pw(params["wd_out"], params["bd_out"],
                                params["wp_out"], params["bp_out"])
    fp = {
        "in": (_band_matrices(wt_in, W), jnp.tile(b_in, W)[None, :]),
        "out": (_band_matrices(wt_out, W), jnp.tile(b_out, W)[None, :]),
        "blocks": [],
    }
    for blk in params["blocks"]:
        wt1, b1 = _fold_dw_pw(blk["wd1"], blk["bd1"], blk["wp1"], blk["bp1"])
        wt2, b2 = _fold_dw_pw(blk["wd2"], blk["bd2"], blk["wp2"], blk["bp2"])
        fp["blocks"].append({
            "g1": blk["g1"], "b1": blk["b1"],
            "w1": _band_matrices(wt1, W), "bias1": jnp.tile(b1, W)[None, :],
            "g2": blk["g2"], "b2": blk["b2"],
            "w2": _band_matrices(wt2, W), "bias2": jnp.tile(b2, W)[None, :],
        })
    return fp


def _bn_rows(stats, count, gamma, beta, eps=1e-5):
    """PyTorch train-mode BN folded to lane-dense (2, W*C) scale/shift rows.
    NOTE: one-pass E[x^2]-E[x]^2 variance; switch to two-pass/Welford if
    `count` grows very large."""
    Cch = gamma.shape[0]
    Wimg = stats.shape[-1] // Cch
    s = stats.reshape(stats.shape[0], 2, Wimg, Cch).sum(axis=(0, 2))   # (2, C)
    mean = s[0] / count
    var = jnp.maximum(s[1] / count - mean * mean, 0.0)                 # biased
    scale = gamma * lax.rsqrt(var + eps)
    shift = beta - mean * scale
    return jnp.stack([jnp.tile(scale, Wimg), jnp.tile(shift, Wimg)])   # (2, W*C)


# ----------------------------------------------------------------------------
# Full forward pass (Pallas)
# ----------------------------------------------------------------------------
def net_forward(x_nchw, fp, nLayers, C, m):
    N, _, H, W = x_nchw.shape
    count = N * H * W
    B = _pick_batch_block(N)

    # lane-dense layout: (N, H, W*C), lane index = w*C + c
    x = jnp.transpose(x_nchw, (0, 2, 3, 1)).reshape(N, H, W * C)

    # entry: convd_in (grouped) + convp_in + ReLU, emitting BN1 stats
    w_in, b_in = fp["in"]
    first = fused_conv_pair(x, w_in, b_in, B=B, post_relu=True,
                            with_stats=(nLayers > 0))
    if nLayers > 0:
        y, stats = first
    else:
        y = first

    # ConvBlocks (the PyTorch block stores `residual = x` but never uses it)
    for i, blk in enumerate(fp["blocks"]):
        ss1 = _bn_rows(stats, count, blk["g1"], blk["b1"])
        h, stats = fused_conv_pair(y, blk["w1"], blk["bias1"], B=B,
                                   scale_shift=ss1, with_stats=True)
        ss2 = _bn_rows(stats, count, blk["g2"], blk["b2"])
        need_stats = i < nLayers - 1
        nxt = fused_conv_pair(h, blk["w2"], blk["bias2"], B=B,
                              scale_shift=ss2, with_stats=need_stats)
        if need_stats:
            y, stats = nxt
        else:
            y = nxt

    # exit: convd_out + convp_out with the residual subtraction fused in
    w_out, b_out = fp["out"]
    out = fused_conv_pair(y, w_out, b_out, B=B, residual=x, with_stats=False)

    return jnp.transpose(out.reshape(N, H, W, C), (0, 3, 1, 2))   # back to NCHW


# ----------------------------------------------------------------------------
# Parameter init (PyTorch tensor layouts)
# ----------------------------------------------------------------------------
def init_params(key, nLayers, C, m):
    Cm = C * m
    keys = iter(jax.random.split(key, 256))

    def w(shape):
        return (0.1 * jax.random.normal(next(keys), shape)).astype(jnp.float32)

    params = {
        "wd_in": w((Cm, 1, 3, 3)), "bd_in": w((Cm,)),      # convd_in (groups=C)
        "wp_in": w((Cm, Cm, 1, 1)), "bp_in": w((Cm,)),     # convp_in
        "wd_out": w((Cm, 1, 3, 3)), "bd_out": w((Cm,)),    # convd_out
        "wp_out": w((C, Cm, 1, 1)), "bp_out": w((C,)),     # convp_out
        "blocks": [],
    }
    for _ in range(nLayers):
        params["blocks"].append({
            "g1": jnp.ones((Cm,), jnp.float32), "b1": jnp.zeros((Cm,), jnp.float32),
            "wd1": w((Cm, 1, 3, 3)), "bd1": w((Cm,)),
            "wp1": w((C, Cm, 1, 1)), "bp1": w((C,)),
            "g2": jnp.ones((C,), jnp.float32), "b2": jnp.zeros((C,), jnp.float32),
            "wd2": w((C, 1, 3, 3)), "bd2": w((C,)),
            "wp2": w((Cm, C, 1, 1)), "bp2": w((Cm,)),
        })
    return params


# ----------------------------------------------------------------------------
# Pure-JAX reference (mirrors the PyTorch module, NCHW / OIHW)
# ----------------------------------------------------------------------------
def ref_forward(x, params, nLayers, C, m):
    Cm = C * m

    def conv(x, w, b, groups, pad):
        y = lax.conv_general_dilated(
            x, w, (1, 1), [(pad, pad), (pad, pad)],
            feature_group_count=groups,
            dimension_numbers=("NCHW", "OIHW", "NCHW"))
        return y + b[None, :, None, None]

    def bn(x, g, bb, eps=1e-5):
        mean = jnp.mean(x, axis=(0, 2, 3), keepdims=True)
        var = jnp.mean((x - mean) ** 2, axis=(0, 2, 3), keepdims=True)
        return ((x - mean) / jnp.sqrt(var + eps)) * g[None, :, None, None] \
            + bb[None, :, None, None]

    y = conv(x, params["wd_in"], params["bd_in"], groups=C, pad=1)
    y = conv(y, params["wp_in"], params["bp_in"], groups=1, pad=0)
    y = jnp.maximum(y, 0.0)
    for i in range(nLayers):
        p = params["blocks"][i]
        h = jnp.maximum(bn(y, p["g1"], p["b1"]), 0.0)
        h = conv(h, p["wd1"], p["bd1"], groups=Cm, pad=1)
        h = conv(h, p["wp1"], p["bp1"], groups=1, pad=0)
        h = jnp.maximum(bn(h, p["g2"], p["b2"]), 0.0)
        h = conv(h, p["wd2"], p["bd2"], groups=C, pad=1)
        y = conv(h, p["wp2"], p["bp2"], groups=1, pad=0)
    y = conv(y, params["wd_out"], params["bd_out"], groups=Cm, pad=1)
    y = conv(y, params["wp_out"], params["bp_out"], groups=1, pad=0)
    return x - y


# ----------------------------------------------------------------------------
if __name__ == "__main__":
    nLayers, C, m = 2, 4, 2
    N, H, W = 2, 16, 16

    key = jax.random.PRNGKey(0)
    kx, kp = jax.random.split(key)
    x = jax.random.normal(kx, (N, C, H, W), dtype=jnp.float32)
    params = init_params(kp, nLayers, C, m)

    # static weight folding hoisted out of the hot path
    fparams = prepare_params(params, C, m, W)

    fwd = jax.jit(functools.partial(net_forward, nLayers=nLayers, C=C, m=m))
    out = jax.block_until_ready(fwd(x, fparams))

    ref = ref_forward(x, params, nLayers, C, m)
    assert out.shape == ref.shape == (N, C, H, W)
    err = float(jnp.max(jnp.abs(out - ref)))
    assert jnp.allclose(out, ref, atol=1e-2, rtol=1e-2), err

    print("KERNEL_OK")
</pallas_src>

<mosaic_0001>
module attributes {stable_mosaic.version = 11 : i64} {
  func.func @kernel(%arg0: i32, %arg1: memref<2x16x64xf32, #tpu.memory_space<vmem>>, %arg2: memref<3x64x128xf32, #tpu.memory_space<vmem>>, %arg3: memref<1x128xf32, #tpu.memory_space<vmem>>, %arg4: memref<2x16x128xf32, #tpu.memory_space<vmem>>, %arg5: memref<1x2x128xf32, #tpu.memory_space<vmem>>, %arg6: memref<36x64xf32, #tpu.memory_space<vmem>>) attributes {dimension_semantics = [#tpu.dimension_semantics<parallel>], iteration_bounds = array<i64: 1>, scalar_prefetch = 0 : i64, scratch_operands = 1 : i64, tpu.core_type = #tpu.core_type<tc>, window_params = [{transform_indices = @transform_0, window_bounds = array<i64: 2, 16, 64>}, {pipeline_mode = #tpu.pipeline_mode<synchronous>, transform_indices = @transform_1, window_bounds = array<i64: 3, 64, 128>}, {pipeline_mode = #tpu.pipeline_mode<synchronous>, transform_indices = @transform_2, window_bounds = array<i64: 1, 128>}, {transform_indices = @transform_3, window_bounds = array<i64: 2, 16, 128>}, {transform_indices = @transform_4, window_bounds = array<i64: 1, 2, 128>}]} {
    %c0 = arith.constant 0 : index
    %c0_0 = arith.constant 0 : index
    %c0_1 = arith.constant 0 : index
    %0 = vector.load %arg2[%c0, %c0_0, %c0_1] : memref<3x64x128xf32, #tpu.memory_space<vmem>>, vector<1x64x128xf32>
    %1 = vector.shape_cast %0 : vector<1x64x128xf32> to vector<64x128xf32>
    %c1 = arith.constant 1 : index
    %c0_2 = arith.constant 0 : index
    %c0_3 = arith.constant 0 : index
    %2 = vector.load %arg2[%c1, %c0_2, %c0_3] : memref<3x64x128xf32, #tpu.memory_space<vmem>>, vector<1x64x128xf32>
    %3 = vector.shape_cast %2 : vector<1x64x128xf32> to vector<64x128xf32>
    %c2 = arith.constant 2 : index
    %c0_4 = arith.constant 0 : index
    %c0_5 = arith.constant 0 : index
    %4 = vector.load %arg2[%c2, %c0_4, %c0_5] : memref<3x64x128xf32, #tpu.memory_space<vmem>>, vector<1x64x128xf32>
    %5 = vector.shape_cast %4 : vector<1x64x128xf32> to vector<64x128xf32>
    %c0_6 = arith.constant 0 : index
    %c0_7 = arith.constant 0 : index
    %6 = vector.load %arg3[%c0_6, %c0_7] : memref<1x128xf32, #tpu.memory_space<vmem>>, vector<1x128xf32>
    %cst = arith.constant 0.000000e+00 : f32
    %7 = vector.broadcast %cst : f32 to vector<1x64xf32>
    %cst_8 = arith.constant 0.000000e+00 : f32
    %8 = vector.broadcast %cst_8 : f32 to vector<1x128xf32>
    %cst_9 = arith.constant 0.000000e+00 : f32
    %9 = vector.broadcast %cst_9 : f32 to vector<1x128xf32>
    %c0_10 = arith.constant 0 : index
    %c0_11 = arith.constant 0 : index
    %c0_12 = arith.constant 0 : index
    %10 = vector.load %arg1[%c0_10, %c0_11, %c0_12] : memref<2x16x64xf32, #tpu.memory_space<vmem>>, vector<1x16x64xf32>
    %11 = vector.shape_cast %10 : vector<1x16x64xf32> to vector<16x64xf32>
    %c0_13 = arith.constant 0 : index
    %c0_14 = arith.constant 0 : index
    %12 = vector.load %arg6[%c0_13, %c0_14] : memref<36x64xf32, #tpu.memory_space<vmem>>, vector<1x64xf32>
    tpu.vector_store %arg6[%c0_13, %c0_14], %7 {strides = array<i32>} : memref<36x64xf32, #tpu.memory_space<vmem>>, vector<1x64xf32>,
    %c17 = arith.constant 17 : index
    %c0_15 = arith.constant 0 : index
    %13 = vector.load %arg6[%c17, %c0_15] : memref<36x64xf32, #tpu.memory_space<vmem>>, vector<1x64xf32>
    tpu.vector_store %arg6[%c17, %c0_15], %7 {strides = array<i32>} : memref<36x64xf32, #tpu.memory_space<vmem>>, vector<1x64xf32>,
    %c1_16 = arith.constant 1 : index
    %c0_17 = arith.constant 0 : index
    %14 = vector.load %arg6[%c1_16, %c0_17] : memref<36x64xf32, #tpu.memory_space<vmem>>, vector<16x64xf32>
    tpu.vector_store %arg6[%c1_16, %c0_17], %11 {strides = array<i32>} : memref<36x64xf32, #tpu.memory_space<vmem>>, vector<16x64xf32>,
    %cst_18 = arith.constant dense<0.000000e+00> : vector<16x128xf32>
    %15 = tpu.matmul %11, %3, %cst_18 {dimension_numbers = #tpu.dot_dimension_numbers<[1], [0], [0], [1], [0, 0, 1, 1], [], []>} : vector<16x64xf32>, vector<64x128xf32>, vector<16x128xf32> -> vector<16x128xf32>
    %c0_19 = arith.constant 0 : index
    %c0_20 = arith.constant 0 : index
    %16 = vector.load %arg6[%c0_19, %c0_20] : memref<36x64xf32, #tpu.memory_space<vmem>>, vector<16x64xf32>
    %cst_21 = arith.constant dense<0.000000e+00> : vector<16x128xf32>
    %17 = tpu.matmul %16, %1, %cst_21 {dimension_numbers = #tpu.dot_dimension_numbers<[1], [0], [0], [1], [0, 0, 1, 1], [], []>} : vector<16x64xf32>, vector<64x128xf32>, vector<16x128xf32> -> vector<16x128xf32>
    %18 = arith.addf %15, %17 : vector<16x128xf32>
    %c2_22 = arith.constant 2 : index
    %c0_23 = arith.constant 0 : index
    %19 = vector.load %arg6[%c2_22, %c0_23] : memref<36x64xf32, #tpu.memory_space<vmem>>, vector<16x64xf32>
    %cst_24 = arith.constant dense<0.000000e+00> : vector<16x128xf32>
    %20 = tpu.matmul %19, %5, %cst_24 {dimension_numbers = #tpu.dot_dimension_numbers<[1], [0], [0], [1], [0, 0, 1, 1], [], []>} : vector<16x64xf32>, vector<64x128xf32>, vector<16x128xf32> -> vector<16x128xf32>
    %21 = arith.addf %18, %20 : vector<16x128xf32>
    %22 = vector.broadcast %6 : vector<1x128xf32> to vector<16x128xf32>
    %23 = arith.addf %21, %22 : vector<16x128xf32>
    %cst_25 = arith.constant 0.000000e+00 : f32
    %24 = vector.broadcast %cst_25 : f32 to vector<16x128xf32>
    %25 = arith.maximumf %23, %24 : vector<16x128xf32>
    %cst_26 = arith.constant dense<0.000000e+00> : vector<128xf32>
    %26 = vector.multi_reduction <add>, %25, %cst_26 [0] : vector<16x128xf32> to vector<128xf32>
    %27 = vector.shape_cast %26 : vector<128xf32> to vector<1x128xf32>
    %28 = arith.addf %8, %27 : vector<1x128xf32>
    %29 = arith.mulf %25, %25 : vector<16x128xf32>
    %cst_27 = arith.constant dense<0.000000e+00> : vector<128xf32>
    %30 = vector.multi_reduction <add>, %29, %cst_27 [0] : vector<16x128xf32> to vector<128xf32>
    %31 = vector.shape_cast %30 : vector<128xf32> to vector<1x128xf32>
    %32 = arith.addf %9, %31 : vector<1x128xf32>
    %c0_28 = arith.constant 0 : index
    %c0_29 = arith.constant 0 : index
    %c0_30 = arith.constant 0 : index
    %33 = vector.load %arg4[%c0_28, %c0_29, %c0_30] : memref<2x16x128xf32, #tpu.memory_space<vmem>>, vector<1x16x128xf32>
    %34 = vector.shape_cast %33 : vector<1x16x128xf32> to vector<16x128xf32>
    %35 = vector.shape_cast %25 : vector<16x128xf32> to vector<1x16x128xf32>
    tpu.vector_store %arg4[%c0_28, %c0_29, %c0_30], %35 {strides = array<i32>} : memref<2x16x128xf32, #tpu.memory_space<vmem>>, vector<1x16x128xf32>,
    %c1_31 = arith.constant 1 : index
    %c0_32 = arith.constant 0 : index
    %c0_33 = arith.constant 0 : index
    %36 = vector.load %arg1[%c1_31, %c0_32, %c0_33] : memref<2x16x64xf32, #tpu.memory_space<vmem>>, vector<1x16x64xf32>
    %37 = vector.shape_cast %36 : vector<1x16x64xf32> to vector<16x64xf32>
    %c18 = arith.constant 18 : index
    %c0_34 = arith.constant 0 : index
    %38 = vector.load %arg6[%c18, %c0_34] : memref<36x64xf32, #tpu.memory_space<vmem>>, vector<1x64xf32>
    tpu.vector_store %arg6[%c18, %c0_34], %7 {strides = array<i32>} : memref<36x64xf32, #tpu.memory_space<vmem>>, vector<1x64xf32>,
    %c35 = arith.constant 35 : index
    %c0_35 = arith.constant 0 : index
    %39 = vector.load %arg6[%c35, %c0_35] : memref<36x64xf32, #tpu.memory_space<vmem>>, vector<1x64xf32>
    tpu.vector_store %arg6[%c35, %c0_35], %7 {strides = array<i32>} : memref<36x64xf32, #tpu.memory_space<vmem>>, vector<1x64xf32>,
    %c19 = arith.constant 19 : index
    %c0_36 = arith.constant 0 : index
    %40 = vector.load %arg6[%c19, %c0_36] : memref<36x64xf32, #tpu.memory_space<vmem>>, vector<16x64xf32>
    tpu.vector_store %arg6[%c19, %c0_36], %37 {strides = array<i32>} : memref<36x64xf32, #tpu.memory_space<vmem>>, vector<16x64xf32>,
    %cst_37 = arith.constant dense<0.000000e+00> : vector<16x128xf32>
    %41 = tpu.matmul %37, %3, %cst_37 {dimension_numbers = #tpu.dot_dimension_numbers<[1], [0], [0], [1], [0, 0, 1, 1], [], []>} : vector<16x64xf32>, vector<64x128xf32>, vector<16x128xf32> -> vector<16x128xf32>
    %c18_38 = arith.constant 18 : index
    %c0_39 = arith.constant 0 : index
    %42 = vector.load %arg6[%c18_38, %c0_39] : memref<36x64xf32, #tpu.memory_space<vmem>>, vector<16x64xf32>
    %cst_40 = arith.constant dense<0.000000e+00> : vector<16x128xf32>
    %43 = tpu.matmul %42, %1, %cst_40 {dimension_numbers = #tpu.dot_dimension_numbers<[1], [0], [0], [1], [0, 0, 1, 1], [], []>} : vector<16x64xf32>, vector<64x128xf32>, vector<16x128xf32> -> vector<16x128xf32>
    %44 = arith.addf %41, %43 : vector<16x128xf32>
    %c20 = arith.constant 20 : index
    %c0_41 = arith.constant 0 : index
    %45 = vector.load %arg6[%c20, %c0_41] : memref<36x64xf32, #tpu.memory_space<vmem>>, vector<16x64xf32>
    %cst_42 = arith.constant dense<0.000000e+00> : vector<16x128xf32>
    %46 = tpu.matmul %45, %5, %cst_42 {dimension_numbers = #tpu.dot_dimension_numbers<[1], [0], [0], [1], [0, 0, 1, 1], [], []>} : vector<16x64xf32>, vector<64x128xf32>, vector<16x128xf32> -> vector<16x128xf32>
    %47 = arith.addf %44, %46 : vector<16x128xf32>
    %48 = vector.broadcast %6 : vector<1x128xf32> to vector<16x128xf32>
    %49 = arith.addf %47, %48 : vector<16x128xf32>
    %cst_43 = arith.constant 0.000000e+00 : f32
    %50 = vector.broadcast %cst_43 : f32 to vector<16x128xf32>
    %51 = arith.maximumf %49, %50 : vector<16x128xf32>
    %cst_44 = arith.constant dense<0.000000e+00> : vector<128xf32>
    %52 = vector.multi_reduction <add>, %51, %cst_44 [0] : vector<16x128xf32> to vector<128xf32>
    %53 = vector.shape_cast %52 : vector<128xf32> to vector<1x128xf32>
    %54 = arith.addf %28, %53 : vector<1x128xf32>
    %55 = arith.mulf %51, %51 : vector<16x128xf32>
    %cst_45 = arith.constant dense<0.000000e+00> : vector<128xf32>
    %56 = vector.multi_reduction <add>, %55, %cst_45 [0] : vector<16x128xf32> to vector<128xf32>
    %57 = vector.shape_cast %56 : vector<128xf32> to vector<1x128xf32>
    %58 = arith.addf %32, %57 : vector<1x128xf32>
    %c1_46 = arith.constant 1 : index
    %c0_47 = arith.constant 0 : index
    %c0_48 = arith.constant 0 : index
    %59 = vector.load %arg4[%c1_46, %c0_47, %c0_48] : memref<2x16x128xf32, #tpu.memory_space<vmem>>, vector<1x16x128xf32>
    %60 = vector.shape_cast %59 : vector<1x16x128xf32> to vector<16x128xf32>
    %61 = vector.shape_cast %51 : vector<16x128xf32> to vector<1x16x128xf32>
    tpu.vector_store %arg4[%c1_46, %c0_47, %c0_48], %61 {strides = array<i32>} : memref<2x16x128xf32, #tpu.memory_space<vmem>>, vector<1x16x128xf32>,
    %62 = tpu.concatenate %54, %58 in 0 : vector<1x128xf32>, vector<1x128xf32> -> vector<2x128xf32>
    %c0_49 = arith.constant 0 : index
    %c0_50 = arith.constant 0 : index
    %c0_51 = arith.constant 0 : index
    %63 = vector.load %arg5[%c0_49, %c0_50, %c0_51] : memref<1x2x128xf32, #tpu.memory_space<vmem>>, vector<1x2x128xf32>
    %64 = vector.shape_cast %63 : vector<1x2x128xf32> to vector<2x128xf32>
    %65 = vector.shape_cast %62 : vector<2x128xf32> to vector<1x2x128xf32>
    tpu.vector_store %arg5[%c0_49, %c0_50, %c0_51], %65 {strides = array<i32>} : memref<1x2x128xf32, #tpu.memory_space<vmem>>, vector<1x2x128xf32>,
    return
  }
  func.func @transform_0(%arg0: i32) -> (i32, i32, i32) {
    %c0_i32 = arith.constant 0 : i32
    %c0_i32_0 = arith.constant 0 : i32
    %c0_i32_1 = arith.constant 0 : i32
    return %arg0, %c0_i32, %c0_i32_0 : i32, i32, i32
  }
  func.func @transform_1(%arg0: i32) -> (i32, i32, i32) {
    %c0_i32 = arith.constant 0 : i32
    %c0_i32_0 = arith.constant 0 : i32
    %c0_i32_1 = arith.constant 0 : i32
    %c0_i32_2 = arith.constant 0 : i32
    return %c0_i32, %c0_i32_0, %c0_i32_1 : i32, i32, i32
  }
  func.func @transform_2(%arg0: i32) -> (i32, i32) {
    %c0_i32 = arith.constant 0 : i32
    %c0_i32_0 = arith.constant 0 : i32
    %c0_i32_1 = arith.constant 0 : i32
    return %c0_i32, %c0_i32_0 : i32, i32
  }
  func.func @transform_3(%arg0: i32) -> (i32, i32, i32) {
    %c0_i32 = arith.constant 0 : i32
    %c0_i32_0 = arith.constant 0 : i32
    %c0_i32_1 = arith.constant 0 : i32
    return %arg0, %c0_i32, %c0_i32_0 : i32, i32, i32
  }
  func.func @transform_4(%arg0: i32) -> (i32, i32, i32) {
    %c0_i32 = arith.constant 0 : i32
    %c0_i32_0 = arith.constant 0 : i32
    %c0_i32_1 = arith.constant 0 : i32
    return %arg0, %c0_i32, %c0_i32_0 : i32, i32, i32
  }
}

module attributes {stable_mosaic.version = 11 : i64} {
  func.func @kernel(%arg0: i32, %arg1: memref<2x16x128xf32, #tpu.memory_space<vmem>>, %arg2: memref<2x128xf32, #tpu.memory_space<vmem>>, %arg3: memref<3x128x64xf32, #tpu.memory_space<vmem>>, %arg4: memref<1x64xf32, #tpu.memory_space<vmem>>, %arg5: memref<2x16x64xf32, #tpu.memory_space<vmem>>, %arg6: memref<1x2x64xf32, #tpu.memory_space<vmem>>, %arg7: memref<36x128xf32, #tpu.memory_space<vmem>>) attributes {dimension_semantics = [#tpu.dimension_semantics<parallel>], iteration_bounds = array<i64: 1>, scalar_prefetch = 0 : i64, scratch_operands = 1 : i64, tpu.core_type = #tpu.core_type<tc>, window_params = [{transform_indices = @transform_0, window_bounds = array<i64: 2, 16, 128>}, {pipeline_mode = #tpu.pipeline_mode<synchronous>, transform_indices = @transform_1, window_bounds = array<i64: 2, 128>}, {pipeline_mode = #tpu.pipeline_mode<synchronous>, transform_indices = @transform_2, window_bounds = array<i64: 3, 128, 64>}, {pipeline_mode = #tpu.pipeline_mode<synchronous>, transform_indices = @transform_3, window_bounds = array<i64: 1, 64>}, {transform_indices = @transform_4, window_bounds = array<i64: 2, 16, 64>}, {transform_indices = @transform_5, window_bounds = array<i64: 1, 2, 64>}]} {
    %c0 = arith.constant 0 : index
    %c0_0 = arith.constant 0 : index
    %c0_1 = arith.constant 0 : index
    %0 = vector.load %arg3[%c0, %c0_0, %c0_1] : memref<3x128x64xf32, #tpu.memory_space<vmem>>, vector<1x128x64xf32>
    %1 = vector.shape_cast %0 : vector<1x128x64xf32> to vector<128x64xf32>
    %c1 = arith.constant 1 : index
    %c0_2 = arith.constant 0 : index
    %c0_3 = arith.constant 0 : index
    %2 = vector.load %arg3[%c1, %c0_2, %c0_3] : memref<3x128x64xf32, #tpu.memory_space<vmem>>, vector<1x128x64xf32>
    %3 = vector.shape_cast %2 : vector<1x128x64xf32> to vector<128x64xf32>
    %c2 = arith.constant 2 : index
    %c0_4 = arith.constant 0 : index
    %c0_5 = arith.constant 0 : index
    %4 = vector.load %arg3[%c2, %c0_4, %c0_5] : memref<3x128x64xf32, #tpu.memory_space<vmem>>, vector<1x128x64xf32>
    %5 = vector.shape_cast %4 : vector<1x128x64xf32> to vector<128x64xf32>
    %c0_6 = arith.constant 0 : index
    %c0_7 = arith.constant 0 : index
    %6 = vector.load %arg4[%c0_6, %c0_7] : memref<1x64xf32, #tpu.memory_space<vmem>>, vector<1x64xf32>
    %c0_8 = arith.constant 0 : index
    %c0_9 = arith.constant 0 : index
    %7 = vector.load %arg2[%c0_8, %c0_9] : memref<2x128xf32, #tpu.memory_space<vmem>>, vector<1x128xf32>
    %c1_10 = arith.constant 1 : index
    %c0_11 = arith.constant 0 : index
    %8 = vector.load %arg2[%c1_10, %c0_11] : memref<2x128xf32, #tpu.memory_space<vmem>>, vector<1x128xf32>
    %cst = arith.constant 0.000000e+00 : f32
    %9 = vector.broadcast %cst : f32 to vector<1x128xf32>
    %cst_12 = arith.constant 0.000000e+00 : f32
    %10 = vector.broadcast %cst_12 : f32 to vector<1x64xf32>
    %cst_13 = arith.constant 0.000000e+00 : f32
    %11 = vector.broadcast %cst_13 : f32 to vector<1x64xf32>
    %c0_14 = arith.constant 0 : index
    %c0_15 = arith.constant 0 : index
    %c0_16 = arith.constant 0 : index
    %12 = vector.load %arg1[%c0_14, %c0_15, %c0_16] : memref<2x16x128xf32, #tpu.memory_space<vmem>>, vector<1x16x128xf32>
    %13 = vector.shape_cast %12 : vector<1x16x128xf32> to vector<16x128xf32>
    %14 = vector.broadcast %7 : vector<1x128xf32> to vector<16x128xf32>
    %15 = arith.mulf %13, %14 : vector<16x128xf32>
    %16 = vector.broadcast %8 : vector<1x128xf32> to vector<16x128xf32>
    %17 = arith.addf %15, %16 : vector<16x128xf32>
    %cst_17 = arith.constant 0.000000e+00 : f32
    %18 = vector.broadcast %cst_17 : f32 to vector<16x128xf32>
    %19 = arith.maximumf %17, %18 : vector<16x128xf32>
    %c0_18 = arith.constant 0 : index
    %c0_19 = arith.constant 0 : index
    %20 = vector.load %arg7[%c0_18, %c0_19] : memref<36x128xf32, #tpu.memory_space<vmem>>, vector<1x128xf32>
    tpu.vector_store %arg7[%c0_18, %c0_19], %9 {strides = array<i32>} : memref<36x128xf32, #tpu.memory_space<vmem>>, vector<1x128xf32>,
    %c17 = arith.constant 17 : index
    %c0_20 = arith.constant 0 : index
    %21 = vector.load %arg7[%c17, %c0_20] : memref<36x128xf32, #tpu.memory_space<vmem>>, vector<1x128xf32>
    tpu.vector_store %arg7[%c17, %c0_20], %9 {strides = array<i32>} : memref<36x128xf32, #tpu.memory_space<vmem>>, vector<1x128xf32>,
    %c1_21 = arith.constant 1 : index
    %c0_22 = arith.constant 0 : index
    %22 = vector.load %arg7[%c1_21, %c0_22] : memref<36x128xf32, #tpu.memory_space<vmem>>, vector<16x128xf32>
    tpu.vector_store %arg7[%c1_21, %c0_22], %19 {strides = array<i32>} : memref<36x128xf32, #tpu.memory_space<vmem>>, vector<16x128xf32>,
    %cst_23 = arith.constant dense<0.000000e+00> : vector<16x64xf32>
    %23 = tpu.matmul %19, %3, %cst_23 {dimension_numbers = #tpu.dot_dimension_numbers<[1], [0], [0], [1], [0, 0, 1, 1], [], []>} : vector<16x128xf32>, vector<128x64xf32>, vector<16x64xf32> -> vector<16x64xf32>
    %c0_24 = arith.constant 0 : index
    %c0_25 = arith.constant 0 : index
    %24 = vector.load %arg7[%c0_24, %c0_25] : memref<36x128xf32, #tpu.memory_space<vmem>>, vector<16x128xf32>
    %cst_26 = arith.constant dense<0.000000e+00> : vector<16x64xf32>
    %25 = tpu.matmul %24, %1, %cst_26 {dimension_numbers = #tpu.dot_dimension_numbers<[1], [0], [0], [1], [0, 0, 1, 1], [], []>} : vector<16x128xf32>, vector<128x64xf32>, vector<16x64xf32> -> vector<16x64xf32>
    %26 = arith.addf %23, %25 : vector<16x64xf32>
    %c2_27 = arith.constant 2 : index
    %c0_28 = arith.constant 0 : index
    %27 = vector.load %arg7[%c2_27, %c0_28] : memref<36x128xf32, #tpu.memory_space<vmem>>, vector<16x128xf32>
    %cst_29 = arith.constant dense<0.000000e+00> : vector<16x64xf32>
    %28 = tpu.matmul %27, %5, %cst_29 {dimension_numbers = #tpu.dot_dimension_numbers<[1], [0], [0], [1], [0, 0, 1, 1], [], []>} : vector<16x128xf32>, vector<128x64xf32>, vector<16x64xf32> -> vector<16x64xf32>
    %29 = arith.addf %26, %28 : vector<16x64xf32>
    %30 = vector.broadcast %6 : vector<1x64xf32> to vector<16x64xf32>
    %31 = arith.addf %29, %30 : vector<16x64xf32>
    %cst_30 = arith.constant dense<0.000000e+00> : vector<64xf32>
    %32 = vector.multi_reduction <add>, %31, %cst_30 [0] : vector<16x64xf32> to vector<64xf32>
    %33 = vector.shape_cast %32 : vector<64xf32> to vector<1x64xf32>
    %34 = arith.addf %10, %33 : vector<1x64xf32>
    %35 = arith.mulf %31, %31 : vector<16x64xf32>
    %cst_31 = arith.constant dense<0.000000e+00> : vector<64xf32>
    %36 = vector.multi_reduction <add>, %35, %cst_31 [0] : vector<16x64xf32> to vector<64xf32>
    %37 = vector.shape_cast %36 : vector<64xf32> to vector<1x64xf32>
    %38 = arith.addf %11, %37 : vector<1x64xf32>
    %c0_32 = arith.constant 0 : index
    %c0_33 = arith.constant 0 : index
    %c0_34 = arith.constant 0 : index
    %39 = vector.load %arg5[%c0_32, %c0_33, %c0_34] : memref<2x16x64xf32, #tpu.memory_space<vmem>>, vector<1x16x64xf32>
    %40 = vector.shape_cast %39 : vector<1x16x64xf32> to vector<16x64xf32>
    %41 = vector.shape_cast %31 : vector<16x64xf32> to vector<1x16x64xf32>
    tpu.vector_store %arg5[%c0_32, %c0_33, %c0_34], %41 {strides = array<i32>} : memref<2x16x64xf32, #tpu.memory_space<vmem>>, vector<1x16x64xf32>,
    %c1_35 = arith.constant 1 : index
    %c0_36 = arith.constant 0 : index
    %c0_37 = arith.constant 0 : index
    %42 = vector.load %arg1[%c1_35, %c0_36, %c0_37] : memref<2x16x128xf32, #tpu.memory_space<vmem>>, vector<1x16x128xf32>
    %43 = vector.shape_cast %42 : vector<1x16x128xf32> to vector<16x128xf32>
    %44 = vector.broadcast %7 : vector<1x128xf32> to vector<16x128xf32>
    %45 = arith.mulf %43, %44 : vector<16x128xf32>
    %46 = vector.broadcast %8 : vector<1x128xf32> to vector<16x128xf32>
    %47 = arith.addf %45, %46 : vector<16x128xf32>
    %cst_38 = arith.constant 0.000000e+00 : f32
    %48 = vector.broadcast %cst_38 : f32 to vector<16x128xf32>
    %49 = arith.maximumf %47, %48 : vector<16x128xf32>
    %c18 = arith.constant 18 : index
    %c0_39 = arith.constant 0 : index
    %50 = vector.load %arg7[%c18, %c0_39] : memref<36x128xf32, #tpu.memory_space<vmem>>, vector<1x128xf32>
    tpu.vector_store %arg7[%c18, %c0_39], %9 {strides = array<i32>} : memref<36x128xf32, #tpu.memory_space<vmem>>, vector<1x128xf32>,
    %c35 = arith.constant 35 : index
    %c0_40 = arith.constant 0 : index
    %51 = vector.load %arg7[%c35, %c0_40] : memref<36x128xf32, #tpu.memory_space<vmem>>, vector<1x128xf32>
    tpu.vector_store %arg7[%c35, %c0_40], %9 {strides = array<i32>} : memref<36x128xf32, #tpu.memory_space<vmem>>, vector<1x128xf32>,
    %c19 = arith.constant 19 : index
    %c0_41 = arith.constant 0 : index
    %52 = vector.load %arg7[%c19, %c0_41] : memref<36x128xf32, #tpu.memory_space<vmem>>, vector<16x128xf32>
    tpu.vector_store %arg7[%c19, %c0_41], %49 {strides = array<i32>} : memref<36x128xf32, #tpu.memory_space<vmem>>, vector<16x128xf32>,
    %cst_42 = arith.constant dense<0.000000e+00> : vector<16x64xf32>
    %53 = tpu.matmul %49, %3, %cst_42 {dimension_numbers = #tpu.dot_dimension_numbers<[1], [0], [0], [1], [0, 0, 1, 1], [], []>} : vector<16x128xf32>, vector<128x64xf32>, vector<16x64xf32> -> vector<16x64xf32>
    %c18_43 = arith.constant 18 : index
    %c0_44 = arith.constant 0 : index
    %54 = vector.load %arg7[%c18_43, %c0_44] : memref<36x128xf32, #tpu.memory_space<vmem>>, vector<16x128xf32>
    %cst_45 = arith.constant dense<0.000000e+00> : vector<16x64xf32>
    %55 = tpu.matmul %54, %1, %cst_45 {dimension_numbers = #tpu.dot_dimension_numbers<[1], [0], [0], [1], [0, 0, 1, 1], [], []>} : vector<16x128xf32>, vector<128x64xf32>, vector<16x64xf32> -> vector<16x64xf32>
    %56 = arith.addf %53, %55 : vector<16x64xf32>
    %c20 = arith.constant 20 : index
    %c0_46 = arith.constant 0 : index
    %57 = vector.load %arg7[%c20, %c0_46] : memref<36x128xf32, #tpu.memory_space<vmem>>, vector<16x128xf32>
    %cst_47 = arith.constant dense<0.000000e+00> : vector<16x64xf32>
    %58 = tpu.matmul %57, %5, %cst_47 {dimension_numbers = #tpu.dot_dimension_numbers<[1], [0], [0], [1], [0, 0, 1, 1], [], []>} : vector<16x128xf32>, vector<128x64xf32>, vector<16x64xf32> -> vector<16x64xf32>
    %59 = arith.addf %56, %58 : vector<16x64xf32>
    %60 = vector.broadcast %6 : vector<1x64xf32> to vector<16x64xf32>
    %61 = arith.addf %59, %60 : vector<16x64xf32>
    %cst_48 = arith.constant dense<0.000000e+00> : vector<64xf32>
    %62 = vector.multi_reduction <add>, %61, %cst_48 [0] : vector<16x64xf32> to vector<64xf32>
    %63 = vector.shape_cast %62 : vector<64xf32> to vector<1x64xf32>
    %64 = arith.addf %34, %63 : vector<1x64xf32>
    %65 = arith.mulf %61, %61 : vector<16x64xf32>
    %cst_49 = arith.constant dense<0.000000e+00> : vector<64xf32>
    %66 = vector.multi_reduction <add>, %65, %cst_49 [0] : vector<16x64xf32> to vector<64xf32>
    %67 = vector.shape_cast %66 : vector<64xf32> to vector<1x64xf32>
    %68 = arith.addf %38, %67 : vector<1x64xf32>
    %c1_50 = arith.constant 1 : index
    %c0_51 = arith.constant 0 : index
    %c0_52 = arith.constant 0 : index
    %69 = vector.load %arg5[%c1_50, %c0_51, %c0_52] : memref<2x16x64xf32, #tpu.memory_space<vmem>>, vector<1x16x64xf32>
    %70 = vector.shape_cast %69 : vector<1x16x64xf32> to vector<16x64xf32>
    %71 = vector.shape_cast %61 : vector<16x64xf32> to vector<1x16x64xf32>
    tpu.vector_store %arg5[%c1_50, %c0_51, %c0_52], %71 {strides = array<i32>} : memref<2x16x64xf32, #tpu.memory_space<vmem>>, vector<1x16x64xf32>,
    %72 = tpu.concatenate %64, %68 in 0 : vector<1x64xf32>, vector<1x64xf32> -> vector<2x64xf32>
    %c0_53 = arith.constant 0 : index
    %c0_54 = arith.constant 0 : index
    %c0_55 = arith.constant 0 : index
    %73 = vector.load %arg6[%c0_53, %c0_54, %c0_55] : memref<1x2x64xf32, #tpu.memory_space<vmem>>, vector<1x2x64xf32>
    %74 = vector.shape_cast %73 : vector<1x2x64xf32> to vector<2x64xf32>
    %75 = vector.shape_cast %72 : vector<2x64xf32> to vector<1x2x64xf32>
    tpu.vector_store %arg6[%c0_53, %c0_54, %c0_55], %75 {strides = array<i32>} : memref<1x2x64xf32, #tpu.memory_space<vmem>>, vector<1x2x64xf32>,
    return
  }
  func.func @transform_0(%arg0: i32) -> (i32, i32, i32) {
    %c0_i32 = arith.constant 0 : i32
    %c0_i32_0 = arith.constant 0 : i32
    %c0_i32_1 = arith.constant 0 : i32
    return %arg0, %c0_i32, %c0_i32_0 : i32, i32, i32
  }
  func.func @transform_1(%arg0: i32) -> (i32, i32) {
    %c0_i32 = arith.constant 0 : i32
    %c0_i32_0 = arith.constant 0 : i32
    %c0_i32_1 = arith.constant 0 : i32
    return %c0_i32, %c0_i32_0 : i32, i32
  }
  func.func @transform_2(%arg0: i32) -> (i32, i32, i32) {
    %c0_i32 = arith.constant 0 : i32
    %c0_i32_0 = arith.constant 0 : i32
    %c0_i32_1 = arith.constant 0 : i32
    %c0_i32_2 = arith.constant 0 : i32
    return %c0_i32, %c0_i32_0, %c0_i32_1 : i32, i32, i32
  }
  func.func @transform_3(%arg0: i32) -> (i32, i32) {
    %c0_i32 = arith.constant 0 : i32
    %c0_i32_0 = arith.constant 0 : i32
    %c0_i32_1 = arith.constant 0 : i32
    return %c0_i32, %c0_i32_0 : i32, i32
  }
  func.func @transform_4(%arg0: i32) -> (i32, i32, i32) {
    %c0_i32 = arith.constant 0 : i32
    %c0_i32_0 = arith.constant 0 : i32
    %c0_i32_1 = arith.constant 0 : i32
    return %arg0, %c0_i32, %c0_i32_0 : i32, i32, i32
  }
  func.func @transform_5(%arg0: i32) -> (i32, i32, i32) {
    %c0_i32 = arith.constant 0 : i32
    %c0_i32_0 = arith.constant 0 : i32
    %c0_i32_1 = arith.constant 0 : i32
    return %arg0, %c0_i32, %c0_i32_0 : i32, i32, i32
  }
}

module attributes {stable_mosaic.version = 11 : i64} {
  func.func @kernel(%arg0: i32, %arg1: memref<2x16x64xf32, #tpu.memory_space<vmem>>, %arg2: memref<2x64xf32, #tpu.memory_space<vmem>>, %arg3: memref<3x64x128xf32, #tpu.memory_space<vmem>>, %arg4: memref<1x128xf32, #tpu.memory_space<vmem>>, %arg5: memref<2x16x128xf32, #tpu.memory_space<vmem>>, %arg6: memref<1x2x128xf32, #tpu.memory_space<vmem>>, %arg7: memref<36x64xf32, #tpu.memory_space<vmem>>) attributes {dimension_semantics = [#tpu.dimension_semantics<parallel>], iteration_bounds = array<i64: 1>, scalar_prefetch = 0 : i64, scratch_operands = 1 : i64, tpu.core_type = #tpu.core_type<tc>, window_params = [{transform_indices = @transform_0, window_bounds = array<i64: 2, 16, 64>}, {pipeline_mode = #tpu.pipeline_mode<synchronous>, transform_indices = @transform_1, window_bounds = array<i64: 2, 64>}, {pipeline_mode = #tpu.pipeline_mode<synchronous>, transform_indices = @transform_2, window_bounds = array<i64: 3, 64, 128>}, {pipeline_mode = #tpu.pipeline_mode<synchronous>, transform_indices = @transform_3, window_bounds = array<i64: 1, 128>}, {transform_indices = @transform_4, window_bounds = array<i64: 2, 16, 128>}, {transform_indices = @transform_5, window_bounds = array<i64: 1, 2, 128>}]} {
    %c0 = arith.constant 0 : index
    %c0_0 = arith.constant 0 : index
    %c0_1 = arith.constant 0 : index
    %0 = vector.load %arg3[%c0, %c0_0, %c0_1] : memref<3x64x128xf32, #tpu.memory_space<vmem>>, vector<1x64x128xf32>
    %1 = vector.shape_cast %0 : vector<1x64x128xf32> to vector<64x128xf32>
    %c1 = arith.constant 1 : index
    %c0_2 = arith.constant 0 : index
    %c0_3 = arith.constant 0 : index
    %2 = vector.load %arg3[%c1, %c0_2, %c0_3] : memref<3x64x128xf32, #tpu.memory_space<vmem>>, vector<1x64x128xf32>
    %3 = vector.shape_cast %2 : vector<1x64x128xf32> to vector<64x128xf32>
    %c2 = arith.constant 2 : index
    %c0_4 = arith.constant 0 : index
    %c0_5 = arith.constant 0 : index
    %4 = vector.load %arg3[%c2, %c0_4, %c0_5] : memref<3x64x128xf32, #tpu.memory_space<vmem>>, vector<1x64x128xf32>
    %5 = vector.shape_cast %4 : vector<1x64x128xf32> to vector<64x128xf32>
    %c0_6 = arith.constant 0 : index
    %c0_7 = arith.constant 0 : index
    %6 = vector.load %arg4[%c0_6, %c0_7] : memref<1x128xf32, #tpu.memory_space<vmem>>, vector<1x128xf32>
    %c0_8 = arith.constant 0 : index
    %c0_9 = arith.constant 0 : index
    %7 = vector.load %arg2[%c0_8, %c0_9] : memref<2x64xf32, #tpu.memory_space<vmem>>, vector<1x64xf32>
    %c1_10 = arith.constant 1 : index
    %c0_11 = arith.constant 0 : index
    %8 = vector.load %arg2[%c1_10, %c0_11] : memref<2x64xf32, #tpu.memory_space<vmem>>, vector<1x64xf32>
    %cst = arith.constant 0.000000e+00 : f32
    %9 = vector.broadcast %cst : f32 to vector<1x64xf32>
    %cst_12 = arith.constant 0.000000e+00 : f32
    %10 = vector.broadcast %cst_12 : f32 to vector<1x128xf32>
    %cst_13 = arith.constant 0.000000e+00 : f32
    %11 = vector.broadcast %cst_13 : f32 to vector<1x128xf32>
    %c0_14 = arith.constant 0 : index
    %c0_15 = arith.constant 0 : index
    %c0_16 = arith.constant 0 : index
    %12 = vector.load %arg1[%c0_14, %c0_15, %c0_16] : memref<2x16x64xf32, #tpu.memory_space<vmem>>, vector<1x16x64xf32>
    %13 = vector.shape_cast %12 : vector<1x16x64xf32> to vector<16x64xf32>
    %14 = vector.broadcast %7 : vector<1x64xf32> to vector<16x64xf32>
    %15 = arith.mulf %13, %14 : vector<16x64xf32>
    %16 = vector.broadcast %8 : vector<1x64xf32> to vector<16x64xf32>
    %17 = arith.addf %15, %16 : vector<16x64xf32>
    %cst_17 = arith.constant 0.000000e+00 : f32
    %18 = vector.broadcast %cst_17 : f32 to vector<16x64xf32>
    %19 = arith.maximumf %17, %18 : vector<16x64xf32>
    %c0_18 = arith.constant 0 : index
    %c0_19 = arith.constant 0 : index
    %20 = vector.load %arg7[%c0_18, %c0_19] : memref<36x64xf32, #tpu.memory_space<vmem>>, vector<1x64xf32>
    tpu.vector_store %arg7[%c0_18, %c0_19], %9 {strides = array<i32>} : memref<36x64xf32, #tpu.memory_space<vmem>>, vector<1x64xf32>,
    %c17 = arith.constant 17 : index
    %c0_20 = arith.constant 0 : index
    %21 = vector.load %arg7[%c17, %c0_20] : memref<36x64xf32, #tpu.memory_space<vmem>>, vector<1x64xf32>
    tpu.vector_store %arg7[%c17, %c0_20], %9 {strides = array<i32>} : memref<36x64xf32, #tpu.memory_space<vmem>>, vector<1x64xf32>,
    %c1_21 = arith.constant 1 : index
    %c0_22 = arith.constant 0 : index
    %22 = vector.load %arg7[%c1_21, %c0_22] : memref<36x64xf32, #tpu.memory_space<vmem>>, vector<16x64xf32>
    tpu.vector_store %arg7[%c1_21, %c0_22], %19 {strides = array<i32>} : memref<36x64xf32, #tpu.memory_space<vmem>>, vector<16x64xf32>,
    %cst_23 = arith.constant dense<0.000000e+00> : vector<16x128xf32>
    %23 = tpu.matmul %19, %3, %cst_23 {dimension_numbers = #tpu.dot_dimension_numbers<[1], [0], [0], [1], [0, 0, 1, 1], [], []>} : vector<16x64xf32>, vector<64x128xf32>, vector<16x128xf32> -> vector<16x128xf32>
    %c0_24 = arith.constant 0 : index
    %c0_25 = arith.constant 0 : index
    %24 = vector.load %arg7[%c0_24, %c0_25] : memref<36x64xf32, #tpu.memory_space<vmem>>, vector<16x64xf32>
    %cst_26 = arith.constant dense<0.000000e+00> : vector<16x128xf32>
    %25 = tpu.matmul %24, %1, %cst_26 {dimension_numbers = #tpu.dot_dimension_numbers<[1], [0], [0], [1], [0, 0, 1, 1], [], []>} : vector<16x64xf32>, vector<64x128xf32>, vector<16x128xf32> -> vector<16x128xf32>
    %26 = arith.addf %23, %25 : vector<16x128xf32>
    %c2_27 = arith.constant 2 : index
    %c0_28 = arith.constant 0 : index
    %27 = vector.load %arg7[%c2_27, %c0_28] : memref<36x64xf32, #tpu.memory_space<vmem>>, vector<16x64xf32>
    %cst_29 = arith.constant dense<0.000000e+00> : vector<16x128xf32>
    %28 = tpu.matmul %27, %5, %cst_29 {dimension_numbers = #tpu.dot_dimension_numbers<[1], [0], [0], [1], [0, 0, 1, 1], [], []>} : vector<16x64xf32>, vector<64x128xf32>, vector<16x128xf32> -> vector<16x128xf32>
    %29 = arith.addf %26, %28 : vector<16x128xf32>
    %30 = vector.broadcast %6 : vector<1x128xf32> to vector<16x128xf32>
    %31 = arith.addf %29, %30 : vector<16x128xf32>
    %cst_30 = arith.constant dense<0.000000e+00> : vector<128xf32>
    %32 = vector.multi_reduction <add>, %31, %cst_30 [0] : vector<16x128xf32> to vector<128xf32>
    %33 = vector.shape_cast %32 : vector<128xf32> to vector<1x128xf32>
    %34 = arith.addf %10, %33 : vector<1x128xf32>
    %35 = arith.mulf %31, %31 : vector<16x128xf32>
    %cst_31 = arith.constant dense<0.000000e+00> : vector<128xf32>
    %36 = vector.multi_reduction <add>, %35, %cst_31 [0] : vector<16x128xf32> to vector<128xf32>
    %37 = vector.shape_cast %36 : vector<128xf32> to vector<1x128xf32>
    %38 = arith.addf %11, %37 : vector<1x128xf32>
    %c0_32 = arith.constant 0 : index
    %c0_33 = arith.constant 0 : index
    %c0_34 = arith.constant 0 : index
    %39 = vector.load %arg5[%c0_32, %c0_33, %c0_34] : memref<2x16x128xf32, #tpu.memory_space<vmem>>, vector<1x16x128xf32>
    %40 = vector.shape_cast %39 : vector<1x16x128xf32> to vector<16x128xf32>
    %41 = vector.shape_cast %31 : vector<16x128xf32> to vector<1x16x128xf32>
    tpu.vector_store %arg5[%c0_32, %c0_33, %c0_34], %41 {strides = array<i32>} : memref<2x16x128xf32, #tpu.memory_space<vmem>>, vector<1x16x128xf32>,
    %c1_35 = arith.constant 1 : index
    %c0_36 = arith.constant 0 : index
    %c0_37 = arith.constant 0 : index
    %42 = vector.load %arg1[%c1_35, %c0_36, %c0_37] : memref<2x16x64xf32, #tpu.memory_space<vmem>>, vector<1x16x64xf32>
    %43 = vector.shape_cast %42 : vector<1x16x64xf32> to vector<16x64xf32>
    %44 = vector.broadcast %7 : vector<1x64xf32> to vector<16x64xf32>
    %45 = arith.mulf %43, %44 : vector<16x64xf32>
    %46 = vector.broadcast %8 : vector<1x64xf32> to vector<16x64xf32>
    %47 = arith.addf %45, %46 : vector<16x64xf32>
    %cst_38 = arith.constant 0.000000e+00 : f32
    %48 = vector.broadcast %cst_38 : f32 to vector<16x64xf32>
    %49 = arith.maximumf %47, %48 : vector<16x64xf32>
    %c18 = arith.constant 18 : index
    %c0_39 = arith.constant 0 : index
    %50 = vector.load %arg7[%c18, %c0_39] : memref<36x64xf32, #tpu.memory_space<vmem>>, vector<1x64xf32>
    tpu.vector_store %arg7[%c18, %c0_39], %9 {strides = array<i32>} : memref<36x64xf32, #tpu.memory_space<vmem>>, vector<1x64xf32>,
    %c35 = arith.constant 35 : index
    %c0_40 = arith.constant 0 : index
    %51 = vector.load %arg7[%c35, %c0_40] : memref<36x64xf32, #tpu.memory_space<vmem>>, vector<1x64xf32>
    tpu.vector_store %arg7[%c35, %c0_40], %9 {strides = array<i32>} : memref<36x64xf32, #tpu.memory_space<vmem>>, vector<1x64xf32>,
    %c19 = arith.constant 19 : index
    %c0_41 = arith.constant 0 : index
    %52 = vector.load %arg7[%c19, %c0_41] : memref<36x64xf32, #tpu.memory_space<vmem>>, vector<16x64xf32>
    tpu.vector_store %arg7[%c19, %c0_41], %49 {strides = array<i32>} : memref<36x64xf32, #tpu.memory_space<vmem>>, vector<16x64xf32>,
    %cst_42 = arith.constant dense<0.000000e+00> : vector<16x128xf32>
    %53 = tpu.matmul %49, %3, %cst_42 {dimension_numbers = #tpu.dot_dimension_numbers<[1], [0], [0], [1], [0, 0, 1, 1], [], []>} : vector<16x64xf32>, vector<64x128xf32>, vector<16x128xf32> -> vector<16x128xf32>
    %c18_43 = arith.constant 18 : index
    %c0_44 = arith.constant 0 : index
    %54 = vector.load %arg7[%c18_43, %c0_44] : memref<36x64xf32, #tpu.memory_space<vmem>>, vector<16x64xf32>
    %cst_45 = arith.constant dense<0.000000e+00> : vector<16x128xf32>
    %55 = tpu.matmul %54, %1, %cst_45 {dimension_numbers = #tpu.dot_dimension_numbers<[1], [0], [0], [1], [0, 0, 1, 1], [], []>} : vector<16x64xf32>, vector<64x128xf32>, vector<16x128xf32> -> vector<16x128xf32>
    %56 = arith.addf %53, %55 : vector<16x128xf32>
    %c20 = arith.constant 20 : index
    %c0_46 = arith.constant 0 : index
    %57 = vector.load %arg7[%c20, %c0_46] : memref<36x64xf32, #tpu.memory_space<vmem>>, vector<16x64xf32>
    %cst_47 = arith.constant dense<0.000000e+00> : vector<16x128xf32>
    %58 = tpu.matmul %57, %5, %cst_47 {dimension_numbers = #tpu.dot_dimension_numbers<[1], [0], [0], [1], [0, 0, 1, 1], [], []>} : vector<16x64xf32>, vector<64x128xf32>, vector<16x128xf32> -> vector<16x128xf32>
    %59 = arith.addf %56, %58 : vector<16x128xf32>
    %60 = vector.broadcast %6 : vector<1x128xf32> to vector<16x128xf32>
    %61 = arith.addf %59, %60 : vector<16x128xf32>
    %cst_48 = arith.constant dense<0.000000e+00> : vector<128xf32>
    %62 = vector.multi_reduction <add>, %61, %cst_48 [0] : vector<16x128xf32> to vector<128xf32>
    %63 = vector.shape_cast %62 : vector<128xf32> to vector<1x128xf32>
    %64 = arith.addf %34, %63 : vector<1x128xf32>
    %65 = arith.mulf %61, %61 : vector<16x128xf32>
    %cst_49 = arith.constant dense<0.000000e+00> : vector<128xf32>
    %66 = vector.multi_reduction <add>, %65, %cst_49 [0] : vector<16x128xf32> to vector<128xf32>
    %67 = vector.shape_cast %66 : vector<128xf32> to vector<1x128xf32>
    %68 = arith.addf %38, %67 : vector<1x128xf32>
    %c1_50 = arith.constant 1 : index
    %c0_51 = arith.constant 0 : index
    %c0_52 = arith.constant 0 : index
    %69 = vector.load %arg5[%c1_50, %c0_51, %c0_52] : memref<2x16x128xf32, #tpu.memory_space<vmem>>, vector<1x16x128xf32>
    %70 = vector.shape_cast %69 : vector<1x16x128xf32> to vector<16x128xf32>
    %71 = vector.shape_cast %61 : vector<16x128xf32> to vector<1x16x128xf32>
    tpu.vector_store %arg5[%c1_50, %c0_51, %c0_52], %71 {strides = array<i32>} : memref<2x16x128xf32, #tpu.memory_space<vmem>>, vector<1x16x128xf32>,
    %72 = tpu.concatenate %64, %68 in 0 : vector<1x128xf32>, vector<1x128xf32> -> vector<2x128xf32>
    %c0_53 = arith.constant 0 : index
    %c0_54 = arith.constant 0 : index
    %c0_55 = arith.constant 0 : index
    %73 = vector.load %arg6[%c0_53, %c0_54, %c0_55] : memref<1x2x128xf32, #tpu.memory_space<vmem>>, vector<1x2x128xf32>
    %74 = vector.shape_cast %73 : vector<1x2x128xf32> to vector<2x128xf32>
    %75 = vector.shape_cast %72 : vector<2x128xf32> to vector<1x2x128xf32>
    tpu.vector_store %arg6[%c0_53, %c0_54, %c0_55], %75 {strides = array<i32>} : memref<1x2x128xf32, #tpu.memory_space<vmem>>, vector<1x2x128xf32>,
    return
  }
  func.func @transform_0(%arg0: i32) -> (i32, i32, i32) {
    %c0_i32 = arith.constant 0 : i32
    %c0_i32_0 = arith.constant 0 : i32
    %c0_i32_1 = arith.constant 0 : i32
    return %arg0, %c0_i32, %c0_i32_0 : i32, i32, i32
  }
  func.func @transform_1(%arg0: i32) -> (i32, i32) {
    %c0_i32 = arith.constant 0 : i32
    %c0_i32_0 = arith.constant 0 : i32
    %c0_i32_1 = arith.constant 0 : i32
    return %c0_i32, %c0_i32_0 : i32, i32
  }
  func.func @transform_2(%arg0: i32) -> (i32, i32, i32) {
    %c0_i32 = arith.constant 0 : i32
    %c0_i32_0 = arith.constant 0 : i32
    %c0_i32_1 = arith.constant 0 : i32
    %c0_i32_2 = arith.constant 0 : i32
    return %c0_i32, %c0_i32_0, %c0_i32_1 : i32, i32, i32
  }
  func.func @transform_3(%arg0: i32) -> (i32, i32) {
    %c0_i32 = arith.constant 0 : i32
    %c0_i32_0 = arith.constant 0 : i32
    %c0_i32_1 = arith.constant 0 : i32
    return %c0_i32, %c0_i32_0 : i32, i32
  }
  func.func @transform_4(%arg0: i32) -> (i32, i32, i32) {
    %c0_i32 = arith.constant 0 : i32
    %c0_i32_0 = arith.constant 0 : i32
    %c0_i32_1 = arith.constant 0 : i32
    return %arg0, %c0_i32, %c0_i32_0 : i32, i32, i32
  }
  func.func @transform_5(%arg0: i32) -> (i32, i32, i32) {
    %c0_i32 = arith.constant 0 : i32
    %c0_i32_0 = arith.constant 0 : i32
    %c0_i32_1 = arith.constant 0 : i32
    return %arg0, %c0_i32, %c0_i32_0 : i32, i32, i32
  }
}

module attributes {stable_mosaic.version = 11 : i64} {
  func.func @kernel(%arg0: i32, %arg1: memref<2x16x64xf32, #tpu.memory_space<vmem>>, %arg2: memref<2x64xf32, #tpu.memory_space<vmem>>, %arg3: memref<3x64x128xf32, #tpu.memory_space<vmem>>, %arg4: memref<1x128xf32, #tpu.memory_space<vmem>>, %arg5: memref<2x16x128xf32, #tpu.memory_space<vmem>>, %arg6: memref<36x64xf32, #tpu.memory_space<vmem>>) attributes {dimension_semantics = [#tpu.dimension_semantics<parallel>], iteration_bounds = array<i64: 1>, scalar_prefetch = 0 : i64, scratch_operands = 1 : i64, tpu.core_type = #tpu.core_type<tc>, window_params = [{transform_indices = @transform_0, window_bounds = array<i64: 2, 16, 64>}, {pipeline_mode = #tpu.pipeline_mode<synchronous>, transform_indices = @transform_1, window_bounds = array<i64: 2, 64>}, {pipeline_mode = #tpu.pipeline_mode<synchronous>, transform_indices = @transform_2, window_bounds = array<i64: 3, 64, 128>}, {pipeline_mode = #tpu.pipeline_mode<synchronous>, transform_indices = @transform_3, window_bounds = array<i64: 1, 128>}, {transform_indices = @transform_4, window_bounds = array<i64: 2, 16, 128>}]} {
    %c0 = arith.constant 0 : index
    %c0_0 = arith.constant 0 : index
    %c0_1 = arith.constant 0 : index
    %0 = vector.load %arg3[%c0, %c0_0, %c0_1] : memref<3x64x128xf32, #tpu.memory_space<vmem>>, vector<1x64x128xf32>
    %1 = vector.shape_cast %0 : vector<1x64x128xf32> to vector<64x128xf32>
    %c1 = arith.constant 1 : index
    %c0_2 = arith.constant 0 : index
    %c0_3 = arith.constant 0 : index
    %2 = vector.load %arg3[%c1, %c0_2, %c0_3] : memref<3x64x128xf32, #tpu.memory_space<vmem>>, vector<1x64x128xf32>
    %3 = vector.shape_cast %2 : vector<1x64x128xf32> to vector<64x128xf32>
    %c2 = arith.constant 2 : index
    %c0_4 = arith.constant 0 : index
    %c0_5 = arith.constant 0 : index
    %4 = vector.load %arg3[%c2, %c0_4, %c0_5] : memref<3x64x128xf32, #tpu.memory_space<vmem>>, vector<1x64x128xf32>
    %5 = vector.shape_cast %4 : vector<1x64x128xf32> to vector<64x128xf32>
    %c0_6 = arith.constant 0 : index
    %c0_7 = arith.constant 0 : index
    %6 = vector.load %arg4[%c0_6, %c0_7] : memref<1x128xf32, #tpu.memory_space<vmem>>, vector<1x128xf32>
    %c0_8 = arith.constant 0 : index
    %c0_9 = arith.constant 0 : index
    %7 = vector.load %arg2[%c0_8, %c0_9] : memref<2x64xf32, #tpu.memory_space<vmem>>, vector<1x64xf32>
    %c1_10 = arith.constant 1 : index
    %c0_11 = arith.constant 0 : index
    %8 = vector.load %arg2[%c1_10, %c0_11] : memref<2x64xf32, #tpu.memory_space<vmem>>, vector<1x64xf32>
    %cst = arith.constant 0.000000e+00 : f32
    %9 = vector.broadcast %cst : f32 to vector<1x64xf32>
    %c0_12 = arith.constant 0 : index
    %c0_13 = arith.constant 0 : index
    %c0_14 = arith.constant 0 : index
    %10 = vector.load %arg1[%c0_12, %c0_13, %c0_14] : memref<2x16x64xf32, #tpu.memory_space<vmem>>, vector<1x16x64xf32>
    %11 = vector.shape_cast %10 : vector<1x16x64xf32> to vector<16x64xf32>
    %12 = vector.broadcast %7 : vector<1x64xf32> to vector<16x64xf32>
    %13 = arith.mulf %11, %12 : vector<16x64xf32>
    %14 = vector.broadcast %8 : vector<1x64xf32> to vector<16x64xf32>
    %15 = arith.addf %13, %14 : vector<16x64xf32>
    %cst_15 = arith.constant 0.000000e+00 : f32
    %16 = vector.broadcast %cst_15 : f32 to vector<16x64xf32>
    %17 = arith.maximumf %15, %16 : vector<16x64xf32>
    %c0_16 = arith.constant 0 : index
    %c0_17 = arith.constant 0 : index
    %18 = vector.load %arg6[%c0_16, %c0_17] : memref<36x64xf32, #tpu.memory_space<vmem>>, vector<1x64xf32>
    tpu.vector_store %arg6[%c0_16, %c0_17], %9 {strides = array<i32>} : memref<36x64xf32, #tpu.memory_space<vmem>>, vector<1x64xf32>,
    %c17 = arith.constant 17 : index
    %c0_18 = arith.constant 0 : index
    %19 = vector.load %arg6[%c17, %c0_18] : memref<36x64xf32, #tpu.memory_space<vmem>>, vector<1x64xf32>
    tpu.vector_store %arg6[%c17, %c0_18], %9 {strides = array<i32>} : memref<36x64xf32, #tpu.memory_space<vmem>>, vector<1x64xf32>,
    %c1_19 = arith.constant 1 : index
    %c0_20 = arith.constant 0 : index
    %20 = vector.load %arg6[%c1_19, %c0_20] : memref<36x64xf32, #tpu.memory_space<vmem>>, vector<16x64xf32>
    tpu.vector_store %arg6[%c1_19, %c0_20], %17 {strides = array<i32>} : memref<36x64xf32, #tpu.memory_space<vmem>>, vector<16x64xf32>,
    %cst_21 = arith.constant dense<0.000000e+00> : vector<16x128xf32>
    %21 = tpu.matmul %17, %3, %cst_21 {dimension_numbers = #tpu.dot_dimension_numbers<[1], [0], [0], [1], [0, 0, 1, 1], [], []>} : vector<16x64xf32>, vector<64x128xf32>, vector<16x128xf32> -> vector<16x128xf32>
    %c0_22 = arith.constant 0 : index
    %c0_23 = arith.constant 0 : index
    %22 = vector.load %arg6[%c0_22, %c0_23] : memref<36x64xf32, #tpu.memory_space<vmem>>, vector<16x64xf32>
    %cst_24 = arith.constant dense<0.000000e+00> : vector<16x128xf32>
    %23 = tpu.matmul %22, %1, %cst_24 {dimension_numbers = #tpu.dot_dimension_numbers<[1], [0], [0], [1], [0, 0, 1, 1], [], []>} : vector<16x64xf32>, vector<64x128xf32>, vector<16x128xf32> -> vector<16x128xf32>
    %24 = arith.addf %21, %23 : vector<16x128xf32>
    %c2_25 = arith.constant 2 : index
    %c0_26 = arith.constant 0 : index
    %25 = vector.load %arg6[%c2_25, %c0_26] : memref<36x64xf32, #tpu.memory_space<vmem>>, vector<16x64xf32>
    %cst_27 = arith.constant dense<0.000000e+00> : vector<16x128xf32>
    %26 = tpu.matmul %25, %5, %cst_27 {dimension_numbers = #tpu.dot_dimension_numbers<[1], [0], [0], [1], [0, 0, 1, 1], [], []>} : vector<16x64xf32>, vector<64x128xf32>, vector<16x128xf32> -> vector<16x128xf32>
    %27 = arith.addf %24, %26 : vector<16x128xf32>
    %28 = vector.broadcast %6 : vector<1x128xf32> to vector<16x128xf32>
    %29 = arith.addf %27, %28 : vector<16x128xf32>
    %c0_28 = arith.constant 0 : index
    %c0_29 = arith.constant 0 : index
    %c0_30 = arith.constant 0 : index
    %30 = vector.load %arg5[%c0_28, %c0_29, %c0_30] : memref<2x16x128xf32, #tpu.memory_space<vmem>>, vector<1x16x128xf32>
    %31 = vector.shape_cast %30 : vector<1x16x128xf32> to vector<16x128xf32>
    %32 = vector.shape_cast %29 : vector<16x128xf32> to vector<1x16x128xf32>
    tpu.vector_store %arg5[%c0_28, %c0_29, %c0_30], %32 {strides = array<i32>} : memref<2x16x128xf32, #tpu.memory_space<vmem>>, vector<1x16x128xf32>,
    %c1_31 = arith.constant 1 : index
    %c0_32 = arith.constant 0 : index
    %c0_33 = arith.constant 0 : index
    %33 = vector.load %arg1[%c1_31, %c0_32, %c0_33] : memref<2x16x64xf32, #tpu.memory_space<vmem>>, vector<1x16x64xf32>
    %34 = vector.shape_cast %33 : vector<1x16x64xf32> to vector<16x64xf32>
    %35 = vector.broadcast %7 : vector<1x64xf32> to vector<16x64xf32>
    %36 = arith.mulf %34, %35 : vector<16x64xf32>
    %37 = vector.broadcast %8 : vector<1x64xf32> to vector<16x64xf32>
    %38 = arith.addf %36, %37 : vector<16x64xf32>
    %cst_34 = arith.constant 0.000000e+00 : f32
    %39 = vector.broadcast %cst_34 : f32 to vector<16x64xf32>
    %40 = arith.maximumf %38, %39 : vector<16x64xf32>
    %c18 = arith.constant 18 : index
    %c0_35 = arith.constant 0 : index
    %41 = vector.load %arg6[%c18, %c0_35] : memref<36x64xf32, #tpu.memory_space<vmem>>, vector<1x64xf32>
    tpu.vector_store %arg6[%c18, %c0_35], %9 {strides = array<i32>} : memref<36x64xf32, #tpu.memory_space<vmem>>, vector<1x64xf32>,
    %c35 = arith.constant 35 : index
    %c0_36 = arith.constant 0 : index
    %42 = vector.load %arg6[%c35, %c0_36] : memref<36x64xf32, #tpu.memory_space<vmem>>, vector<1x64xf32>
    tpu.vector_store %arg6[%c35, %c0_36], %9 {strides = array<i32>} : memref<36x64xf32, #tpu.memory_space<vmem>>, vector<1x64xf32>,
    %c19 = arith.constant 19 : index
    %c0_37 = arith.constant 0 : index
    %43 = vector.load %arg6[%c19, %c0_37] : memref<36x64xf32, #tpu.memory_space<vmem>>, vector<16x64xf32>
    tpu.vector_store %arg6[%c19, %c0_37], %40 {strides = array<i32>} : memref<36x64xf32, #tpu.memory_space<vmem>>, vector<16x64xf32>,
    %cst_38 = arith.constant dense<0.000000e+00> : vector<16x128xf32>
    %44 = tpu.matmul %40, %3, %cst_38 {dimension_numbers = #tpu.dot_dimension_numbers<[1], [0], [0], [1], [0, 0, 1, 1], [], []>} : vector<16x64xf32>, vector<64x128xf32>, vector<16x128xf32> -> vector<16x128xf32>
    %c18_39 = arith.constant 18 : index
    %c0_40 = arith.constant 0 : index
    %45 = vector.load %arg6[%c18_39, %c0_40] : memref<36x64xf32, #tpu.memory_space<vmem>>, vector<16x64xf32>
    %cst_41 = arith.constant dense<0.000000e+00> : vector<16x128xf32>
    %46 = tpu.matmul %45, %1, %cst_41 {dimension_numbers = #tpu.dot_dimension_numbers<[1], [0], [0], [1], [0, 0, 1, 1], [], []>} : vector<16x64xf32>, vector<64x128xf32>, vector<16x128xf32> -> vector<16x128xf32>
    %47 = arith.addf %44, %46 : vector<16x128xf32>
    %c20 = arith.constant 20 : index
    %c0_42 = arith.constant 0 : index
    %48 = vector.load %arg6[%c20, %c0_42] : memref<36x64xf32, #tpu.memory_space<vmem>>, vector<16x64xf32>
    %cst_43 = arith.constant dense<0.000000e+00> : vector<16x128xf32>
    %49 = tpu.matmul %48, %5, %cst_43 {dimension_numbers = #tpu.dot_dimension_numbers<[1], [0], [0], [1], [0, 0, 1, 1], [], []>} : vector<16x64xf32>, vector<64x128xf32>, vector<16x128xf32> -> vector<16x128xf32>
    %50 = arith.addf %47, %49 : vector<16x128xf32>
    %51 = vector.broadcast %6 : vector<1x128xf32> to vector<16x128xf32>
    %52 = arith.addf %50, %51 : vector<16x128xf32>
    %c1_44 = arith.constant 1 : index
    %c0_45 = arith.constant 0 : index
    %c0_46 = arith.constant 0 : index
    %53 = vector.load %arg5[%c1_44, %c0_45, %c0_46] : memref<2x16x128xf32, #tpu.memory_space<vmem>>, vector<1x16x128xf32>
    %54 = vector.shape_cast %53 : vector<1x16x128xf32> to vector<16x128xf32>
    %55 = vector.shape_cast %52 : vector<16x128xf32> to vector<1x16x128xf32>
    tpu.vector_store %arg5[%c1_44, %c0_45, %c0_46], %55 {strides = array<i32>} : memref<2x16x128xf32, #tpu.memory_space<vmem>>, vector<1x16x128xf32>,
    return
  }
  func.func @transform_0(%arg0: i32) -> (i32, i32, i32) {
    %c0_i32 = arith.constant 0 : i32
    %c0_i32_0 = arith.constant 0 : i32
    %c0_i32_1 = arith.constant 0 : i32
    return %arg0, %c0_i32, %c0_i32_0 : i32, i32, i32
  }
  func.func @transform_1(%arg0: i32) -> (i32, i32) {
    %c0_i32 = arith.constant 0 : i32
    %c0_i32_0 = arith.constant 0 : i32
    %c0_i32_1 = arith.constant 0 : i32
    return %c0_i32, %c0_i32_0 : i32, i32
  }
  func.func @transform_2(%arg0: i32) -> (i32, i32, i32) {
    %c0_i32 = arith.constant 0 : i32
    %c0_i32_0 = arith.constant 0 : i32
    %c0_i32_1 = arith.constant 0 : i32
    %c0_i32_2 = arith.constant 0 : i32
    return %c0_i32, %c0_i32_0, %c0_i32_1 : i32, i32, i32
  }
  func.func @transform_3(%arg0: i32) -> (i32, i32) {
    %c0_i32 = arith.constant 0 : i32
    %c0_i32_0 = arith.constant 0 : i32
    %c0_i32_1 = arith.constant 0 : i32
    return %c0_i32, %c0_i32_0 : i32, i32
  }
  func.func @transform_4(%arg0: i32) -> (i32, i32, i32) {
    %c0_i32 = arith.constant 0 : i32
    %c0_i32_0 = arith.constant 0 : i32
    %c0_i32_1 = arith.constant 0 : i32
    return %arg0, %c0_i32, %c0_i32_0 : i32, i32, i32
  }
}

module attributes {stable_mosaic.version = 11 : i64} {
  func.func @kernel(%arg0: i32, %arg1: memref<2x16x128xf32, #tpu.memory_space<vmem>>, %arg2: memref<3x128x64xf32, #tpu.memory_space<vmem>>, %arg3: memref<1x64xf32, #tpu.memory_space<vmem>>, %arg4: memref<2x16x64xf32, #tpu.memory_space<vmem>>, %arg5: memref<2x16x64xf32, #tpu.memory_space<vmem>>, %arg6: memref<36x128xf32, #tpu.memory_space<vmem>>) attributes {dimension_semantics = [#tpu.dimension_semantics<parallel>], iteration_bounds = array<i64: 1>, scalar_prefetch = 0 : i64, scratch_operands = 1 : i64, tpu.core_type = #tpu.core_type<tc>, window_params = [{transform_indices = @transform_0, window_bounds = array<i64: 2, 16, 128>}, {pipeline_mode = #tpu.pipeline_mode<synchronous>, transform_indices = @transform_1, window_bounds = array<i64: 3, 128, 64>}, {pipeline_mode = #tpu.pipeline_mode<synchronous>, transform_indices = @transform_2, window_bounds = array<i64: 1, 64>}, {transform_indices = @transform_3, window_bounds = array<i64: 2, 16, 64>}, {transform_indices = @transform_4, window_bounds = array<i64: 2, 16, 64>}]} {
    %c0 = arith.constant 0 : index
    %c0_0 = arith.constant 0 : index
    %c0_1 = arith.constant 0 : index
    %0 = vector.load %arg2[%c0, %c0_0, %c0_1] : memref<3x128x64xf32, #tpu.memory_space<vmem>>, vector<1x128x64xf32>
    %1 = vector.shape_cast %0 : vector<1x128x64xf32> to vector<128x64xf32>
    %c1 = arith.constant 1 : index
    %c0_2 = arith.constant 0 : index
    %c0_3 = arith.constant 0 : index
    %2 = vector.load %arg2[%c1, %c0_2, %c0_3] : memref<3x128x64xf32, #tpu.memory_space<vmem>>, vector<1x128x64xf32>
    %3 = vector.shape_cast %2 : vector<1x128x64xf32> to vector<128x64xf32>
    %c2 = arith.constant 2 : index
    %c0_4 = arith.constant 0 : index
    %c0_5 = arith.constant 0 : index
    %4 = vector.load %arg2[%c2, %c0_4, %c0_5] : memref<3x128x64xf32, #tpu.memory_space<vmem>>, vector<1x128x64xf32>
    %5 = vector.shape_cast %4 : vector<1x128x64xf32> to vector<128x64xf32>
    %c0_6 = arith.constant 0 : index
    %c0_7 = arith.constant 0 : index
    %6 = vector.load %arg3[%c0_6, %c0_7] : memref<1x64xf32, #tpu.memory_space<vmem>>, vector<1x64xf32>
    %cst = arith.constant 0.000000e+00 : f32
    %7 = vector.broadcast %cst : f32 to vector<1x128xf32>
    %c0_8 = arith.constant 0 : index
    %c0_9 = arith.constant 0 : index
    %c0_10 = arith.constant 0 : index
    %8 = vector.load %arg1[%c0_8, %c0_9, %c0_10] : memref<2x16x128xf32, #tpu.memory_space<vmem>>, vector<1x16x128xf32>
    %9 = vector.shape_cast %8 : vector<1x16x128xf32> to vector<16x128xf32>
    %c0_11 = arith.constant 0 : index
    %c0_12 = arith.constant 0 : index
    %10 = vector.load %arg6[%c0_11, %c0_12] : memref<36x128xf32, #tpu.memory_space<vmem>>, vector<1x128xf32>
    tpu.vector_store %arg6[%c0_11, %c0_12], %7 {strides = array<i32>} : memref<36x128xf32, #tpu.memory_space<vmem>>, vector<1x128xf32>,
    %c17 = arith.constant 17 : index
    %c0_13 = arith.constant 0 : index
    %11 = vector.load %arg6[%c17, %c0_13] : memref<36x128xf32, #tpu.memory_space<vmem>>, vector<1x128xf32>
    tpu.vector_store %arg6[%c17, %c0_13], %7 {strides = array<i32>} : memref<36x128xf32, #tpu.memory_space<vmem>>, vector<1x128xf32>,
    %c1_14 = arith.constant 1 : index
    %c0_15 = arith.constant 0 : index
    %12 = vector.load %arg6[%c1_14, %c0_15] : memref<36x128xf32, #tpu.memory_space<vmem>>, vector<16x128xf32>
    tpu.vector_store %arg6[%c1_14, %c0_15], %9 {strides = array<i32>} : memref<36x128xf32, #tpu.memory_space<vmem>>, vector<16x128xf32>,
    %cst_16 = arith.constant dense<0.000000e+00> : vector<16x64xf32>
    %13 = tpu.matmul %9, %3, %cst_16 {dimension_numbers = #tpu.dot_dimension_numbers<[1], [0], [0], [1], [0, 0, 1, 1], [], []>} : vector<16x128xf32>, vector<128x64xf32>, vector<16x64xf32> -> vector<16x64xf32>
    %c0_17 = arith.constant 0 : index
    %c0_18 = arith.constant 0 : index
    %14 = vector.load %arg6[%c0_17, %c0_18] : memref<36x128xf32, #tpu.memory_space<vmem>>, vector<16x128xf32>
    %cst_19 = arith.constant dense<0.000000e+00> : vector<16x64xf32>
    %15 = tpu.matmul %14, %1, %cst_19 {dimension_numbers = #tpu.dot_dimension_numbers<[1], [0], [0], [1], [0, 0, 1, 1], [], []>} : vector<16x128xf32>, vector<128x64xf32>, vector<16x64xf32> -> vector<16x64xf32>
    %16 = arith.addf %13, %15 : vector<16x64xf32>
    %c2_20 = arith.constant 2 : index
    %c0_21 = arith.constant 0 : index
    %17 = vector.load %arg6[%c2_20, %c0_21] : memref<36x128xf32, #tpu.memory_space<vmem>>, vector<16x128xf32>
    %cst_22 = arith.constant dense<0.000000e+00> : vector<16x64xf32>
    %18 = tpu.matmul %17, %5, %cst_22 {dimension_numbers = #tpu.dot_dimension_numbers<[1], [0], [0], [1], [0, 0, 1, 1], [], []>} : vector<16x128xf32>, vector<128x64xf32>, vector<16x64xf32> -> vector<16x64xf32>
    %19 = arith.addf %16, %18 : vector<16x64xf32>
    %20 = vector.broadcast %6 : vector<1x64xf32> to vector<16x64xf32>
    %21 = arith.addf %19, %20 : vector<16x64xf32>
    %c0_23 = arith.constant 0 : index
    %c0_24 = arith.constant 0 : index
    %c0_25 = arith.constant 0 : index
    %22 = vector.load %arg4[%c0_23, %c0_24, %c0_25] : memref<2x16x64xf32, #tpu.memory_space<vmem>>, vector<1x16x64xf32>
    %23 = vector.shape_cast %22 : vector<1x16x64xf32> to vector<16x64xf32>
    %24 = arith.subf %23, %21 : vector<16x64xf32>
    %c0_26 = arith.constant 0 : index
    %c0_27 = arith.constant 0 : index
    %c0_28 = arith.constant 0 : index
    %25 = vector.load %arg5[%c0_26, %c0_27, %c0_28] : memref<2x16x64xf32, #tpu.memory_space<vmem>>, vector<1x16x64xf32>
    %26 = vector.shape_cast %25 : vector<1x16x64xf32> to vector<16x64xf32>
    %27 = vector.shape_cast %24 : vector<16x64xf32> to vector<1x16x64xf32>
    tpu.vector_store %arg5[%c0_26, %c0_27, %c0_28], %27 {strides = array<i32>} : memref<2x16x64xf32, #tpu.memory_space<vmem>>, vector<1x16x64xf32>,
    %c1_29 = arith.constant 1 : index
    %c0_30 = arith.constant 0 : index
    %c0_31 = arith.constant 0 : index
    %28 = vector.load %arg1[%c1_29, %c0_30, %c0_31] : memref<2x16x128xf32, #tpu.memory_space<vmem>>, vector<1x16x128xf32>
    %29 = vector.shape_cast %28 : vector<1x16x128xf32> to vector<16x128xf32>
    %c18 = arith.constant 18 : index
    %c0_32 = arith.constant 0 : index
    %30 = vector.load %arg6[%c18, %c0_32] : memref<36x128xf32, #tpu.memory_space<vmem>>, vector<1x128xf32>
    tpu.vector_store %arg6[%c18, %c0_32], %7 {strides = array<i32>} : memref<36x128xf32, #tpu.memory_space<vmem>>, vector<1x128xf32>,
    %c35 = arith.constant 35 : index
    %c0_33 = arith.constant 0 : index
    %31 = vector.load %arg6[%c35, %c0_33] : memref<36x128xf32, #tpu.memory_space<vmem>>, vector<1x128xf32>
    tpu.vector_store %arg6[%c35, %c0_33], %7 {strides = array<i32>} : memref<36x128xf32, #tpu.memory_space<vmem>>, vector<1x128xf32>,
    %c19 = arith.constant 19 : index
    %c0_34 = arith.constant 0 : index
    %32 = vector.load %arg6[%c19, %c0_34] : memref<36x128xf32, #tpu.memory_space<vmem>>, vector<16x128xf32>
    tpu.vector_store %arg6[%c19, %c0_34], %29 {strides = array<i32>} : memref<36x128xf32, #tpu.memory_space<vmem>>, vector<16x128xf32>,
    %cst_35 = arith.constant dense<0.000000e+00> : vector<16x64xf32>
    %33 = tpu.matmul %29, %3, %cst_35 {dimension_numbers = #tpu.dot_dimension_numbers<[1], [0], [0], [1], [0, 0, 1, 1], [], []>} : vector<16x128xf32>, vector<128x64xf32>, vector<16x64xf32> -> vector<16x64xf32>
    %c18_36 = arith.constant 18 : index
    %c0_37 = arith.constant 0 : index
    %34 = vector.load %arg6[%c18_36, %c0_37] : memref<36x128xf32, #tpu.memory_space<vmem>>, vector<16x128xf32>
    %cst_38 = arith.constant dense<0.000000e+00> : vector<16x64xf32>
    %35 = tpu.matmul %34, %1, %cst_38 {dimension_numbers = #tpu.dot_dimension_numbers<[1], [0], [0], [1], [0, 0, 1, 1], [], []>} : vector<16x128xf32>, vector<128x64xf32>, vector<16x64xf32> -> vector<16x64xf32>
    %36 = arith.addf %33, %35 : vector<16x64xf32>
    %c20 = arith.constant 20 : index
    %c0_39 = arith.constant 0 : index
    %37 = vector.load %arg6[%c20, %c0_39] : memref<36x128xf32, #tpu.memory_space<vmem>>, vector<16x128xf32>
    %cst_40 = arith.constant dense<0.000000e+00> : vector<16x64xf32>
    %38 = tpu.matmul %37, %5, %cst_40 {dimension_numbers = #tpu.dot_dimension_numbers<[1], [0], [0], [1], [0, 0, 1, 1], [], []>} : vector<16x128xf32>, vector<128x64xf32>, vector<16x64xf32> -> vector<16x64xf32>
    %39 = arith.addf %36, %38 : vector<16x64xf32>
    %40 = vector.broadcast %6 : vector<1x64xf32> to vector<16x64xf32>
    %41 = arith.addf %39, %40 : vector<16x64xf32>
    %c1_41 = arith.constant 1 : index
    %c0_42 = arith.constant 0 : index
    %c0_43 = arith.constant 0 : index
    %42 = vector.load %arg4[%c1_41, %c0_42, %c0_43] : memref<2x16x64xf32, #tpu.memory_space<vmem>>, vector<1x16x64xf32>
    %43 = vector.shape_cast %42 : vector<1x16x64xf32> to vector<16x64xf32>
    %44 = arith.subf %43, %41 : vector<16x64xf32>
    %c1_44 = arith.constant 1 : index
    %c0_45 = arith.constant 0 : index
    %c0_46 = arith.constant 0 : index
    %45 = vector.load %arg5[%c1_44, %c0_45, %c0_46] : memref<2x16x64xf32, #tpu.memory_space<vmem>>, vector<1x16x64xf32>
    %46 = vector.shape_cast %45 : vector<1x16x64xf32> to vector<16x64xf32>
    %47 = vector.shape_cast %44 : vector<16x64xf32> to vector<1x16x64xf32>
    tpu.vector_store %arg5[%c1_44, %c0_45, %c0_46], %47 {strides = array<i32>} : memref<2x16x64xf32, #tpu.memory_space<vmem>>, vector<1x16x64xf32>,
    return
  }
  func.func @transform_0(%arg0: i32) -> (i32, i32, i32) {
    %c0_i32 = arith.constant 0 : i32
    %c0_i32_0 = arith.constant 0 : i32
    %c0_i32_1 = arith.constant 0 : i32
    return %arg0, %c0_i32, %c0_i32_0 : i32, i32, i32
  }
  func.func @transform_1(%arg0: i32) -> (i32, i32, i32) {
    %c0_i32 = arith.constant 0 : i32
    %c0_i32_0 = arith.constant 0 : i32
    %c0_i32_1 = arith.constant 0 : i32
    %c0_i32_2 = arith.constant 0 : i32
    return %c0_i32, %c0_i32_0, %c0_i32_1 : i32, i32, i32
  }
  func.func @transform_2(%arg0: i32) -> (i32, i32) {
    %c0_i32 = arith.constant 0 : i32
    %c0_i32_0 = arith.constant 0 : i32
    %c0_i32_1 = arith.constant 0 : i32
    return %c0_i32, %c0_i32_0 : i32, i32
  }
  func.func @transform_3(%arg0: i32) -> (i32, i32, i32) {
    %c0_i32 = arith.constant 0 : i32
    %c0_i32_0 = arith.constant 0 : i32
    %c0_i32_1 = arith.constant 0 : i32
    return %arg0, %c0_i32, %c0_i32_0 : i32, i32, i32
  }
  func.func @transform_4(%arg0: i32) -> (i32, i32, i32) {
    %c0_i32 = arith.constant 0 : i32
    %c0_i32_0 = arith.constant 0 : i32
    %c0_i32_1 = arith.constant 0 : i32
    return %arg0, %c0_i32, %c0_i32_0 : i32, i32, i32
  }
}

</mosaic_0001>

<bundles_post_ra>
// kernel: tile.47
= control target key start
LH: loop header
LB: loop body
LE: loop exit
PB: predicated region body
PF: predicated region fallthrough
CT: control target
= control target key end

     0   :  { %s28_s0 = inlined_call_operand.vmem [shape: f32[8], index: 0, kind: input, shape index: {}]   ;;  %s29_s1 = inlined_call_operand.vmem [shape: f32[16,8], index: 1, kind: output, shape index: {}]  }
   0x1   :  { %v4_v0 = vld [vmem:[%s28_s0] ss:$0 sm:$0xff] }
   0x2   :  { %5 = vst [vmem:[%s29_s1] sm:$0xff] %v4_v0 }
   0x3   :  { %8 = vst [vmem:[%s29_s1 + $0x8] sm:$0xff] %v4_v0 }

// kernel: tile.49
= control target key start
LH: loop header
LB: loop body
LE: loop exit
PB: predicated region body
PF: predicated region fallthrough
CT: control target
= control target key end

     0   :  { %s131_s10 = smov 120   ;;  %s132_s11 = smov 104   ;;  %vm3_vm0 = vcmask 64512   ;;  %vm9_vm1 = vcmask 1048512   ;;  %vm15_vm2 = vcmask 982912   ;;  %vm21_vm3 = vcmask 917312   ;;  %s207_s0 = inlined_call_operand.vmem [shape: f32[16,8], index: 0, kind: input, shape index: {}]   ;;  %s208_s1 = inlined_call_operand.vmem [shape: f32[1,128], index: 1, kind: output, shape index: {}]  }
   0x1   :  { %v101_v0 = vld [vmem:[%s207_s0 + $0xf] sm:$0x1]   ;;  %v103_v1 = vld [vmem:[%s207_s0 + $0xd] sm:$0x1]   ;;  %v105_v2 = vld [vmem:[%s207_s0 + $0xb] sm:$0x1]  }
   0x2   :  { %7 = vrot.lane.b32.xlu0 %v101_v0, %s131_s10  ;;  %19 = vrot.lane.b32.xlu1 %v103_v1, %s132_s11  ;;  %s133_s14 = smov 88   ;;  %v102_v3 = vld [vmem:[%s207_s0 + $0xe] sm:$0x1]   ;;  %v104_v4 = vld [vmem:[%s207_s0 + $0xc] sm:$0x1]   ;;  %s134_s19 = smov 112  }
   0x3   :  { %31 = vrot.lane.b32.xlu2 %v105_v2, %s133_s14  ;;  %s135_s20 = smov 96   ;;  %v106_v5 = vld [vmem:[%s207_s0 + $0xa] sm:$0x1]   ;;  %s136_s23 = smov 80   ;;  %v107_v6 = vld [vmem:[%s207_s0 + $0x9] sm:$0x1]  }
   0x4   :  { %v108_v7 = vld [vmem:[%s207_s0 + $0x8] sm:$0x1]   ;;  %s137_s28 = smov 72   ;;  %s138_s29 = smov 64   ;;  %v109_v8 = vld [vmem:[%s207_s0 + $0x7] sm:$0x1]  }
   0x5   :  { %s139_s3 = smov 56   ;;  %v110_v9 = vld [vmem:[%s207_s0 + $0x6] sm:$0x1]   ;;  %v111_v10 = vld [vmem:[%s207_s0 + $0x5] sm:$0x1]   ;;  %s140_s8 = smov 48  }
   0x6   :  { %s141_s9 = smov 40   ;;  %v112_v11 = vld [vmem:[%s207_s0 + $0x4] sm:$0x1]   ;;  %s142_s12 = smov 32   ;;  %v113_v12 = vld [vmem:[%s207_s0 + $0x3] sm:$0x1]  }
   0x7   :  { %v114_v13 = vld [vmem:[%s207_s0 + $0x2] sm:$0x1]   ;;  %s143_s17 = smov 24   ;;  %s144_s18 = smov 16   ;;  %v115_v14 = vld [vmem:[%s207_s0 + $0x1] sm:$0x1]  }
   0x8   :  { %s145_s21 = smov 8   ;;  %v2_v15 = vld [vmem:[%s207_s0] sm:$0x1]   ;;  %vm27_vm4 = vcmask 851712   ;;  %vm33_vm5 = vcmask 786112   ;;  %vm39_vm6 = vcmask 720512  }
   0x9   :  { %4 = vst.msk [vmem:[#allocation0] sm:$0x1] %vm3_vm0, %v2_v15   ;;  %vm45_vm7 = vcmask 654912   ;;  %vm51_vm8 = vcmask 589312   ;;  %vm57_vm9 = vcmask 523712   ;;  %vm63_vm10 = vcmask 458112  }
   0xa   :  { %13 = vrot.lane.b32.xlu0 %v102_v3, %s134_s19  ;;  %25 = vrot.lane.b32.xlu1 %v104_v4, %s135_s20  ;;  %vm69_vm11 = vcmask 392512   ;;  %vm75_vm12 = vcmask 326912   ;;  %vm81_vm13 = vcmask 261312   ;;  %vm87_vm14 = vcmask 195712  }
   0xb   :  { %37 = vrot.lane.b32.xlu2 %v106_v5, %s136_s23  ;;  %vm93_vm15 = vcmask 130112  }
  0x12   :  { %43 = vrot.lane.b32.xlu0 %v107_v6, %s137_s28  ;;  %49 = vrot.lane.b32.xlu1 %v108_v7, %s138_s29 }
  0x13   :  { %55 = vrot.lane.b32.xlu2 %v109_v8, %s139_s3 }
  0x1a   :  { %61 = vrot.lane.b32.xlu0 %v110_v9, %s140_s8  ;;  %67 = vrot.lane.b32.xlu1 %v111_v10, %s141_s9 }
  0x1b   :  { %73 = vrot.lane.b32.xlu2 %v112_v11, %s142_s12 }
  0x22   :  { %79 = vrot.lane.b32.xlu0 %v113_v12, %s143_s17  ;;  %85 = vrot.lane.b32.xlu1 %v114_v13, %s144_s18 }
  0x23   :  { %91 = vrot.lane.b32.xlu2 %v115_v14, %s145_s21 }
  0x5d   :  { %v32_v16 = vpop.permute.xlu2 %31  }
  0x65   :  { %v38_v17 = vpop.permute.xlu2 %37  }
  0x6d   :  { %v56_v18 = vpop.permute.xlu2 %55  }
  0x74   :  { %v8_v19 = vpop.permute.xlu0 %7   ;;  %v20_v20 = vpop.permute.xlu1 %19  }
  0x75   :  { %10 = vst.msk [vmem:[#allocation0] sm:$0x1] %vm9_vm1, %v8_v19   ;;  %v74_v21 = vpop.permute.xlu2 %73  }
  0x7c   :  { %v14_v22 = vpop.permute.xlu0 %13   ;;  %v26_v23 = vpop.permute.xlu1 %25  }
  0x7d   :  { %16 = vst.msk [vmem:[#allocation0] sm:$0x1] %vm15_vm2, %v14_v22   ;;  %v92_v24 = vpop.permute.xlu2 %91  }
  0x7e   :  { %22 = vst.msk [vmem:[#allocation0] sm:$0x1] %vm21_vm3, %v20_v20  }
  0x7f   :  { %28 = vst.msk [vmem:[#allocation0] sm:$0x1] %vm27_vm4, %v26_v23  }
  0x80   :  { %34 = vst.msk [vmem:[#allocation0] sm:$0x1] %vm33_vm5, %v32_v16  }
  0x81   :  { %40 = vst.msk [vmem:[#allocation0] sm:$0x1] %vm39_vm6, %v38_v17  }
  0x84   :  { %v44_v25 = vpop.permute.xlu0 %43   ;;  %v50_v26 = vpop.permute.xlu1 %49  }
  0x85   :  { %46 = vst.msk [vmem:[#allocation0] sm:$0x1] %vm45_vm7, %v44_v25  }
  0x86   :  { %52 = vst.msk [vmem:[#allocation0] sm:$0x1] %vm51_vm8, %v50_v26  }
  0x87   :  { %58 = vst.msk [vmem:[#allocation0] sm:$0x1] %vm57_vm9, %v56_v18  }
  0x8c   :  { %v62_v27 = vpop.permute.xlu0 %61   ;;  %v68_v28 = vpop.permute.xlu1 %67  }
  0x8d   :  { %64 = vst.msk [vmem:[#allocation0] sm:$0x1] %vm63_vm10, %v62_v27  }
  0x8e   :  { %70 = vst.msk [vmem:[#allocation0] sm:$0x1] %vm69_vm11, %v68_v28  }
  0x8f   :  { %76 = vst.msk [vmem:[#allocation0] sm:$0x1] %vm75_vm12, %v74_v21  }
  0x94   :  { %v80_v29 = vpop.permute.xlu0 %79   ;;  %v86_v30 = vpop.permute.xlu1 %85  }
  0x95   :  { %82 = vst.msk [vmem:[#allocation0] sm:$0x1] %vm81_vm13, %v80_v29  }
  0x96   :  { %88 = vst.msk [vmem:[#allocation0] sm:$0x1] %vm87_vm14, %v86_v30  }
  0x97   :  { %94 = vst.msk [vmem:[#allocation0] sm:$0x1] %vm93_vm15, %v92_v24  }
  0x9e   :  { %v97_v31 = vld [vmem:[#allocation0] sm:$0x1] }
  0x9f   :  { %100 = vst [vmem:[%s208_s1] sm:$0x1] %v97_v31 }

// kernel: tile.57
= control target key start
LH: loop header
LB: loop body
LE: loop exit
PB: predicated region body
PF: predicated region fallthrough
CT: control target
= control target key end

     0   :  { %s28_s0 = inlined_call_operand.vmem [shape: f32[4], index: 0, kind: input, shape index: {}]   ;;  %s29_s1 = inlined_call_operand.vmem [shape: f32[16,4], index: 1, kind: output, shape index: {}]  }
   0x1   :  { %v4_v0 = vld [vmem:[%s28_s0] ss:$0 sm:$0xff] }
   0x2   :  { %5 = vst [vmem:[%s29_s1] sm:$0xff] %v4_v0 }
   0x3   :  { %8 = vst [vmem:[%s29_s1 + $0x8] sm:$0xff] %v4_v0 }

// kernel: tile.59
= control target key start
LH: loop header
LB: loop body
LE: loop exit
PB: predicated region body
PF: predicated region fallthrough
CT: control target
= control target key end

     0   :  { %s131_s10 = smov 60   ;;  %s132_s11 = smov 52   ;;  %vm3_vm0 = vcmask 31744   ;;  %vm9_vm1 = vcmask 523744   ;;  %vm15_vm2 = vcmask 490944   ;;  %vm21_vm3 = vcmask 458144   ;;  %s207_s0 = inlined_call_operand.vmem [shape: f32[16,4], index: 0, kind: input, shape index: {}]   ;;  %s208_s1 = inlined_call_operand.vmem [shape: f32[1,64], index: 1, kind: output, shape index: {}]  }
   0x1   :  { %v101_v0 = vld [vmem:[%s207_s0 + $0xf] sm:$0x1]   ;;  %v103_v1 = vld [vmem:[%s207_s0 + $0xd] sm:$0x1]   ;;  %v105_v2 = vld [vmem:[%s207_s0 + $0xb] sm:$0x1]  }
   0x2   :  { %7 = vrot.lane.b32.xlu0 %v101_v0, %s131_s10  ;;  %19 = vrot.lane.b32.xlu1 %v103_v1, %s132_s11  ;;  %s133_s14 = smov 44   ;;  %v102_v3 = vld [vmem:[%s207_s0 + $0xe] sm:$0x1]   ;;  %v104_v4 = vld [vmem:[%s207_s0 + $0xc] sm:$0x1]   ;;  %s134_s19 = smov 56  }
   0x3   :  { %31 = vrot.lane.b32.xlu2 %v105_v2, %s133_s14  ;;  %s135_s20 = smov 48   ;;  %v106_v5 = vld [vmem:[%s207_s0 + $0xa] sm:$0x1]   ;;  %s136_s23 = smov 40   ;;  %v107_v6 = vld [vmem:[%s207_s0 + $0x9] sm:$0x1]  }
   0x4   :  { %v108_v7 = vld [vmem:[%s207_s0 + $0x8] sm:$0x1]   ;;  %s137_s28 = smov 36   ;;  %s138_s29 = smov 32   ;;  %v109_v8 = vld [vmem:[%s207_s0 + $0x7] sm:$0x1]  }
   0x5   :  { %s139_s3 = smov 28   ;;  %v110_v9 = vld [vmem:[%s207_s0 + $0x6] sm:$0x1]   ;;  %v111_v10 = vld [vmem:[%s207_s0 + $0x5] sm:$0x1]   ;;  %s140_s8 = smov 24  }
   0x6   :  { %s141_s9 = smov 20   ;;  %v112_v11 = vld [vmem:[%s207_s0 + $0x4] sm:$0x1]   ;;  %s142_s12 = smov 16   ;;  %v113_v12 = vld [vmem:[%s207_s0 + $0x3] sm:$0x1]  }
   0x7   :  { %v114_v13 = vld [vmem:[%s207_s0 + $0x2] sm:$0x1]   ;;  %s143_s17 = smov 12   ;;  %s144_s18 = smov 8   ;;  %v115_v14 = vld [vmem:[%s207_s0 + $0x1] sm:$0x1]  }
   0x8   :  { %s145_s21 = smov 4   ;;  %v2_v15 = vld [vmem:[%s207_s0] sm:$0x1]   ;;  %vm27_vm4 = vcmask 425344   ;;  %vm33_vm5 = vcmask 392544   ;;  %vm39_vm6 = vcmask 359744  }
   0x9   :  { %4 = vst.msk [vmem:[#allocation0] sm:$0x1] %vm3_vm0, %v2_v15   ;;  %vm45_vm7 = vcmask 326944   ;;  %vm51_vm8 = vcmask 294144   ;;  %vm57_vm9 = vcmask 261344   ;;  %vm63_vm10 = vcmask 228544  }
   0xa   :  { %13 = vrot.lane.b32.xlu0 %v102_v3, %s134_s19  ;;  %25 = vrot.lane.b32.xlu1 %v104_v4, %s135_s20  ;;  %vm69_vm11 = vcmask 195744   ;;  %vm75_vm12 = vcmask 162944   ;;  %vm81_vm13 = vcmask 130144   ;;  %vm87_vm14 = vcmask 97344  }
   0xb   :  { %37 = vrot.lane.b32.xlu2 %v106_v5, %s136_s23  ;;  %vm93_vm15 = vcmask 64544  }
  0x12   :  { %43 = vrot.lane.b32.xlu0 %v107_v6, %s137_s28  ;;  %49 = vrot.lane.b32.xlu1 %v108_v7, %s138_s29 }
  0x13   :  { %55 = vrot.lane.b32.xlu2 %v109_v8, %s139_s3 }
  0x1a   :  { %61 = vrot.lane.b32.xlu0 %v110_v9, %s140_s8  ;;  %67 = vrot.lane.b32.xlu1 %v111_v10, %s141_s9 }
  0x1b   :  { %73 = vrot.lane.b32.xlu2 %v112_v11, %s142_s12 }
  0x22   :  { %79 = vrot.lane.b32.xlu0 %v113_v12, %s143_s17  ;;  %85 = vrot.lane.b32.xlu1 %v114_v13, %s144_s18 }
  0x23   :  { %91 = vrot.lane.b32.xlu2 %v115_v14, %s145_s21 }
  0x5d   :  { %v32_v16 = vpop.permute.xlu2 %31  }
  0x65   :  { %v38_v17 = vpop.permute.xlu2 %37  }
  0x6d   :  { %v56_v18 = vpop.permute.xlu2 %55  }
  0x74   :  { %v8_v19 = vpop.permute.xlu0 %7   ;;  %v20_v20 = vpop.permute.xlu1 %19  }
  0x75   :  { %10 = vst.msk [vmem:[#allocation0] sm:$0x1] %vm9_vm1, %v8_v19   ;;  %v74_v21 = vpop.permute.xlu2 %73  }
  0x7c   :  { %v14_v22 = vpop.permute.xlu0 %13   ;;  %v26_v23 = vpop.permute.xlu1 %25  }
  0x7d   :  { %16 = vst.msk [vmem:[#allocation0] sm:$0x1] %vm15_vm2, %v14_v22   ;;  %v92_v24 = vpop.permute.xlu2 %91  }
  0x7e   :  { %22 = vst.msk [vmem:[#allocation0] sm:$0x1] %vm21_vm3, %v20_v20  }
  0x7f   :  { %28 = vst.msk [vmem:[#allocation0] sm:$0x1] %vm27_vm4, %v26_v23  }
  0x80   :  { %34 = vst.msk [vmem:[#allocation0] sm:$0x1] %vm33_vm5, %v32_v16  }
  0x81   :  { %40 = vst.msk [vmem:[#allocation0] sm:$0x1] %vm39_vm6, %v38_v17  }
  0x84   :  { %v44_v25 = vpop.permute.xlu0 %43   ;;  %v50_v26 = vpop.permute.xlu1 %49  }
  0x85   :  { %46 = vst.msk [vmem:[#allocation0] sm:$0x1] %vm45_vm7, %v44_v25  }
  0x86   :  { %52 = vst.msk [vmem:[#allocation0] sm:$0x1] %vm51_vm8, %v50_v26  }
  0x87   :  { %58 = vst.msk [vmem:[#allocation0] sm:$0x1] %vm57_vm9, %v56_v18  }
  0x8c   :  { %v62_v27 = vpop.permute.xlu0 %61   ;;  %v68_v28 = vpop.permute.xlu1 %67  }
  0x8d   :  { %64 = vst.msk [vmem:[#allocation0] sm:$0x1] %vm63_vm10, %v62_v27  }
  0x8e   :  { %70 = vst.msk [vmem:[#allocation0] sm:$0x1] %vm69_vm11, %v68_v28  }
  0x8f   :  { %76 = vst.msk [vmem:[#allocation0] sm:$0x1] %vm75_vm12, %v74_v21  }
  0x94   :  { %v80_v29 = vpop.permute.xlu0 %79   ;;  %v86_v30 = vpop.permute.xlu1 %85  }
  0x95   :  { %82 = vst.msk [vmem:[#allocation0] sm:$0x1] %vm81_vm13, %v80_v29  }
  0x96   :  { %88 = vst.msk [vmem:[#allocation0] sm:$0x1] %vm87_vm14, %v86_v30  }
  0x97   :  { %94 = vst.msk [vmem:[#allocation0] sm:$0x1] %vm93_vm15, %v92_v24  }
  0x9e   :  { %v97_v31 = vld [vmem:[#allocation0] sm:$0x1] }
  0x9f   :  { %100 = vst [vmem:[%s208_s1] sm:$0x1] %v97_v31 }

// kernel: net_forward.6
= control target key start
LH: loop header
LB: loop body
LE: loop exit
PB: predicated region body
PF: predicated region fallthrough
CT: control target
= control target key end

     0   :  { %vm45_vm0 = vcmask 516096   ;;  %v357_v3 = vmov 0.0   ;;  %vm48_vm1 = vcmask 523264   ;;  %vm296_vm2 = vcmask 1040384   ;;  %s568_s1 = inlined_call_operand.vmem [shape: f32[3,64,128], index: 1, kind: input, shape index: {}]   ;;  %s569_s0 = inlined_call_operand.vmem [shape: f32[2,16,64], index: 0, kind: input, shape index: {}]   ;;  %s570_s2 = inlined_call_operand.vmem [shape: f32[1,128], index: 2, kind: input, shape index: {}]   ;;  %s571_s3 = inlined_call_operand.vmem [shape: f32[2,16,128], index: 3, kind: output, shape index: {0}]   ;;  %s572_s4 = inlined_call_operand.vmem [shape: f32[1,2,128], index: 4, kind: output, shape index: {1}]  }
   0x1   :  { %v23_v0 = vld [vmem:[%s568_s1 + $0x38] sm:$0xff]  ;;  %v22_v2 = vld [vmem:[%s568_s1 + $0x30] sm:$0xff]  ;;  %46 = vst.msk [vmem:[#allocation2] sm:$0x1] %vm45_vm0, %v357_v3  ;;  %v21_v6 = vld [vmem:[%s568_s1 + $0x28] sm:$0xff] }
   0x2   :  { %v389_v1 = vld [vmem:[%s568_s1 + $0xb8] sm:$0xff]  ;;  %67 = vmatpush.msra.mxu0 %v23_v0  ;;  %v404_v5 = vld [vmem:[%s568_s1 + $0xb0] sm:$0xff]  ;;  %47 = vst.msk [vmem:[#allocation2 + $0x11] sm:$0x1] %vm45_vm0, %v357_v3  ;;  %194 = vmatpush.msra.mxu3 %v23_v0  ;;  %v419_v8 = vld [vmem:[%s568_s1 + $0xa8] sm:$0xff] }
   0x3   :  { %127 = vmatpush.msra.mxu2 %v389_v1  ;;  %v399_v4 = vld [vmem:[%s568_s1 + $0x78] sm:$0xff]  ;;  %v414_v7 = vld [vmem:[%s568_s1 + $0x70] sm:$0xff]  ;;  %174 = vst.msk [vmem:[#allocation2 + $0x12] sm:$0x1] %vm45_vm0, %v357_v3  ;;  %v426_v9 = vld [vmem:[%s568_s1 + $0x68] sm:$0xff] }
   0x4   :  { %96 = vmatpush.msra.mxu1 %v399_v4  ;;  %68 = vmatpush.msra.mxu0 %v22_v2  ;;  %175 = vst.msk [vmem:[#allocation2 + $0x23] sm:$0x1] %vm45_vm0, %v357_v3  ;;  %v20_v10 = vld [vmem:[%s568_s1 + $0x20] sm:$0xff]  ;;  %v19_v13 = vld [vmem:[%s568_s1 + $0x18] sm:$0xff]  ;;  %v18_v15 = vld [vmem:[%s568_s1 + $0x10] sm:$0xff] }
   0x5   :  { %128 = vmatpush.msra.mxu2 %v404_v5  ;;  %195 = vmatpush.msra.mxu3 %v22_v2  ;;  %v436_v11 = vld [vmem:[%s568_s1 + $0xa0] sm:$0xff]  ;;  %v451_v14 = vld [vmem:[%s568_s1 + $0x98] sm:$0xff]  ;;  %v469_v18 = vld [vmem:[%s568_s1 + $0x90] sm:$0xff] }
   0x6   :  { %97 = vmatpush.msra.mxu1 %v414_v7  ;;  %69 = vmatpush.msra.mxu0 %v21_v6  ;;  %v442_v12 = vld [vmem:[%s568_s1 + $0x60] sm:$0xff]  ;;  %v460_v16 = vld [vmem:[%s568_s1 + $0x58] sm:$0xff]  ;;  %v44_v19 = vld [vmem:[%s569_s0 + $0x8] sm:$0xff] }
   0x7   :  { %129 = vmatpush.msra.mxu2 %v419_v8  ;;  %196 = vmatpush.msra.mxu3 %v21_v6  ;;  %v43_v17 = vld [vmem:[%s569_s0] sm:$0xff]  ;;  %v478_v20 = vld [vmem:[%s569_s0 + $0x10] sm:$0xff]  ;;  %50 = vst.msk [vmem:[#allocation2 + $0x9] sm:$0xff] %vm48_vm1, %v44_v19  ;;  %v488_v22 = vld [vmem:[%s569_s0 + $0x18] sm:$0xff] }
   0x8   :  { %98 = vmatpush.msra.mxu1 %v426_v9  ;;  %70 = vmatpush.msra.mxu0 %v20_v10  ;;  %49 = vst.msk [vmem:[#allocation2 + $0x1] sm:$0xff] %vm48_vm1, %v43_v17  ;;  %v309_v21 = vld [vmem:[%s568_s1 + $0x50] sm:$0xff]  ;;  %v17_v23 = vld [vmem:[%s568_s1 + $0x8] sm:$0xff]  ;;  %v16_v26 = vld [vmem:[%s568_s1] sm:$0xff] }
   0x9   :  { %130 = vmatpush.msra.mxu2 %v436_v11  ;;  %197 = vmatpush.msra.mxu3 %v20_v10  ;;  %v316_v24 = vld [vmem:[%s568_s1 + $0x88] sm:$0xff]  ;;  %176 = vst.msk [vmem:[#allocation2 + $0x13] sm:$0xff] %vm48_vm1, %v478_v20  ;;  %v315_v27 = vld [vmem:[%s568_s1 + $0x80] sm:$0xff] }
   0xa   :  { %99 = vmatpush.msra.mxu1 %v442_v12  ;;  %71 = vmatpush.msra.mxu0 %v19_v13  ;;  %v308_v25 = vld [vmem:[%s568_s1 + $0x48] sm:$0xff]  ;;  %177 = vst.msk [vmem:[#allocation2 + $0x1b] sm:$0xff] %vm48_vm1, %v488_v22  ;;  %v307_v28 = vld [vmem:[%s568_s1 + $0x40] sm:$0xff] }
   0xb   :  { %131 = vmatpush.msra.mxu2 %v451_v14  ;;  %198 = vmatpush.msra.mxu3 %v19_v13  ;;  %v356_v40 = vld [vmem:[%s570_s2] ss:$0 sm:$0xff] }
   0xc   :  { %100 = vmatpush.msra.mxu1 %v460_v16  ;;  %72 = vmatpush.msra.mxu0 %v18_v15 }
   0xd   :  { %132 = vmatpush.msra.mxu2 %v469_v18  ;;  %199 = vmatpush.msra.mxu3 %v18_v15 }
   0xe   :  { %101 = vmatpush.msra.mxu1 %v309_v21  ;;  %73 = vmatpush.msra.mxu0 %v17_v23  ;;  %v112_v33 = vld [vmem:[#allocation2 + $0xa] sm:$0xff] }
   0xf   :  { %133 = vmatpush.msra.mxu2 %v316_v24  ;;  %200 = vmatpush.msra.mxu3 %v17_v23  ;;  %v51_v29 = vld [vmem:[#allocation2] sm:$0xff]  ;;  %v52_v32 = vld [vmem:[#allocation2 + $0x8] sm:$0xff] }
  0x10   :  { %102 = vmatpush.msra.mxu1 %v308_v25  ;;  %74 = vmatpush.msra.mxu0 %v16_v26  ;;  %v111_v30 = vld [vmem:[#allocation2 + $0x2] sm:$0xff]  ;;  %v178_v31 = vld [vmem:[#allocation2 + $0x12] sm:$0xff] }
  0x11   :  { %134 = vmatpush.msra.mxu2 %v315_v27  ;;  %323 = vmatmul.msk.f32.vlgmr.msra.gmra.mxu0 %vm48_vm1, %v51_v29  ;;  %v179_v34 = vld [vmem:[#allocation2 + $0x1a] sm:$0xff] }
  0x12   :  { %327 = vmatmul.msk.f32.vlgmr.msra.gmra.mxu2 %vm48_vm1, %v111_v30  ;;  %103 = vmatpush.msra.mxu1 %v307_v28  ;;  %v238_v35 = vld [vmem:[#allocation2 + $0x14] sm:$0xff]  ;;  %v239_v36 = vld [vmem:[#allocation2 + $0x1c] sm:$0xff] }
  0x13   :  { %339 = vmatpush.msrb.mxu2 %v399_v4  ;;  %201 = vmatpush.msra.mxu3 %v16_v26 }
  0x14   :  { %223 = vmatpush.msrb.mxu0 %v399_v4  ;;  %325 = vmatmul.msk.f32.vlgmr.msra.gmra.mxu1 %vm48_vm1, %v43_v17 }
  0x15   :  { %331 = vmatmul.msk.f32.vlgmr.msra.gmra.mxu3 %vm48_vm1, %v178_v31  ;;  %340 = vmatpush.msrb.mxu2 %v414_v7 }
  0x16   :  { %347 = vmatpush.msrb.mxu3 %v389_v1  ;;  %224 = vmatpush.msrb.mxu0 %v414_v7 }
  0x17   :  { %254 = vmatpush.msrb.mxu1 %v389_v1  ;;  %341 = vmatpush.msrb.mxu2 %v426_v9 }
  0x18   :  { %348 = vmatpush.msrb.mxu3 %v404_v5  ;;  %225 = vmatpush.msrb.mxu0 %v426_v9 }
  0x19   :  { %255 = vmatpush.msrb.mxu1 %v404_v5  ;;  %342 = vmatpush.msrb.mxu2 %v442_v12 }
  0x1a   :  { %349 = vmatpush.msrb.mxu3 %v419_v8  ;;  %226 = vmatpush.msrb.mxu0 %v442_v12 }
  0x1b   :  { %256 = vmatpush.msrb.mxu1 %v419_v8  ;;  %324 = vmatmul.msk.f32.gmra.mxu0 %vm48_vm1, %v52_v32 }
  0x1c   :  { %328 = vmatmul.msk.f32.gmra.mxu2 %vm48_vm1, %v112_v33  ;;  %350 = vmatpush.msrb.mxu3 %v436_v11 }
  0x1d   :  { %343 = vmatpush.msrb.mxu2 %v460_v16  ;;  %227 = vmatpush.msrb.mxu0 %v460_v16 }
  0x1e   :  { %257 = vmatpush.msrb.mxu1 %v436_v11  ;;  %332 = vmatmul.msk.f32.gmra.mxu3 %vm48_vm1, %v179_v34 }
  0x1f   :  { %326 = vmatmul.msk.f32.gmra.mxu1 %vm48_vm1, %v44_v19  ;;  %344 = vmatpush.msrb.mxu2 %v309_v21 }
  0x20   :  { %351 = vmatpush.msrb.mxu3 %v451_v14  ;;  %228 = vmatpush.msrb.mxu0 %v309_v21 }
  0x21   :  { %258 = vmatpush.msrb.mxu1 %v451_v14  ;;  %345 = vmatpush.msrb.mxu2 %v308_v25 }
  0x22   :  { %352 = vmatpush.msrb.mxu3 %v469_v18  ;;  %229 = vmatpush.msrb.mxu0 %v308_v25 }
  0x23   :  { %259 = vmatpush.msrb.mxu1 %v469_v18  ;;  %346 = vmatpush.msrb.mxu2 %v307_v28 }
  0x24   :  { %353 = vmatpush.msrb.mxu3 %v316_v24  ;;  %230 = vmatpush.msrb.mxu0 %v307_v28 }
  0x25   :  { %260 = vmatpush.msrb.mxu1 %v316_v24  ;;  %333 = vmatmul.msk.f32.vlgmr.msrb.gmra.mxu0 %vm48_vm1, %v478_v20 }
  0x26   :  { %334 = vmatmul.msk.f32.vlgmr.msrb.gmra.mxu2 %vm48_vm1, %v488_v22  ;;  %354 = vmatpush.msrb.mxu3 %v315_v27 }
  0x27   :  { %261 = vmatpush.msrb.mxu1 %v315_v27  ;;  %336 = vmatmul.msk.f32.vlgmr.msrb.gmra.mxu3 %vm48_vm1, %v239_v36 }
  0x28   :  { %335 = vmatmul.msk.f32.vlgmr.msrb.gmra.mxu1 %vm48_vm1, %v238_v35 }
  0x8e   :  { %v76_v37 = vpop.f32.mrf.mxu0 }
  0x91   :  { %v105_v38 = vpop.f32.mrf.mxu1 }
  0x92   :  { %v106_v39 = vadd.f32 %v105_v38, %v76_v37 }
  0x95   :  { %v136_v41 = vpop.f32.mrf.mxu2 }
  0x96   :  { %v142_v42 = vadd.f32 %v136_v41, %v106_v39 }
  0x98   :  { %v203_v43 = vpop.f32.mrf.mxu3  ;;  %v147_v44 = vadd.f32 %v356_v40, %v142_v42  ;;  %v79_v45 = vpop.f32.mrf.mxu0 }
  0x9a   :  { %v149_v46 = vmax.f32 %v147_v44, 0.0 }
  0x9c   :  { %v108_v47 = vpop.f32.mrf.mxu1  ;;  %169 = vst [vmem:[%s571_s3] sm:$0xff] %v149_v46  ;;  %v159_v57 = vmul.f32 %v149_v46, %v149_v46 }
  0x9d   :  { %v109_v48 = vadd.f32 %v108_v47, %v79_v45 }
  0x9f   :  { %v139_v49 = vpop.f32.mrf.mxu2 }
  0xa0   :  { %v143_v50 = vadd.f32 %v139_v49, %v109_v48 }
  0xa1   :  { %v206_v52 = vpop.f32.mrf.mxu3 }
  0xa2   :  { %v148_v51 = vadd.f32 %v356_v40, %v143_v50  ;;  %v232_v53 = vpop.f32.mrf.mxu0 }
  0xa3   :  { %v233_v55 = vadd.f32 %v232_v53, %v203_v43 }
  0xa4   :  { %v150_v54 = vmax.f32 %v148_v51, 0.0 }
  0xa5   :  { %v263_v56 = vpop.f32.mrf.mxu1 }
  0xa6   :  { %v160_v58 = vmul.f32 %v150_v54, %v150_v54  ;;  %170 = vst [vmem:[%s571_s3 + $0x8] sm:$0xff] %v150_v54  ;;  %v269_v59 = vadd.f32 %v263_v56, %v233_v55  ;;  %v151_v60 = vadd.f32 %v150_v54, %v149_v46 }
  0xa8   :  { %v161_v61 = vadd.f32 %v160_v58, %v159_v57  ;;  %v271_v62 = vadd.f32 %v356_v40, %v269_v59  ;;  %v152_v3 = vrot.slane %v151_v60, 4 }
  0xa9   :  { %v235_v63 = vpop.f32.mrf.mxu2 }
  0xaa   :  { %v273_v0 = vmax.f32 %v271_v62, 0.0  ;;  %v236_v1 = vadd.f32 %v235_v63, %v206_v52  ;;  %v266_v2 = vpop.f32.mrf.mxu3  ;;  %v162_v4 = vrot.slane %v161_v61, 4  ;;  %v153_v7 = vadd.f32 %v152_v3, %v151_v60 }
  0xac   :  { %337 = vst [vmem:[%s571_s3 + $0x10] sm:$0xff] %v273_v0  ;;  %v270_v5 = vadd.f32 %v266_v2, %v236_v1  ;;  %v163_v8 = vadd.f32 %v162_v4, %v161_v61  ;;  %v283_v10 = vmul.f32 %v273_v0, %v273_v0  ;;  %v154_v13 = vrot.slane %v153_v7, 2 }
  0xae   :  { %v272_v6 = vadd.f32 %v356_v40, %v270_v5  ;;  %v164_v14 = vrot.slane %v163_v8, 2  ;;  %v155_v19 = vadd.f32 %v154_v13, %v153_v7 }
  0xb0   :  { %v274_v9 = vmax.f32 %v272_v6, 0.0  ;;  %v165_v20 = vadd.f32 %v164_v14, %v163_v8  ;;  %v156_v25 = vrot.slane %v155_v19, 1 }
  0xb2   :  { %v275_v11 = vadd.f32 %v274_v9, %v273_v0  ;;  %v284_v12 = vmul.f32 %v274_v9, %v274_v9  ;;  %338 = vst [vmem:[%s571_s3 + $0x18] sm:$0xff] %v274_v9  ;;  %v166_v26 = vrot.slane %v165_v20, 1  ;;  %v157_v31 = vadd.f32 %v156_v25, %v155_v19 }
  0xb4   :  { %v276_v15 = vrot.slane %v275_v11, 4  ;;  %v285_v16 = vadd.f32 %v284_v12, %v283_v10  ;;  %v167_v32 = vadd.f32 %v166_v26, %v165_v20 }
  0xb6   :  { %v277_v17 = vadd.f32 %v276_v15, %v275_v11  ;;  %v286_v18 = vrot.slane %v285_v16, 4 }
  0xb8   :  { %v278_v21 = vrot.slane %v277_v17, 2  ;;  %v287_v22 = vadd.f32 %v286_v18, %v285_v16 }
  0xba   :  { %v279_v23 = vadd.f32 %v278_v21, %v277_v17  ;;  %v288_v24 = vrot.slane %v287_v22, 2 }
  0xbc   :  { %v280_v27 = vrot.slane %v279_v23, 1  ;;  %v289_v28 = vadd.f32 %v288_v24, %v287_v22 }
  0xbe   :  { %v281_v29 = vadd.f32 %v280_v27, %v279_v23  ;;  %v290_v30 = vrot.slane %v289_v28, 1 }
  0xc0   :  { %v291_v33 = vadd.f32 %v290_v30, %v289_v28  ;;  %v282_v34 = vadd.f32 %v281_v29, %v157_v31 }
  0xc2   :  { %v292_v35 = vadd.f32 %v291_v33, %v167_v32 }
  0xc4   :  { %v297_v36 = vsel %vm296_vm2, %v282_v34, %v292_v35 }
  0xc5   :  { %298 = vst [vmem:[%s572_s4] sm:$0x3] %v297_v36 }

// kernel: net_forward.7
= control target key start
LH: loop header
LB: loop body
LE: loop exit
PB: predicated region body
PF: predicated region fallthrough
CT: control target
= control target key end

     0   :  { %v390_v3 = vmov 0.0   ;;  %vm166_vm0 = vcmask 523264   ;;  %vm306_vm1 = vcmask 1040384   ;;  %vm308_vm2 = vcmask 517120   ;;  %s794_s2 = inlined_call_operand.vmem [shape: f32[3,128,64], index: 2, kind: input, shape index: {}]   ;;  %s795_s0 = inlined_call_operand.vmem [shape: f32[2,16,128], index: 0, kind: input, shape index: {}]   ;;  %s796_s1 = inlined_call_operand.vmem [shape: f32[2,128], index: 1, kind: input, shape index: {}]   ;;  %s797_s3 = inlined_call_operand.vmem [shape: f32[1,64], index: 3, kind: input, shape index: {}]   ;;  %s798_s4 = inlined_call_operand.vmem [shape: f32[2,16,64], index: 4, kind: output, shape index: {0}]   ;;  %s799_s5 = inlined_call_operand.vmem [shape: f32[1,2,64], index: 5, kind: output, shape index: {1}]  }
   0x1   :  { %v34_v0 = vld [vmem:[%s794_s2 + $0x78] sm:$0xff]  ;;  %v33_v2 = vld [vmem:[%s794_s2 + $0x70] sm:$0xff]  ;;  %82 = vst [vmem:[#allocation2] sm:$0x1] %v390_v3  ;;  %v32_v6 = vld [vmem:[%s794_s2 + $0x68] sm:$0xff] }
   0x2   :  { %v427_v1 = vld [vmem:[%s794_s2 + $0x178] sm:$0xff]  ;;  %88 = vmatpush.msra.mxu0 %v34_v0  ;;  %v441_v5 = vld [vmem:[%s794_s2 + $0x170] sm:$0xff]  ;;  %83 = vst [vmem:[#allocation2 + $0x11] sm:$0x1] %v390_v3  ;;  %206 = vmatpush.msra.mxu3 %v34_v0  ;;  %v455_v8 = vld [vmem:[%s794_s2 + $0x168] sm:$0xff] }
   0x3   :  { %136 = vmatpush.msra.mxu2 %v427_v1  ;;  %v436_v4 = vld [vmem:[%s794_s2 + $0xf8] sm:$0xff]  ;;  %v450_v7 = vld [vmem:[%s794_s2 + $0xf0] sm:$0xff]  ;;  %200 = vst [vmem:[#allocation2 + $0x12] sm:$0x1] %v390_v3  ;;  %v461_v9 = vld [vmem:[%s794_s2 + $0xe8] sm:$0xff] }
   0x4   :  { %111 = vmatpush.msra.mxu1 %v436_v4  ;;  %89 = vmatpush.msra.mxu0 %v33_v2  ;;  %201 = vst [vmem:[#allocation2 + $0x23] sm:$0x1] %v390_v3  ;;  %v31_v10 = vld [vmem:[%s794_s2 + $0x60] sm:$0xff]  ;;  %v30_v13 = vld [vmem:[%s794_s2 + $0x58] sm:$0xff]  ;;  %v29_v16 = vld [vmem:[%s794_s2 + $0x50] sm:$0xff] }
   0x5   :  { %137 = vmatpush.msra.mxu2 %v441_v5  ;;  %207 = vmatpush.msra.mxu3 %v33_v2  ;;  %v470_v11 = vld [vmem:[%s794_s2 + $0x160] sm:$0xff]  ;;  %v485_v14 = vld [vmem:[%s794_s2 + $0x158] sm:$0xff]  ;;  %v500_v17 = vld [vmem:[%s794_s2 + $0x150] sm:$0xff] }
   0x6   :  { %112 = vmatpush.msra.mxu1 %v450_v7  ;;  %90 = vmatpush.msra.mxu0 %v32_v6  ;;  %v476_v12 = vld [vmem:[%s794_s2 + $0xe0] sm:$0xff]  ;;  %v491_v15 = vld [vmem:[%s794_s2 + $0xd8] sm:$0xff]  ;;  %v506_v18 = vld [vmem:[%s794_s2 + $0xd0] sm:$0xff] }
   0x7   :  { %138 = vmatpush.msra.mxu2 %v455_v8  ;;  %208 = vmatpush.msra.mxu3 %v32_v6  ;;  %v28_v19 = vld [vmem:[%s794_s2 + $0x48] sm:$0xff]  ;;  %v27_v22 = vld [vmem:[%s794_s2 + $0x40] sm:$0xff]  ;;  %v26_v25 = vld [vmem:[%s794_s2 + $0x38] sm:$0xff] }
   0x8   :  { %113 = vmatpush.msra.mxu1 %v461_v9  ;;  %91 = vmatpush.msra.mxu0 %v31_v10  ;;  %v515_v20 = vld [vmem:[%s794_s2 + $0x148] sm:$0xff]  ;;  %v530_v23 = vld [vmem:[%s794_s2 + $0x140] sm:$0xff]  ;;  %v545_v26 = vld [vmem:[%s794_s2 + $0x138] sm:$0xff] }
   0x9   :  { %139 = vmatpush.msra.mxu2 %v470_v11  ;;  %209 = vmatpush.msra.mxu3 %v31_v10  ;;  %v521_v21 = vld [vmem:[%s794_s2 + $0xc8] sm:$0xff]  ;;  %v536_v24 = vld [vmem:[%s794_s2 + $0xc0] sm:$0xff]  ;;  %v25_v27 = vld [vmem:[%s794_s2 + $0x30] sm:$0xff] }
   0xa   :  { %114 = vmatpush.msra.mxu1 %v476_v12  ;;  %92 = vmatpush.msra.mxu0 %v30_v13  ;;  %v554_v28 = vld [vmem:[%s794_s2 + $0xb8] sm:$0xff]  ;;  %v559_v29 = vld [vmem:[%s794_s2 + $0x130] sm:$0xff]  ;;  %v24_v31 = vld [vmem:[%s794_s2 + $0x28] sm:$0xff] }
   0xb   :  { %140 = vmatpush.msra.mxu2 %v485_v14  ;;  %210 = vmatpush.msra.mxu3 %v30_v13  ;;  %v564_v30 = vld [vmem:[%s794_s2 + $0xb0] sm:$0xff]  ;;  %v72_v32 = vld [vmem:[%s795_s0] sm:$0xff]  ;;  %v73_v33 = vld [vmem:[%s795_s0 + $0x8] sm:$0xff] }
   0xc   :  { %115 = vmatpush.msra.mxu1 %v491_v15  ;;  %93 = vmatpush.msra.mxu0 %v29_v16  ;;  %v387_v34 = vld [vmem:[%s796_s1] ss:$0 sm:$0xff]  ;;  %v388_v35 = vld [vmem:[%s796_s1 + $0x1] ss:$0 sm:$0xff]  ;;  %v587_v36 = vld [vmem:[%s794_s2 + $0x128] sm:$0xff] }
   0xd   :  { %141 = vmatpush.msra.mxu2 %v500_v17  ;;  %211 = vmatpush.msra.mxu3 %v29_v16  ;;  %v350_v37 = vld [vmem:[%s795_s0 + $0x10] sm:$0xff]  ;;  %v351_v38 = vld [vmem:[%s795_s0 + $0x18] sm:$0xff]  ;;  %v599_v39 = vld [vmem:[%s794_s2 + $0xa8] sm:$0xff]  ;;  %v75_v40 = vmul.f32 %v387_v34, %v72_v32  ;;  %v76_v41 = vmul.f32 %v387_v34, %v73_v33 }
   0xe   :  { %116 = vmatpush.msra.mxu1 %v506_v18  ;;  %94 = vmatpush.msra.mxu0 %v28_v19  ;;  %v194_v42 = vmul.f32 %v387_v34, %v350_v37  ;;  %v23_v43 = vld [vmem:[%s794_s2 + $0x20] sm:$0xff]  ;;  %v195_v45 = vmul.f32 %v387_v34, %v351_v38  ;;  %v22_v50 = vld [vmem:[%s794_s2 + $0x18] sm:$0xff]  ;;  %v21_v57 = vld [vmem:[%s794_s2 + $0x10] sm:$0xff] }
   0xf   :  { %142 = vmatpush.msra.mxu2 %v515_v20  ;;  %212 = vmatpush.msra.mxu3 %v28_v19  ;;  %v608_v44 = vld [vmem:[%s794_s2 + $0x120] sm:$0xff]  ;;  %v78_v47 = vadd.f32 %v388_v35, %v75_v40  ;;  %v616_v48 = vadd.f32 %v388_v35, %v76_v41  ;;  %v627_v51 = vld [vmem:[%s794_s2 + $0x118] sm:$0xff]  ;;  %v646_v58 = vld [vmem:[%s794_s2 + $0x110] sm:$0xff] }
  0x10   :  { %117 = vmatpush.msra.mxu1 %v521_v21  ;;  %95 = vmatpush.msra.mxu0 %v27_v22  ;;  %v614_v46 = vld [vmem:[%s794_s2 + $0xa0] sm:$0xff]  ;;  %v618_v49 = vadd.f32 %v388_v35, %v194_v42  ;;  %v629_v52 = vadd.f32 %v388_v35, %v195_v45  ;;  %v635_v53 = vld [vmem:[%s794_s2 + $0x98] sm:$0xff]  ;;  %v653_v60 = vld [vmem:[%s794_s2 + $0x90] sm:$0xff] }
  0x11   :  { %143 = vmatpush.msra.mxu2 %v530_v23  ;;  %213 = vmatpush.msra.mxu3 %v27_v22  ;;  %v80_v54 = vmax.f32 %v78_v47, 0.0  ;;  %v81_v55 = vmax.f32 %v616_v48, 0.0  ;;  %v20_v61 = vld [vmem:[%s794_s2 + $0x8] sm:$0xff]  ;;  %v19_v0 = vld [vmem:[%s794_s2] sm:$0xff] }
  0x12   :  { %118 = vmatpush.msra.mxu1 %v536_v24  ;;  %96 = vmatpush.msra.mxu0 %v26_v25  ;;  %v198_v56 = vmax.f32 %v618_v49, 0.0  ;;  %v199_v59 = vmax.f32 %v629_v52, 0.0  ;;  %v662_v62 = vld [vmem:[%s794_s2 + $0x108] sm:$0xff]  ;;  %v681_v2 = vld [vmem:[%s794_s2 + $0x100] sm:$0xff] }
  0x13   :  { %144 = vmatpush.msra.mxu2 %v545_v26  ;;  %214 = vmatpush.msra.mxu3 %v26_v25  ;;  %84 = vst [vmem:[#allocation2 + $0x1] sm:$0xff] %v80_v54  ;;  %v670_v63 = vld [vmem:[%s794_s2 + $0x88] sm:$0xff]  ;;  %v690_v3 = vld [vmem:[%s794_s2 + $0x80] sm:$0xff] }
  0x14   :  { %119 = vmatpush.msra.mxu1 %v554_v28  ;;  %97 = vmatpush.msra.mxu0 %v25_v27  ;;  %85 = vst [vmem:[#allocation2 + $0x9] sm:$0xff] %v81_v55 }
  0x15   :  { %145 = vmatpush.msra.mxu2 %v559_v29  ;;  %215 = vmatpush.msra.mxu3 %v25_v27  ;;  %202 = vst [vmem:[#allocation2 + $0x13] sm:$0xff] %v198_v56 }
  0x16   :  { %120 = vmatpush.msra.mxu1 %v564_v30  ;;  %98 = vmatpush.msra.mxu0 %v24_v31  ;;  %203 = vst [vmem:[#allocation2 + $0x1b] sm:$0xff] %v199_v59 }
  0x17   :  { %146 = vmatpush.msra.mxu2 %v587_v36  ;;  %216 = vmatpush.msra.mxu3 %v24_v31 }
  0x18   :  { %121 = vmatpush.msra.mxu1 %v599_v39  ;;  %99 = vmatpush.msra.mxu0 %v23_v43 }
  0x19   :  { %147 = vmatpush.msra.mxu2 %v608_v44  ;;  %217 = vmatpush.msra.mxu3 %v23_v43 }
  0x1a   :  { %122 = vmatpush.msra.mxu1 %v614_v46  ;;  %100 = vmatpush.msra.mxu0 %v22_v50  ;;  %v86_v10 = vld [vmem:[#allocation2] sm:$0xff] }
  0x1b   :  { %148 = vmatpush.msra.mxu2 %v627_v51  ;;  %218 = vmatpush.msra.mxu3 %v22_v50  ;;  %v134_v6 = vld [vmem:[#allocation2 + $0x2] sm:$0xff] }
  0x1c   :  { %123 = vmatpush.msra.mxu1 %v635_v53  ;;  %101 = vmatpush.msra.mxu0 %v21_v57 }
  0x1d   :  { %149 = vmatpush.msra.mxu2 %v646_v58  ;;  %219 = vmatpush.msra.mxu3 %v21_v57 }
  0x1e   :  { %124 = vmatpush.msra.mxu1 %v653_v60  ;;  %102 = vmatpush.msra.mxu0 %v20_v61 }
  0x1f   :  { %150 = vmatpush.msra.mxu2 %v662_v62  ;;  %220 = vmatpush.msra.mxu3 %v20_v61 }
  0x20   :  { %125 = vmatpush.msra.mxu1 %v670_v63  ;;  %103 = vmatpush.msra.mxu0 %v19_v0 }
  0x21   :  { %151 = vmatpush.msra.mxu2 %v681_v2  ;;  %221 = vmatpush.msra.mxu3 %v19_v0 }
  0x22   :  { %229 = vmatpush.msrb.mxu0 %v436_v4  ;;  %126 = vmatpush.msra.mxu1 %v690_v3 }
  0x23   :  { %354 = vmatpush.msrb.mxu2 %v436_v4  ;;  %370 = vmatpush.msrb.mxu3 %v427_v1  ;;  %v135_v4 = vld [vmem:[#allocation2 + $0xa] sm:$0xff] }
  0x24   :  { %152 = vmatmul.f32.vlgmr.msra.gmra.mxu2 %v134_v6  ;;  %230 = vmatpush.msrb.mxu0 %v450_v7 }
  0x25   :  { %355 = vmatpush.msrb.mxu2 %v450_v7  ;;  %254 = vmatpush.msrb.mxu1 %v427_v1  ;;  %v87_v1 = vld [vmem:[#allocation2 + $0x8] sm:$0xff]  ;;  %v205_v7 = vld [vmem:[#allocation2 + $0x1a] sm:$0xff] }
  0x26   :  { %231 = vmatpush.msrb.mxu0 %v461_v9  ;;  %371 = vmatpush.msrb.mxu3 %v441_v5 }
  0x27   :  { %356 = vmatpush.msrb.mxu2 %v461_v9  ;;  %255 = vmatpush.msrb.mxu1 %v441_v5  ;;  %v204_v5 = vld [vmem:[#allocation2 + $0x12] sm:$0xff]  ;;  %v253_v9 = vld [vmem:[#allocation2 + $0x1c] sm:$0xff] }
  0x28   :  { %104 = vmatmul.f32.vlgmr.msra.gmra.mxu0 %v86_v10  ;;  %127 = vmatmul.f32.vlgmr.msra.gmra.mxu1 %v80_v54 }
  0x29   :  { %232 = vmatpush.msrb.mxu0 %v476_v12  ;;  %357 = vmatpush.msrb.mxu2 %v476_v12 }
  0x2a   :  { %256 = vmatpush.msrb.mxu1 %v455_v8  ;;  %372 = vmatpush.msrb.mxu3 %v455_v8  ;;  %v252_v8 = vld [vmem:[#allocation2 + $0x14] sm:$0xff] }
  0x2b   :  { %233 = vmatpush.msrb.mxu0 %v491_v15  ;;  %358 = vmatpush.msrb.mxu2 %v491_v15  ;;  %v389_v15 = vld [vmem:[%s797_s3] ss:$0 sm:$0xff] }
  0x2c   :  { %257 = vmatpush.msrb.mxu1 %v470_v11  ;;  %373 = vmatpush.msrb.mxu3 %v470_v11 }
  0x2d   :  { %155 = vmatmul.f32.gmra.mxu2 %v135_v4  ;;  %234 = vmatpush.msrb.mxu0 %v506_v18 }
  0x2e   :  { %359 = vmatpush.msrb.mxu2 %v506_v18  ;;  %258 = vmatpush.msrb.mxu1 %v485_v14 }
  0x2f   :  { %374 = vmatpush.msrb.mxu3 %v485_v14  ;;  %235 = vmatpush.msrb.mxu0 %v521_v21 }
  0x30   :  { %360 = vmatpush.msrb.mxu2 %v521_v21  ;;  %259 = vmatpush.msrb.mxu1 %v500_v17 }
  0x31   :  { %375 = vmatpush.msrb.mxu3 %v500_v17  ;;  %107 = vmatmul.f32.gmra.mxu0 %v87_v1 }
  0x32   :  { %130 = vmatmul.f32.gmra.mxu1 %v81_v55  ;;  %236 = vmatpush.msrb.mxu0 %v536_v24 }
  0x33   :  { %361 = vmatpush.msrb.mxu2 %v536_v24  ;;  %260 = vmatpush.msrb.mxu1 %v515_v20 }
  0x34   :  { %376 = vmatpush.msrb.mxu3 %v515_v20  ;;  %237 = vmatpush.msrb.mxu0 %v554_v28 }
  0x35   :  { %362 = vmatpush.msrb.mxu2 %v554_v28  ;;  %261 = vmatpush.msrb.mxu1 %v530_v23 }
  0x36   :  { %377 = vmatpush.msrb.mxu3 %v530_v23  ;;  %238 = vmatpush.msrb.mxu0 %v564_v30 }
  0x37   :  { %222 = vmatmul.f32.vlgmr.msra.gmra.mxu3 %v204_v5  ;;  %363 = vmatpush.msrb.mxu2 %v564_v30 }
  0x38   :  { %262 = vmatpush.msrb.mxu1 %v545_v26  ;;  %378 = vmatpush.msrb.mxu3 %v545_v26 }
  0x39   :  { %239 = vmatpush.msrb.mxu0 %v599_v39  ;;  %364 = vmatpush.msrb.mxu2 %v599_v39 }
  0x3a   :  { %263 = vmatpush.msrb.mxu1 %v559_v29  ;;  %379 = vmatpush.msrb.mxu3 %v559_v29 }
  0x3b   :  { %240 = vmatpush.msrb.mxu0 %v614_v46  ;;  %365 = vmatpush.msrb.mxu2 %v614_v46 }
  0x3c   :  { %264 = vmatpush.msrb.mxu1 %v587_v36  ;;  %380 = vmatpush.msrb.mxu3 %v587_v36 }
  0x3d   :  { %241 = vmatpush.msrb.mxu0 %v635_v53  ;;  %366 = vmatpush.msrb.mxu2 %v635_v53 }
  0x3e   :  { %265 = vmatpush.msrb.mxu1 %v608_v44  ;;  %381 = vmatpush.msrb.mxu3 %v608_v44 }
  0x3f   :  { %242 = vmatpush.msrb.mxu0 %v653_v60  ;;  %225 = vmatmul.f32.gmra.mxu3 %v205_v7 }
  0x40   :  { %367 = vmatpush.msrb.mxu2 %v653_v60  ;;  %266 = vmatpush.msrb.mxu1 %v627_v51 }
  0x41   :  { %382 = vmatpush.msrb.mxu3 %v627_v51  ;;  %243 = vmatpush.msrb.mxu0 %v670_v63 }
  0x42   :  { %368 = vmatpush.msrb.mxu2 %v670_v63  ;;  %267 = vmatpush.msrb.mxu1 %v646_v58 }
  0x43   :  { %383 = vmatpush.msrb.mxu3 %v646_v58  ;;  %244 = vmatpush.msrb.mxu0 %v690_v3 }
  0x44   :  { %369 = vmatpush.msrb.mxu2 %v690_v3  ;;  %268 = vmatpush.msrb.mxu1 %v662_v62 }
  0x45   :  { %384 = vmatpush.msrb.mxu3 %v662_v62  ;;  %245 = vmatmul.f32.vlgmr.msrb.gmra.mxu0 %v198_v56 }
  0x46   :  { %248 = vmatmul.f32.vlgmr.msrb.gmra.mxu2 %v199_v59  ;;  %269 = vmatpush.msrb.mxu1 %v681_v2 }
  0x47   :  { %385 = vmatpush.msrb.mxu3 %v681_v2  ;;  %270 = vmatmul.f32.vlgmr.msrb.gmra.mxu1 %v252_v8 }
  0x48   :  { %273 = vmatmul.f32.vlgmr.msrb.gmra.mxu3 %v253_v9 }
  0xa5   :  { %v105_v11 = vpop.f32.mrf.mxu0  ;;  %v128_v12 = vpop.f32.mrf.mxu1 }
  0xa6   :  { %v129_v13 = vadd.f32 %v128_v12, %v105_v11 }
  0xa7   :  { %v153_v14 = vpop.f32.mrf.mxu2 }
  0xa8   :  { %v159_v16 = vadd.f32 %v153_v14, %v129_v13 }
  0xaa   :  { %v164_v17 = vadd.f32 %v389_v15, %v159_v16 }
  0xac   :  { %189 = vst.msk [vmem:[%s798_s4] sm:$0xff] %vm166_vm0, %v164_v17  ;;  %v177_v25 = vmul.f32 %v164_v17, %v164_v17  ;;  %v167_v27 = vsel %vm166_vm0, %v164_v17, 0.0 }
  0xae   :  { %v108_v18 = vpop.f32.mrf.mxu0  ;;  %v179_v30 = vsel %vm166_vm0, %v177_v25, 0.0 }
  0xaf   :  { %v131_v19 = vpop.f32.mrf.mxu1 }
  0xb0   :  { %v132_v20 = vadd.f32 %v131_v19, %v108_v18  ;;  %v156_v21 = vpop.f32.mrf.mxu2 }
  0xb2   :  { %v160_v22 = vadd.f32 %v156_v21, %v132_v20 }
  0xb4   :  { %v165_v23 = vadd.f32 %v389_v15, %v160_v22 }
  0xb6   :  { %190 = vst.msk [vmem:[%s798_s4 + $0x8] sm:$0xff] %vm166_vm0, %v165_v23  ;;  %v178_v26 = vmul.f32 %v165_v23, %v165_v23  ;;  %v168_v31 = vsel %vm166_vm0, %v165_v23, 0.0 }
  0xb7   :  { %v169_v36 = vadd.f32 %v168_v31, %v167_v27 }
  0xb8   :  { %v180_v32 = vsel %vm166_vm0, %v178_v26, 0.0 }
  0xb9   :  { %v181_v37 = vadd.f32 %v180_v32, %v179_v30  ;;  %v170_v41 = vrot.slane %v169_v36, 4 }
  0xba   :  { %v223_v24 = vpop.f32.mrf.mxu3 }
  0xbb   :  { %v182_v42 = vrot.slane %v181_v37, 4  ;;  %v171_v47 = vadd.f32 %v170_v41, %v169_v36 }
  0xbd   :  { %v183_v48 = vadd.f32 %v182_v42, %v181_v37  ;;  %v172_v55 = vrot.slane %v171_v47, 2 }
  0xbf   :  { %v184_v56 = vrot.slane %v183_v48, 2  ;;  %v173_v61 = vadd.f32 %v172_v55, %v171_v47 }
  0xc1   :  { %v185_v62 = vadd.f32 %v184_v56, %v183_v48  ;;  %v174_v6 = vrot.slane %v173_v61, 1 }
  0xc2   :  { %v226_v28 = vpop.f32.mrf.mxu3  ;;  %v246_v29 = vpop.f32.mrf.mxu0 }
  0xc3   :  { %v247_v33 = vadd.f32 %v246_v29, %v223_v24  ;;  %v186_v10 = vrot.slane %v185_v62, 1  ;;  %v175_v8 = vadd.f32 %v174_v6, %v173_v61 }
  0xc4   :  { %v271_v34 = vpop.f32.mrf.mxu1 }
  0xc5   :  { %v277_v35 = vadd.f32 %v271_v34, %v247_v33  ;;  %v187_v9 = vadd.f32 %v186_v10, %v185_v62 }
  0xc7   :  { %v279_v38 = vadd.f32 %v389_v15, %v277_v35 }
  0xc9   :  { %v249_v39 = vpop.f32.mrf.mxu2  ;;  %352 = vst.msk [vmem:[%s798_s4 + $0x10] sm:$0xff] %vm166_vm0, %v279_v38  ;;  %v291_v45 = vmul.f32 %v279_v38, %v279_v38  ;;  %v281_v49 = vsel %vm166_vm0, %v279_v38, 0.0 }
  0xca   :  { %v250_v40 = vadd.f32 %v249_v39, %v226_v28 }
  0xcb   :  { %v274_v43 = vpop.f32.mrf.mxu3  ;;  %v293_v53 = vsel %vm166_vm0, %v291_v45, 0.0 }
  0xcc   :  { %v278_v44 = vadd.f32 %v274_v43, %v250_v40 }
  0xce   :  { %v280_v46 = vadd.f32 %v389_v15, %v278_v44 }
  0xd0   :  { %v282_v50 = vsel %vm166_vm0, %v280_v46, 0.0  ;;  %v292_v51 = vmul.f32 %v280_v46, %v280_v46  ;;  %353 = vst.msk [vmem:[%s798_s4 + $0x18] sm:$0xff] %vm166_vm0, %v280_v46 }
  0xd1   :  { %v283_v52 = vadd.f32 %v282_v50, %v281_v49 }
  0xd2   :  { %v294_v54 = vsel %vm166_vm0, %v292_v51, 0.0 }
  0xd3   :  { %v284_v57 = vrot.slane %v283_v52, 4  ;;  %v295_v58 = vadd.f32 %v294_v54, %v293_v53 }
  0xd5   :  { %v285_v59 = vadd.f32 %v284_v57, %v283_v52  ;;  %v296_v60 = vrot.slane %v295_v58, 4 }
  0xd7   :  { %v286_v63 = vrot.slane %v285_v59, 2  ;;  %v297_v0 = vadd.f32 %v296_v60, %v295_v58 }
  0xd9   :  { %v287_v2 = vadd.f32 %v286_v63, %v285_v59  ;;  %v298_v3 = vrot.slane %v297_v0, 2 }
  0xdb   :  { %v288_v4 = vrot.slane %v287_v2, 1  ;;  %v299_v1 = vadd.f32 %v298_v3, %v297_v0 }
  0xdd   :  { %v289_v5 = vadd.f32 %v288_v4, %v287_v2  ;;  %v300_v7 = vrot.slane %v299_v1, 1 }
  0xdf   :  { %v301_v11 = vadd.f32 %v300_v7, %v299_v1  ;;  %v290_v12 = vadd.f32 %v289_v5, %v175_v8 }
  0xe1   :  { %v302_v13 = vadd.f32 %v301_v11, %v187_v9 }
  0xe3   :  { %v307_v14 = vsel %vm306_vm1, %v290_v12, %v302_v13 }
  0xe4   :  { %309 = vst.msk [vmem:[%s799_s5] sm:$0x3] %vm308_vm2, %v307_v14 }

// kernel: net_forward.8
= control target key start
LH: loop header
LB: loop body
LE: loop exit
PB: predicated region body
PF: predicated region fallthrough
CT: control target
= control target key end

     0   :  { %vm58_vm0 = vcmask 516096   ;;  %v374_v3 = vmov 0.0   ;;  %vm61_vm1 = vcmask 523264   ;;  %vm311_vm2 = vcmask 1040384   ;;  %s614_s2 = inlined_call_operand.vmem [shape: f32[3,64,128], index: 2, kind: input, shape index: {}]   ;;  %s615_s0 = inlined_call_operand.vmem [shape: f32[2,16,64], index: 0, kind: input, shape index: {}]   ;;  %s616_s1 = inlined_call_operand.vmem [shape: f32[2,64], index: 1, kind: input, shape index: {}]   ;;  %s617_s3 = inlined_call_operand.vmem [shape: f32[1,128], index: 3, kind: input, shape index: {}]   ;;  %s618_s4 = inlined_call_operand.vmem [shape: f32[2,16,128], index: 4, kind: output, shape index: {0}]   ;;  %s619_s5 = inlined_call_operand.vmem [shape: f32[1,2,128], index: 5, kind: output, shape index: {1}]  }
   0x1   :  { %v26_v0 = vld [vmem:[%s614_s2 + $0x38] sm:$0xff]  ;;  %v25_v2 = vld [vmem:[%s614_s2 + $0x30] sm:$0xff]  ;;  %59 = vst.msk [vmem:[#allocation2] sm:$0x1] %vm58_vm0, %v374_v3  ;;  %v24_v6 = vld [vmem:[%s614_s2 + $0x28] sm:$0xff] }
   0x2   :  { %v411_v1 = vld [vmem:[%s614_s2 + $0xb8] sm:$0xff]  ;;  %80 = vmatpush.msra.mxu0 %v26_v0  ;;  %v426_v5 = vld [vmem:[%s614_s2 + $0xb0] sm:$0xff]  ;;  %60 = vst.msk [vmem:[#allocation2 + $0x11] sm:$0x1] %vm58_vm0, %v374_v3  ;;  %211 = vmatpush.msra.mxu3 %v26_v0  ;;  %v441_v8 = vld [vmem:[%s614_s2 + $0xa8] sm:$0xff] }
   0x3   :  { %140 = vmatpush.msra.mxu2 %v411_v1  ;;  %v421_v4 = vld [vmem:[%s614_s2 + $0x78] sm:$0xff]  ;;  %v436_v7 = vld [vmem:[%s614_s2 + $0x70] sm:$0xff]  ;;  %191 = vst.msk [vmem:[#allocation2 + $0x12] sm:$0x1] %vm58_vm0, %v374_v3  ;;  %v448_v9 = vld [vmem:[%s614_s2 + $0x68] sm:$0xff] }
   0x4   :  { %109 = vmatpush.msra.mxu1 %v421_v4  ;;  %81 = vmatpush.msra.mxu0 %v25_v2  ;;  %192 = vst.msk [vmem:[#allocation2 + $0x23] sm:$0x1] %vm58_vm0, %v374_v3  ;;  %v23_v10 = vld [vmem:[%s614_s2 + $0x20] sm:$0xff]  ;;  %v22_v13 = vld [vmem:[%s614_s2 + $0x18] sm:$0xff]  ;;  %v21_v15 = vld [vmem:[%s614_s2 + $0x10] sm:$0xff] }
   0x5   :  { %141 = vmatpush.msra.mxu2 %v426_v5  ;;  %212 = vmatpush.msra.mxu3 %v25_v2  ;;  %v458_v11 = vld [vmem:[%s614_s2 + $0xa0] sm:$0xff]  ;;  %v473_v14 = vld [vmem:[%s614_s2 + $0x98] sm:$0xff]  ;;  %v487_v17 = vld [vmem:[%s614_s2 + $0x90] sm:$0xff] }
   0x6   :  { %110 = vmatpush.msra.mxu1 %v436_v7  ;;  %82 = vmatpush.msra.mxu0 %v24_v6  ;;  %v464_v12 = vld [vmem:[%s614_s2 + $0x60] sm:$0xff]  ;;  %v482_v16 = vld [vmem:[%s614_s2 + $0x58] sm:$0xff]  ;;  %v20_v18 = vld [vmem:[%s614_s2 + $0x8] sm:$0xff] }
   0x7   :  { %142 = vmatpush.msra.mxu2 %v441_v8  ;;  %213 = vmatpush.msra.mxu3 %v24_v6  ;;  %v48_v19 = vld [vmem:[%s615_s0] sm:$0xff]  ;;  %v503_v21 = vld [vmem:[%s614_s2 + $0x50] sm:$0xff]  ;;  %v49_v23 = vld [vmem:[%s615_s0 + $0x8] sm:$0xff] }
   0x8   :  { %111 = vmatpush.msra.mxu1 %v448_v9  ;;  %83 = vmatpush.msra.mxu0 %v23_v10  ;;  %v371_v20 = vld [vmem:[%s616_s1] ss:$0 sm:$0xff]  ;;  %v372_v22 = vld [vmem:[%s616_s1 + $0x1] ss:$0 sm:$0xff]  ;;  %v515_v24 = vld [vmem:[%s614_s2 + $0x88] sm:$0xff] }
   0x9   :  { %143 = vmatpush.msra.mxu2 %v458_v11  ;;  %214 = vmatpush.msra.mxu3 %v23_v10  ;;  %v51_v25 = vmul.f32 %v371_v20, %v48_v19  ;;  %v52_v26 = vmul.f32 %v371_v20, %v49_v23  ;;  %v344_v27 = vld [vmem:[%s615_s0 + $0x10] sm:$0xff]  ;;  %v345_v28 = vld [vmem:[%s615_s0 + $0x18] sm:$0xff]  ;;  %v527_v29 = vld [vmem:[%s614_s2 + $0x48] sm:$0xff] }
   0xa   :  { %112 = vmatpush.msra.mxu1 %v464_v12  ;;  %84 = vmatpush.msra.mxu0 %v22_v13  ;;  %v185_v30 = vmul.f32 %v371_v20, %v344_v27  ;;  %v186_v31 = vmul.f32 %v371_v20, %v345_v28  ;;  %v19_v32 = vld [vmem:[%s614_s2] sm:$0xff] }
   0xb   :  { %144 = vmatpush.msra.mxu2 %v473_v14  ;;  %215 = vmatpush.msra.mxu3 %v22_v13  ;;  %v536_v33 = vld [vmem:[%s614_s2 + $0x80] sm:$0xff]  ;;  %v54_v34 = vadd.f32 %v372_v22, %v51_v25  ;;  %v55_v35 = vadd.f32 %v372_v22, %v52_v26 }
   0xc   :  { %113 = vmatpush.msra.mxu1 %v482_v16  ;;  %85 = vmatpush.msra.mxu0 %v21_v15  ;;  %v322_v36 = vld [vmem:[%s614_s2 + $0x40] sm:$0xff]  ;;  %v542_v37 = vadd.f32 %v372_v22, %v185_v30  ;;  %v544_v38 = vadd.f32 %v372_v22, %v186_v31 }
   0xd   :  { %145 = vmatpush.msra.mxu2 %v487_v17  ;;  %216 = vmatpush.msra.mxu3 %v21_v15  ;;  %v56_v39 = vmax.f32 %v54_v34, 0.0  ;;  %v57_v40 = vmax.f32 %v55_v35, 0.0  ;;  %v373_v55 = vld [vmem:[%s617_s3] ss:$0 sm:$0xff] }
   0xe   :  { %114 = vmatpush.msra.mxu1 %v503_v21  ;;  %86 = vmatpush.msra.mxu0 %v20_v18  ;;  %v189_v41 = vmax.f32 %v542_v37, 0.0  ;;  %v190_v42 = vmax.f32 %v544_v38, 0.0 }
   0xf   :  { %146 = vmatpush.msra.mxu2 %v515_v24  ;;  %217 = vmatpush.msra.mxu3 %v20_v18  ;;  %62 = vst.msk [vmem:[#allocation2 + $0x1] sm:$0xff] %vm61_vm1, %v56_v39 }
  0x10   :  { %115 = vmatpush.msra.mxu1 %v527_v29  ;;  %87 = vmatpush.msra.mxu0 %v19_v32  ;;  %63 = vst.msk [vmem:[#allocation2 + $0x9] sm:$0xff] %vm61_vm1, %v57_v40 }
  0x11   :  { %147 = vmatpush.msra.mxu2 %v536_v33  ;;  %218 = vmatpush.msra.mxu3 %v19_v32  ;;  %193 = vst.msk [vmem:[#allocation2 + $0x13] sm:$0xff] %vm61_vm1, %v189_v41 }
  0x12   :  { %116 = vmatpush.msra.mxu1 %v322_v36  ;;  %240 = vmatpush.msrb.mxu0 %v421_v4  ;;  %194 = vst.msk [vmem:[#allocation2 + $0x1b] sm:$0xff] %vm61_vm1, %v190_v42 }
  0x13   :  { %354 = vmatpush.msrb.mxu2 %v421_v4  ;;  %340 = vmatmul.msk.f32.vlgmr.msra.gmra.mxu1 %vm61_vm1, %v56_v39 }
  0x14   :  { %362 = vmatpush.msrb.mxu3 %v411_v1  ;;  %241 = vmatpush.msrb.mxu0 %v436_v7 }
  0x15   :  { %355 = vmatpush.msrb.mxu2 %v436_v7  ;;  %271 = vmatpush.msrb.mxu1 %v411_v1 }
  0x16   :  { %363 = vmatpush.msrb.mxu3 %v426_v5  ;;  %242 = vmatpush.msrb.mxu0 %v448_v9  ;;  %v64_v43 = vld [vmem:[#allocation2] sm:$0xff] }
  0x17   :  { %356 = vmatpush.msrb.mxu2 %v448_v9  ;;  %272 = vmatpush.msrb.mxu1 %v426_v5  ;;  %v124_v44 = vld [vmem:[#allocation2 + $0x2] sm:$0xff]  ;;  %v125_v47 = vld [vmem:[#allocation2 + $0xa] sm:$0xff] }
  0x18   :  { %364 = vmatpush.msrb.mxu3 %v441_v8  ;;  %243 = vmatpush.msrb.mxu0 %v464_v12  ;;  %v195_v45 = vld [vmem:[#allocation2 + $0x12] sm:$0xff]  ;;  %v65_v46 = vld [vmem:[#allocation2 + $0x8] sm:$0xff] }
  0x19   :  { %357 = vmatpush.msrb.mxu2 %v464_v12  ;;  %338 = vmatmul.msk.f32.vlgmr.msra.gmra.mxu0 %vm61_vm1, %v64_v43  ;;  %v196_v48 = vld [vmem:[#allocation2 + $0x1a] sm:$0xff] }
  0x1a   :  { %273 = vmatpush.msrb.mxu1 %v441_v8  ;;  %342 = vmatmul.msk.f32.vlgmr.msra.gmra.mxu2 %vm61_vm1, %v124_v44  ;;  %v255_v49 = vld [vmem:[#allocation2 + $0x14] sm:$0xff]  ;;  %v256_v50 = vld [vmem:[#allocation2 + $0x1c] sm:$0xff] }
  0x1b   :  { %365 = vmatpush.msrb.mxu3 %v458_v11  ;;  %358 = vmatpush.msrb.mxu2 %v482_v16 }
  0x1c   :  { %346 = vmatmul.msk.f32.vlgmr.msra.gmra.mxu3 %vm61_vm1, %v195_v45  ;;  %244 = vmatpush.msrb.mxu0 %v482_v16 }
  0x1d   :  { %274 = vmatpush.msrb.mxu1 %v458_v11  ;;  %359 = vmatpush.msrb.mxu2 %v503_v21 }
  0x1e   :  { %341 = vmatmul.msk.f32.gmra.mxu1 %vm61_vm1, %v57_v40  ;;  %366 = vmatpush.msrb.mxu3 %v473_v14 }
  0x1f   :  { %245 = vmatpush.msrb.mxu0 %v503_v21  ;;  %275 = vmatpush.msrb.mxu1 %v473_v14 }
  0x20   :  { %360 = vmatpush.msrb.mxu2 %v527_v29  ;;  %367 = vmatpush.msrb.mxu3 %v487_v17 }
  0x21   :  { %246 = vmatpush.msrb.mxu0 %v527_v29  ;;  %276 = vmatpush.msrb.mxu1 %v487_v17 }
  0x22   :  { %339 = vmatmul.msk.f32.gmra.mxu0 %vm61_vm1, %v65_v46  ;;  %343 = vmatmul.msk.f32.gmra.mxu2 %vm61_vm1, %v125_v47 }
  0x23   :  { %368 = vmatpush.msrb.mxu3 %v515_v24  ;;  %361 = vmatpush.msrb.mxu2 %v322_v36 }
  0x24   :  { %347 = vmatmul.msk.f32.gmra.mxu3 %vm61_vm1, %v196_v48  ;;  %247 = vmatpush.msrb.mxu0 %v322_v36 }
  0x25   :  { %277 = vmatpush.msrb.mxu1 %v515_v24  ;;  %369 = vmatpush.msrb.mxu3 %v536_v33 }
  0x27   :  { %278 = vmatpush.msrb.mxu1 %v536_v33 }
  0x28   :  { %350 = vmatmul.msk.f32.vlgmr.msrb.gmra.mxu1 %vm61_vm1, %v255_v49 }
  0x2a   :  { %348 = vmatmul.msk.f32.vlgmr.msrb.gmra.mxu0 %vm61_vm1, %v189_v41  ;;  %349 = vmatmul.msk.f32.vlgmr.msrb.gmra.mxu2 %vm61_vm1, %v190_v42 }
  0x2c   :  { %351 = vmatmul.msk.f32.vlgmr.msrb.gmra.mxu3 %vm61_vm1, %v256_v50 }
  0x90   :  { %v118_v51 = vpop.f32.mrf.mxu1 }
  0x96   :  { %v89_v52 = vpop.f32.mrf.mxu0 }
  0x97   :  { %v119_v53 = vadd.f32 %v118_v51, %v89_v52 }
  0x9b   :  { %v121_v54 = vpop.f32.mrf.mxu1 }
  0x9d   :  { %v149_v56 = vpop.f32.mrf.mxu2 }
  0x9e   :  { %v155_v57 = vadd.f32 %v149_v56, %v119_v53 }
  0x9f   :  { %v92_v58 = vpop.f32.mrf.mxu0  ;;  %v220_v59 = vpop.f32.mrf.mxu3 }
  0xa0   :  { %v160_v60 = vadd.f32 %v373_v55, %v155_v57  ;;  %v122_v61 = vadd.f32 %v121_v54, %v92_v58 }
  0xa2   :  { %180 = vst [vmem:[%s618_s4] sm:$0xff] %v160_v60  ;;  %v170_v6 = vmul.f32 %v160_v60, %v160_v60 }
  0xa5   :  { %v152_v62 = vpop.f32.mrf.mxu2  ;;  %v280_v63 = vpop.f32.mrf.mxu1 }
  0xa6   :  { %v156_v0 = vadd.f32 %v152_v62, %v122_v61 }
  0xa7   :  { %v223_v1 = vpop.f32.mrf.mxu3  ;;  %v249_v2 = vpop.f32.mrf.mxu0 }
  0xa8   :  { %v250_v3 = vadd.f32 %v249_v2, %v220_v59  ;;  %v161_v4 = vadd.f32 %v373_v55, %v156_v0 }
  0xaa   :  { %v286_v5 = vadd.f32 %v280_v63, %v250_v3  ;;  %v162_v7 = vadd.f32 %v161_v4, %v160_v60  ;;  %v171_v8 = vmul.f32 %v161_v4, %v161_v4  ;;  %181 = vst [vmem:[%s618_s4 + $0x8] sm:$0xff] %v161_v4 }
  0xac   :  { %v288_v9 = vadd.f32 %v373_v55, %v286_v5  ;;  %v172_v10 = vadd.f32 %v171_v8, %v170_v6  ;;  %v163_v12 = vrot.slane %v162_v7, 4 }
  0xad   :  { %v252_v11 = vpop.f32.mrf.mxu2 }
  0xae   :  { %352 = vst [vmem:[%s618_s4 + $0x10] sm:$0xff] %v288_v9  ;;  %v173_v13 = vrot.slane %v172_v10, 4  ;;  %v253_v14 = vadd.f32 %v252_v11, %v223_v1  ;;  %v164_v17 = vadd.f32 %v163_v12, %v162_v7  ;;  %v298_v20 = vmul.f32 %v288_v9, %v288_v9 }
  0xaf   :  { %v283_v15 = vpop.f32.mrf.mxu3 }
  0xb0   :  { %v287_v16 = vadd.f32 %v283_v15, %v253_v14  ;;  %v174_v18 = vadd.f32 %v173_v13, %v172_v10  ;;  %v165_v23 = vrot.slane %v164_v17, 2 }
  0xb2   :  { %v289_v19 = vadd.f32 %v373_v55, %v287_v16  ;;  %v175_v24 = vrot.slane %v174_v18, 2  ;;  %v166_v29 = vadd.f32 %v165_v23, %v164_v17 }
  0xb4   :  { %v290_v21 = vadd.f32 %v289_v19, %v288_v9  ;;  %v299_v22 = vmul.f32 %v289_v19, %v289_v19  ;;  %353 = vst [vmem:[%s618_s4 + $0x18] sm:$0xff] %v289_v19  ;;  %v176_v30 = vadd.f32 %v175_v24, %v174_v18  ;;  %v167_v35 = vrot.slane %v166_v29, 1 }
  0xb6   :  { %v291_v25 = vrot.slane %v290_v21, 4  ;;  %v300_v26 = vadd.f32 %v299_v22, %v298_v20  ;;  %v177_v36 = vrot.slane %v176_v30, 1  ;;  %v168_v41 = vadd.f32 %v167_v35, %v166_v29 }
  0xb8   :  { %v292_v27 = vadd.f32 %v291_v25, %v290_v21  ;;  %v301_v28 = vrot.slane %v300_v26, 4  ;;  %v178_v42 = vadd.f32 %v177_v36, %v176_v30 }
  0xba   :  { %v293_v31 = vrot.slane %v292_v27, 2  ;;  %v302_v32 = vadd.f32 %v301_v28, %v300_v26 }
  0xbc   :  { %v294_v33 = vadd.f32 %v293_v31, %v292_v27  ;;  %v303_v34 = vrot.slane %v302_v32, 2 }
  0xbe   :  { %v295_v37 = vrot.slane %v294_v33, 1  ;;  %v304_v38 = vadd.f32 %v303_v34, %v302_v32 }
  0xc0   :  { %v296_v39 = vadd.f32 %v295_v37, %v294_v33  ;;  %v305_v40 = vrot.slane %v304_v38, 1 }
  0xc2   :  { %v306_v43 = vadd.f32 %v305_v40, %v304_v38  ;;  %v297_v44 = vadd.f32 %v296_v39, %v168_v41 }
  0xc4   :  { %v307_v45 = vadd.f32 %v306_v43, %v178_v42 }
  0xc6   :  { %v312_v46 = vsel %vm311_vm2, %v297_v44, %v307_v45 }
  0xc7   :  { %313 = vst [vmem:[%s619_s5] sm:$0x3] %v312_v46 }

// kernel: net_forward.10
= control target key start
LH: loop header
LB: loop body
LE: loop exit
PB: predicated region body
PF: predicated region fallthrough
CT: control target
= control target key end

     0   :  { %vm56_vm0 = vcmask 516096   ;;  %v329_v3 = vmov 0.0   ;;  %vm59_vm1 = vcmask 523264   ;;  %s561_s2 = inlined_call_operand.vmem [shape: f32[3,64,128], index: 2, kind: input, shape index: {}]   ;;  %s562_s0 = inlined_call_operand.vmem [shape: f32[2,16,64], index: 0, kind: input, shape index: {}]   ;;  %s563_s1 = inlined_call_operand.vmem [shape: f32[2,64], index: 1, kind: input, shape index: {}]   ;;  %s564_s3 = inlined_call_operand.vmem [shape: f32[1,128], index: 3, kind: input, shape index: {}]   ;;  %s565_s4 = inlined_call_operand.vmem [shape: f32[2,16,128], index: 4, kind: output, shape index: {}]  }
   0x1   :  { %v24_v0 = vld [vmem:[%s561_s2 + $0x38] sm:$0xff]  ;;  %v23_v2 = vld [vmem:[%s561_s2 + $0x30] sm:$0xff]  ;;  %57 = vst.msk [vmem:[#allocation2] sm:$0x1] %vm56_vm0, %v329_v3  ;;  %v22_v6 = vld [vmem:[%s561_s2 + $0x28] sm:$0xff] }
   0x2   :  { %v361_v1 = vld [vmem:[%s561_s2 + $0xb8] sm:$0xff]  ;;  %78 = vmatpush.msra.mxu0 %v24_v0  ;;  %v376_v5 = vld [vmem:[%s561_s2 + $0xb0] sm:$0xff]  ;;  %58 = vst.msk [vmem:[#allocation2 + $0x11] sm:$0x1] %vm56_vm0, %v329_v3  ;;  %191 = vmatpush.msra.mxu3 %v24_v0  ;;  %v391_v8 = vld [vmem:[%s561_s2 + $0xa8] sm:$0xff] }
   0x3   :  { %138 = vmatpush.msra.mxu2 %v361_v1  ;;  %v371_v4 = vld [vmem:[%s561_s2 + $0x78] sm:$0xff]  ;;  %v386_v7 = vld [vmem:[%s561_s2 + $0x70] sm:$0xff]  ;;  %171 = vst.msk [vmem:[#allocation2 + $0x12] sm:$0x1] %vm56_vm0, %v329_v3  ;;  %v398_v9 = vld [vmem:[%s561_s2 + $0x68] sm:$0xff] }
   0x4   :  { %107 = vmatpush.msra.mxu1 %v371_v4  ;;  %79 = vmatpush.msra.mxu0 %v23_v2  ;;  %172 = vst.msk [vmem:[#allocation2 + $0x23] sm:$0x1] %vm56_vm0, %v329_v3  ;;  %v21_v10 = vld [vmem:[%s561_s2 + $0x20] sm:$0xff]  ;;  %v20_v13 = vld [vmem:[%s561_s2 + $0x18] sm:$0xff]  ;;  %v19_v15 = vld [vmem:[%s561_s2 + $0x10] sm:$0xff] }
   0x5   :  { %139 = vmatpush.msra.mxu2 %v376_v5  ;;  %192 = vmatpush.msra.mxu3 %v23_v2  ;;  %v408_v11 = vld [vmem:[%s561_s2 + $0xa0] sm:$0xff]  ;;  %v423_v14 = vld [vmem:[%s561_s2 + $0x98] sm:$0xff]  ;;  %v437_v17 = vld [vmem:[%s561_s2 + $0x90] sm:$0xff] }
   0x6   :  { %108 = vmatpush.msra.mxu1 %v386_v7  ;;  %80 = vmatpush.msra.mxu0 %v22_v6  ;;  %v414_v12 = vld [vmem:[%s561_s2 + $0x60] sm:$0xff]  ;;  %v432_v16 = vld [vmem:[%s561_s2 + $0x58] sm:$0xff]  ;;  %v18_v18 = vld [vmem:[%s561_s2 + $0x8] sm:$0xff] }
   0x7   :  { %140 = vmatpush.msra.mxu2 %v391_v8  ;;  %193 = vmatpush.msra.mxu3 %v22_v6  ;;  %v46_v19 = vld [vmem:[%s562_s0] sm:$0xff]  ;;  %v453_v21 = vld [vmem:[%s561_s2 + $0x50] sm:$0xff]  ;;  %v47_v23 = vld [vmem:[%s562_s0 + $0x8] sm:$0xff] }
   0x8   :  { %109 = vmatpush.msra.mxu1 %v398_v9  ;;  %81 = vmatpush.msra.mxu0 %v21_v10  ;;  %v326_v20 = vld [vmem:[%s563_s1] ss:$0 sm:$0xff]  ;;  %v327_v22 = vld [vmem:[%s563_s1 + $0x1] ss:$0 sm:$0xff]  ;;  %v465_v24 = vld [vmem:[%s561_s2 + $0x88] sm:$0xff] }
   0x9   :  { %141 = vmatpush.msra.mxu2 %v408_v11  ;;  %194 = vmatpush.msra.mxu3 %v21_v10  ;;  %v49_v25 = vmul.f32 %v326_v20, %v46_v19  ;;  %v50_v26 = vmul.f32 %v326_v20, %v47_v23  ;;  %v299_v27 = vld [vmem:[%s562_s0 + $0x10] sm:$0xff]  ;;  %v300_v28 = vld [vmem:[%s562_s0 + $0x18] sm:$0xff]  ;;  %v477_v29 = vld [vmem:[%s561_s2 + $0x48] sm:$0xff] }
   0xa   :  { %110 = vmatpush.msra.mxu1 %v414_v12  ;;  %82 = vmatpush.msra.mxu0 %v20_v13  ;;  %v165_v30 = vmul.f32 %v326_v20, %v299_v27  ;;  %v166_v31 = vmul.f32 %v326_v20, %v300_v28  ;;  %v17_v32 = vld [vmem:[%s561_s2] sm:$0xff] }
   0xb   :  { %142 = vmatpush.msra.mxu2 %v423_v14  ;;  %195 = vmatpush.msra.mxu3 %v20_v13  ;;  %v486_v33 = vld [vmem:[%s561_s2 + $0x80] sm:$0xff]  ;;  %v52_v34 = vadd.f32 %v327_v22, %v49_v25  ;;  %v53_v35 = vadd.f32 %v327_v22, %v50_v26 }
   0xc   :  { %111 = vmatpush.msra.mxu1 %v432_v16  ;;  %83 = vmatpush.msra.mxu0 %v19_v15  ;;  %v277_v36 = vld [vmem:[%s561_s2 + $0x40] sm:$0xff]  ;;  %v492_v37 = vadd.f32 %v327_v22, %v165_v30  ;;  %v494_v38 = vadd.f32 %v327_v22, %v166_v31 }
   0xd   :  { %143 = vmatpush.msra.mxu2 %v437_v17  ;;  %196 = vmatpush.msra.mxu3 %v19_v15  ;;  %v54_v39 = vmax.f32 %v52_v34, 0.0  ;;  %v55_v40 = vmax.f32 %v53_v35, 0.0  ;;  %v328_v55 = vld [vmem:[%s564_s3] ss:$0 sm:$0xff] }
   0xe   :  { %112 = vmatpush.msra.mxu1 %v453_v21  ;;  %84 = vmatpush.msra.mxu0 %v18_v18  ;;  %v169_v41 = vmax.f32 %v492_v37, 0.0  ;;  %v170_v42 = vmax.f32 %v494_v38, 0.0 }
   0xf   :  { %144 = vmatpush.msra.mxu2 %v465_v24  ;;  %197 = vmatpush.msra.mxu3 %v18_v18  ;;  %60 = vst.msk [vmem:[#allocation2 + $0x1] sm:$0xff] %vm59_vm1, %v54_v39 }
  0x10   :  { %113 = vmatpush.msra.mxu1 %v477_v29  ;;  %85 = vmatpush.msra.mxu0 %v17_v32  ;;  %61 = vst.msk [vmem:[#allocation2 + $0x9] sm:$0xff] %vm59_vm1, %v55_v40 }
  0x11   :  { %145 = vmatpush.msra.mxu2 %v486_v33  ;;  %198 = vmatpush.msra.mxu3 %v17_v32  ;;  %173 = vst.msk [vmem:[#allocation2 + $0x13] sm:$0xff] %vm59_vm1, %v169_v41 }
  0x12   :  { %114 = vmatpush.msra.mxu1 %v277_v36  ;;  %220 = vmatpush.msrb.mxu0 %v371_v4  ;;  %174 = vst.msk [vmem:[#allocation2 + $0x1b] sm:$0xff] %vm59_vm1, %v170_v42 }
  0x13   :  { %309 = vmatpush.msrb.mxu2 %v371_v4  ;;  %295 = vmatmul.msk.f32.vlgmr.msra.gmra.mxu1 %vm59_vm1, %v54_v39 }
  0x14   :  { %317 = vmatpush.msrb.mxu3 %v361_v1  ;;  %221 = vmatpush.msrb.mxu0 %v386_v7 }
  0x15   :  { %310 = vmatpush.msrb.mxu2 %v386_v7  ;;  %251 = vmatpush.msrb.mxu1 %v361_v1 }
  0x16   :  { %318 = vmatpush.msrb.mxu3 %v376_v5  ;;  %222 = vmatpush.msrb.mxu0 %v398_v9  ;;  %v62_v43 = vld [vmem:[#allocation2] sm:$0xff] }
  0x17   :  { %311 = vmatpush.msrb.mxu2 %v398_v9  ;;  %252 = vmatpush.msrb.mxu1 %v376_v5  ;;  %v122_v44 = vld [vmem:[#allocation2 + $0x2] sm:$0xff]  ;;  %v123_v47 = vld [vmem:[#allocation2 + $0xa] sm:$0xff] }
  0x18   :  { %319 = vmatpush.msrb.mxu3 %v391_v8  ;;  %223 = vmatpush.msrb.mxu0 %v414_v12  ;;  %v175_v45 = vld [vmem:[#allocation2 + $0x12] sm:$0xff]  ;;  %v63_v46 = vld [vmem:[#allocation2 + $0x8] sm:$0xff] }
  0x19   :  { %312 = vmatpush.msrb.mxu2 %v414_v12  ;;  %293 = vmatmul.msk.f32.vlgmr.msra.gmra.mxu0 %vm59_vm1, %v62_v43  ;;  %v176_v48 = vld [vmem:[#allocation2 + $0x1a] sm:$0xff] }
  0x1a   :  { %253 = vmatpush.msrb.mxu1 %v391_v8  ;;  %297 = vmatmul.msk.f32.vlgmr.msra.gmra.mxu2 %vm59_vm1, %v122_v44  ;;  %v235_v49 = vld [vmem:[#allocation2 + $0x14] sm:$0xff]  ;;  %v236_v50 = vld [vmem:[#allocation2 + $0x1c] sm:$0xff] }
  0x1b   :  { %320 = vmatpush.msrb.mxu3 %v408_v11  ;;  %313 = vmatpush.msrb.mxu2 %v432_v16 }
  0x1c   :  { %301 = vmatmul.msk.f32.vlgmr.msra.gmra.mxu3 %vm59_vm1, %v175_v45  ;;  %224 = vmatpush.msrb.mxu0 %v432_v16 }
  0x1d   :  { %254 = vmatpush.msrb.mxu1 %v408_v11  ;;  %314 = vmatpush.msrb.mxu2 %v453_v21 }
  0x1e   :  { %296 = vmatmul.msk.f32.gmra.mxu1 %vm59_vm1, %v55_v40  ;;  %321 = vmatpush.msrb.mxu3 %v423_v14 }
  0x1f   :  { %225 = vmatpush.msrb.mxu0 %v453_v21  ;;  %255 = vmatpush.msrb.mxu1 %v423_v14 }
  0x20   :  { %315 = vmatpush.msrb.mxu2 %v477_v29  ;;  %322 = vmatpush.msrb.mxu3 %v437_v17 }
  0x21   :  { %226 = vmatpush.msrb.mxu0 %v477_v29  ;;  %256 = vmatpush.msrb.mxu1 %v437_v17 }
  0x22   :  { %294 = vmatmul.msk.f32.gmra.mxu0 %vm59_vm1, %v63_v46  ;;  %298 = vmatmul.msk.f32.gmra.mxu2 %vm59_vm1, %v123_v47 }
  0x23   :  { %323 = vmatpush.msrb.mxu3 %v465_v24  ;;  %316 = vmatpush.msrb.mxu2 %v277_v36 }
  0x24   :  { %302 = vmatmul.msk.f32.gmra.mxu3 %vm59_vm1, %v176_v48  ;;  %227 = vmatpush.msrb.mxu0 %v277_v36 }
  0x25   :  { %257 = vmatpush.msrb.mxu1 %v465_v24  ;;  %324 = vmatpush.msrb.mxu3 %v486_v33 }
  0x27   :  { %258 = vmatpush.msrb.mxu1 %v486_v33 }
  0x28   :  { %305 = vmatmul.msk.f32.vlgmr.msrb.gmra.mxu1 %vm59_vm1, %v235_v49 }
  0x2a   :  { %303 = vmatmul.msk.f32.vlgmr.msrb.gmra.mxu0 %vm59_vm1, %v169_v41  ;;  %304 = vmatmul.msk.f32.vlgmr.msrb.gmra.mxu2 %vm59_vm1, %v170_v42 }
  0x2c   :  { %306 = vmatmul.msk.f32.vlgmr.msrb.gmra.mxu3 %vm59_vm1, %v236_v50 }
  0x90   :  { %v116_v51 = vpop.f32.mrf.mxu1 }
  0x96   :  { %v87_v52 = vpop.f32.mrf.mxu0 }
  0x97   :  { %v117_v53 = vadd.f32 %v116_v51, %v87_v52 }
  0x9b   :  { %v119_v54 = vpop.f32.mrf.mxu1 }
  0x9d   :  { %v147_v56 = vpop.f32.mrf.mxu2 }
  0x9e   :  { %v153_v57 = vadd.f32 %v147_v56, %v117_v53 }
  0x9f   :  { %v90_v58 = vpop.f32.mrf.mxu0  ;;  %v200_v59 = vpop.f32.mrf.mxu3 }
  0xa0   :  { %v158_v60 = vadd.f32 %v328_v55, %v153_v57  ;;  %v120_v61 = vadd.f32 %v119_v54, %v90_v58 }
  0xa2   :  { %160 = vst [vmem:[%s565_s4] sm:$0xff] %v158_v60 }
  0xa5   :  { %v150_v62 = vpop.f32.mrf.mxu2  ;;  %v260_v63 = vpop.f32.mrf.mxu1 }
  0xa6   :  { %v154_v0 = vadd.f32 %v150_v62, %v120_v61 }
  0xa7   :  { %v203_v1 = vpop.f32.mrf.mxu3  ;;  %v229_v2 = vpop.f32.mrf.mxu0 }
  0xa8   :  { %v230_v3 = vadd.f32 %v229_v2, %v200_v59  ;;  %v159_v4 = vadd.f32 %v328_v55, %v154_v0 }
  0xaa   :  { %v266_v5 = vadd.f32 %v260_v63, %v230_v3  ;;  %161 = vst [vmem:[%s565_s4 + $0x8] sm:$0xff] %v159_v4 }
  0xac   :  { %v268_v6 = vadd.f32 %v328_v55, %v266_v5 }
  0xad   :  { %v232_v7 = vpop.f32.mrf.mxu2 }
  0xae   :  { %307 = vst [vmem:[%s565_s4 + $0x10] sm:$0xff] %v268_v6  ;;  %v233_v8 = vadd.f32 %v232_v7, %v203_v1 }
  0xaf   :  { %v263_v9 = vpop.f32.mrf.mxu3 }
  0xb0   :  { %v267_v10 = vadd.f32 %v263_v9, %v233_v8 }
  0xb2   :  { %v269_v11 = vadd.f32 %v328_v55, %v267_v10 }
  0xb4   :  { %308 = vst [vmem:[%s565_s4 + $0x18] sm:$0xff] %v269_v11 }

// kernel: net_forward.11
= control target key start
LH: loop header
LB: loop body
LE: loop exit
PB: predicated region body
PF: predicated region fallthrough
CT: control target
= control target key end

     0   :  { %v329_v17 = vmov 0.0   ;;  %vm158_vm0 = vcmask 523264   ;;  %s718_s1 = inlined_call_operand.vmem [shape: f32[3,128,64], index: 1, kind: input, shape index: {}]   ;;  %s719_s0 = inlined_call_operand.vmem [shape: f32[2,16,128], index: 0, kind: input, shape index: {}]   ;;  %s720_s2 = inlined_call_operand.vmem [shape: f32[1,64], index: 2, kind: input, shape index: {}]   ;;  %s721_s3 = inlined_call_operand.vmem [shape: f32[2,16,64], index: 3, kind: input, shape index: {}]   ;;  %s722_s4 = inlined_call_operand.vmem [shape: f32[2,16,64], index: 4, kind: output, shape index: {}]  }
   0x1   :  { %v32_v0 = vld [vmem:[%s718_s1 + $0x78] sm:$0xff]  ;;  %v31_v2 = vld [vmem:[%s718_s1 + $0x70] sm:$0xff]  ;;  %v30_v5 = vld [vmem:[%s718_s1 + $0x68] sm:$0xff]  ;;  %70 = vst [vmem:[#allocation2] sm:$0x1] %v329_v17 }
   0x2   :  { %v361_v1 = vld [vmem:[%s718_s1 + $0x178] sm:$0xff]  ;;  %76 = vmatpush.msra.mxu0 %v32_v0  ;;  %v375_v4 = vld [vmem:[%s718_s1 + $0x170] sm:$0xff]  ;;  %170 = vmatpush.msra.mxu3 %v32_v0  ;;  %v389_v7 = vld [vmem:[%s718_s1 + $0x168] sm:$0xff]  ;;  %71 = vst [vmem:[#allocation2 + $0x11] sm:$0x1] %v329_v17 }
   0x3   :  { %124 = vmatpush.msra.mxu2 %v361_v1  ;;  %v370_v3 = vld [vmem:[%s718_s1 + $0xf8] sm:$0xff]  ;;  %v384_v6 = vld [vmem:[%s718_s1 + $0xf0] sm:$0xff]  ;;  %v395_v8 = vld [vmem:[%s718_s1 + $0xe8] sm:$0xff]  ;;  %164 = vst [vmem:[#allocation2 + $0x12] sm:$0x1] %v329_v17 }
   0x4   :  { %99 = vmatpush.msra.mxu1 %v370_v3  ;;  %77 = vmatpush.msra.mxu0 %v31_v2  ;;  %v29_v9 = vld [vmem:[%s718_s1 + $0x60] sm:$0xff]  ;;  %v28_v12 = vld [vmem:[%s718_s1 + $0x58] sm:$0xff]  ;;  %v27_v15 = vld [vmem:[%s718_s1 + $0x50] sm:$0xff]  ;;  %165 = vst [vmem:[#allocation2 + $0x23] sm:$0x1] %v329_v17 }
   0x5   :  { %125 = vmatpush.msra.mxu2 %v375_v4  ;;  %171 = vmatpush.msra.mxu3 %v31_v2  ;;  %v404_v10 = vld [vmem:[%s718_s1 + $0x160] sm:$0xff]  ;;  %v419_v13 = vld [vmem:[%s718_s1 + $0x158] sm:$0xff]  ;;  %v434_v16 = vld [vmem:[%s718_s1 + $0x150] sm:$0xff] }
   0x6   :  { %100 = vmatpush.msra.mxu1 %v384_v6  ;;  %78 = vmatpush.msra.mxu0 %v30_v5  ;;  %v410_v11 = vld [vmem:[%s718_s1 + $0xe0] sm:$0xff]  ;;  %v425_v14 = vld [vmem:[%s718_s1 + $0xd8] sm:$0xff]  ;;  %v440_v18 = vld [vmem:[%s718_s1 + $0xd0] sm:$0xff] }
   0x7   :  { %126 = vmatpush.msra.mxu2 %v389_v7  ;;  %172 = vmatpush.msra.mxu3 %v30_v5  ;;  %v26_v19 = vld [vmem:[%s718_s1 + $0x48] sm:$0xff]  ;;  %v25_v22 = vld [vmem:[%s718_s1 + $0x40] sm:$0xff]  ;;  %v24_v25 = vld [vmem:[%s718_s1 + $0x38] sm:$0xff] }
   0x8   :  { %101 = vmatpush.msra.mxu1 %v395_v8  ;;  %79 = vmatpush.msra.mxu0 %v29_v9  ;;  %v449_v20 = vld [vmem:[%s718_s1 + $0x148] sm:$0xff]  ;;  %v464_v23 = vld [vmem:[%s718_s1 + $0x140] sm:$0xff]  ;;  %v479_v26 = vld [vmem:[%s718_s1 + $0x138] sm:$0xff] }
   0x9   :  { %127 = vmatpush.msra.mxu2 %v404_v10  ;;  %173 = vmatpush.msra.mxu3 %v29_v9  ;;  %v455_v21 = vld [vmem:[%s718_s1 + $0xc8] sm:$0xff]  ;;  %v470_v24 = vld [vmem:[%s718_s1 + $0xc0] sm:$0xff]  ;;  %v23_v27 = vld [vmem:[%s718_s1 + $0x30] sm:$0xff] }
   0xa   :  { %102 = vmatpush.msra.mxu1 %v410_v11  ;;  %80 = vmatpush.msra.mxu0 %v28_v12  ;;  %v488_v28 = vld [vmem:[%s718_s1 + $0xb8] sm:$0xff]  ;;  %v493_v29 = vld [vmem:[%s718_s1 + $0x130] sm:$0xff]  ;;  %v499_v30 = vld [vmem:[%s719_s0] sm:$0xff] }
   0xb   :  { %128 = vmatpush.msra.mxu2 %v419_v13  ;;  %174 = vmatpush.msra.mxu3 %v28_v12  ;;  %v504_v31 = vld [vmem:[%s719_s0 + $0x8] sm:$0xff]  ;;  %v509_v32 = vld [vmem:[%s719_s0 + $0x10] sm:$0xff]  ;;  %72 = vst [vmem:[#allocation2 + $0x1] sm:$0xff] %v499_v30  ;;  %v21_v37 = vld [vmem:[%s718_s1 + $0x20] sm:$0xff] }
   0xc   :  { %103 = vmatpush.msra.mxu1 %v425_v14  ;;  %81 = vmatpush.msra.mxu0 %v27_v15  ;;  %v515_v33 = vld [vmem:[%s718_s1 + $0xb0] sm:$0xff]  ;;  %v22_v34 = vld [vmem:[%s718_s1 + $0x28] sm:$0xff]  ;;  %73 = vst [vmem:[#allocation2 + $0x9] sm:$0xff] %v504_v31  ;;  %v542_v38 = vld [vmem:[%s718_s1 + $0x120] sm:$0xff] }
   0xd   :  { %129 = vmatpush.msra.mxu2 %v434_v16  ;;  %175 = vmatpush.msra.mxu3 %v27_v15  ;;  %v525_v35 = vld [vmem:[%s718_s1 + $0x128] sm:$0xff]  ;;  %166 = vst [vmem:[#allocation2 + $0x13] sm:$0xff] %v509_v32  ;;  %v547_v39 = vld [vmem:[%s719_s0 + $0x18] sm:$0xff]  ;;  %v553_v40 = vld [vmem:[%s718_s1 + $0xa0] sm:$0xff] }
   0xe   :  { %104 = vmatpush.msra.mxu1 %v440_v18  ;;  %82 = vmatpush.msra.mxu0 %v26_v19  ;;  %v532_v36 = vld [vmem:[%s718_s1 + $0xa8] sm:$0xff]  ;;  %167 = vst [vmem:[#allocation2 + $0x1b] sm:$0xff] %v547_v39  ;;  %v20_v41 = vld [vmem:[%s718_s1 + $0x18] sm:$0xff]  ;;  %v19_v44 = vld [vmem:[%s718_s1 + $0x10] sm:$0xff] }
   0xf   :  { %130 = vmatpush.msra.mxu2 %v449_v20  ;;  %176 = vmatpush.msra.mxu3 %v26_v19  ;;  %v563_v42 = vld [vmem:[%s718_s1 + $0x118] sm:$0xff]  ;;  %v578_v45 = vld [vmem:[%s718_s1 + $0x110] sm:$0xff]  ;;  %v18_v47 = vld [vmem:[%s718_s1 + $0x8] sm:$0xff] }
  0x10   :  { %105 = vmatpush.msra.mxu1 %v455_v21  ;;  %83 = vmatpush.msra.mxu0 %v25_v22  ;;  %v569_v43 = vld [vmem:[%s718_s1 + $0x98] sm:$0xff]  ;;  %v584_v46 = vld [vmem:[%s718_s1 + $0x90] sm:$0xff]  ;;  %v593_v48 = vld [vmem:[%s718_s1 + $0x108] sm:$0xff] }
  0x11   :  { %131 = vmatpush.msra.mxu2 %v464_v23  ;;  %177 = vmatpush.msra.mxu3 %v25_v22  ;;  %v599_v49 = vld [vmem:[%s718_s1 + $0x88] sm:$0xff]  ;;  %v17_v50 = vld [vmem:[%s718_s1] sm:$0xff] }
  0x12   :  { %106 = vmatpush.msra.mxu1 %v470_v24  ;;  %84 = vmatpush.msra.mxu0 %v24_v25  ;;  %v608_v51 = vld [vmem:[%s718_s1 + $0x100] sm:$0xff]  ;;  %v155_v12 = vld [vmem:[%s721_s3 + $0x8] sm:$0xff] }
  0x13   :  { %132 = vmatpush.msra.mxu2 %v479_v26  ;;  %178 = vmatpush.msra.mxu3 %v24_v25  ;;  %v615_v52 = vld [vmem:[%s718_s1 + $0x80] sm:$0xff]  ;;  %v75_v56 = vld [vmem:[#allocation2 + $0x8] sm:$0xff] }
  0x14   :  { %107 = vmatpush.msra.mxu1 %v488_v28  ;;  %85 = vmatpush.msra.mxu0 %v23_v27  ;;  %v74_v53 = vld [vmem:[#allocation2] sm:$0xff]  ;;  %v168_v55 = vld [vmem:[#allocation2 + $0x12] sm:$0xff]  ;;  %v123_v57 = vld [vmem:[#allocation2 + $0xa] sm:$0xff] }
  0x15   :  { %133 = vmatpush.msra.mxu2 %v493_v29  ;;  %179 = vmatpush.msra.mxu3 %v23_v27  ;;  %v122_v54 = vld [vmem:[#allocation2 + $0x2] sm:$0xff]  ;;  %v169_v58 = vld [vmem:[#allocation2 + $0x1a] sm:$0xff] }
  0x16   :  { %108 = vmatpush.msra.mxu1 %v515_v33  ;;  %86 = vmatpush.msra.mxu0 %v22_v34  ;;  %v216_v59 = vld [vmem:[#allocation2 + $0x14] sm:$0xff]  ;;  %v217_v60 = vld [vmem:[#allocation2 + $0x1c] sm:$0xff] }
  0x17   :  { %134 = vmatpush.msra.mxu2 %v525_v35  ;;  %180 = vmatpush.msra.mxu3 %v22_v34  ;;  %v328_v0 = vld [vmem:[%s720_s2] ss:$0 sm:$0xff]  ;;  %v292_v27 = vld [vmem:[%s721_s3 + $0x18] sm:$0xff] }
  0x18   :  { %109 = vmatpush.msra.mxu1 %v532_v36  ;;  %87 = vmatpush.msra.mxu0 %v21_v37 }
  0x19   :  { %135 = vmatpush.msra.mxu2 %v542_v38  ;;  %181 = vmatpush.msra.mxu3 %v21_v37 }
  0x1a   :  { %110 = vmatpush.msra.mxu1 %v553_v40  ;;  %88 = vmatpush.msra.mxu0 %v20_v41 }
  0x1b   :  { %136 = vmatpush.msra.mxu2 %v563_v42  ;;  %182 = vmatpush.msra.mxu3 %v20_v41 }
  0x1c   :  { %111 = vmatpush.msra.mxu1 %v569_v43  ;;  %89 = vmatpush.msra.mxu0 %v19_v44 }
  0x1d   :  { %137 = vmatpush.msra.mxu2 %v578_v45  ;;  %183 = vmatpush.msra.mxu3 %v19_v44 }
  0x1e   :  { %112 = vmatpush.msra.mxu1 %v584_v46  ;;  %90 = vmatpush.msra.mxu0 %v18_v47 }
  0x1f   :  { %138 = vmatpush.msra.mxu2 %v593_v48  ;;  %184 = vmatpush.msra.mxu3 %v18_v47 }
  0x20   :  { %113 = vmatpush.msra.mxu1 %v599_v49  ;;  %91 = vmatpush.msra.mxu0 %v17_v50 }
  0x21   :  { %139 = vmatpush.msra.mxu2 %v608_v51  ;;  %185 = vmatpush.msra.mxu3 %v17_v50 }
  0x22   :  { %193 = vmatpush.msrb.mxu0 %v370_v3  ;;  %114 = vmatpush.msra.mxu1 %v615_v52 }
  0x23   :  { %295 = vmatpush.msrb.mxu2 %v370_v3  ;;  %311 = vmatpush.msrb.mxu3 %v361_v1  ;;  %v154_v3 = vld [vmem:[%s721_s3] sm:$0xff] }
  0x24   :  { %194 = vmatpush.msrb.mxu0 %v384_v6  ;;  %218 = vmatpush.msrb.mxu1 %v361_v1 }
  0x25   :  { %296 = vmatpush.msrb.mxu2 %v384_v6  ;;  %312 = vmatpush.msrb.mxu3 %v375_v4 }
  0x26   :  { %195 = vmatpush.msrb.mxu0 %v395_v8  ;;  %219 = vmatpush.msrb.mxu1 %v375_v4 }
  0x27   :  { %297 = vmatpush.msrb.mxu2 %v395_v8  ;;  %313 = vmatpush.msrb.mxu3 %v389_v7 }
  0x28   :  { %196 = vmatpush.msrb.mxu0 %v410_v11  ;;  %220 = vmatpush.msrb.mxu1 %v389_v7 }
  0x29   :  { %298 = vmatpush.msrb.mxu2 %v410_v11  ;;  %314 = vmatpush.msrb.mxu3 %v404_v10 }
  0x2a   :  { %197 = vmatpush.msrb.mxu0 %v425_v14  ;;  %221 = vmatpush.msrb.mxu1 %v404_v10 }
  0x2b   :  { %299 = vmatpush.msrb.mxu2 %v425_v14  ;;  %315 = vmatpush.msrb.mxu3 %v419_v13 }
  0x2c   :  { %198 = vmatpush.msrb.mxu0 %v440_v18  ;;  %222 = vmatpush.msrb.mxu1 %v419_v13 }
  0x2d   :  { %300 = vmatpush.msrb.mxu2 %v440_v18  ;;  %316 = vmatpush.msrb.mxu3 %v434_v16 }
  0x2e   :  { %199 = vmatpush.msrb.mxu0 %v455_v21  ;;  %223 = vmatpush.msrb.mxu1 %v434_v16 }
  0x2f   :  { %301 = vmatpush.msrb.mxu2 %v455_v21  ;;  %317 = vmatpush.msrb.mxu3 %v449_v20 }
  0x30   :  { %200 = vmatpush.msrb.mxu0 %v470_v24  ;;  %224 = vmatpush.msrb.mxu1 %v449_v20  ;;  %v291_v20 = vld [vmem:[%s721_s3 + $0x10] sm:$0xff] }
  0x31   :  { %302 = vmatpush.msrb.mxu2 %v470_v24  ;;  %92 = vmatmul.f32.vlgmr.msra.gmra.mxu0 %v74_v53 }
  0x32   :  { %140 = vmatmul.f32.vlgmr.msra.gmra.mxu2 %v122_v54  ;;  %201 = vmatpush.msrb.mxu0 %v488_v28 }
  0x33   :  { %303 = vmatpush.msrb.mxu2 %v488_v28  ;;  %225 = vmatpush.msrb.mxu1 %v464_v23 }
  0x34   :  { %318 = vmatpush.msrb.mxu3 %v464_v23  ;;  %115 = vmatmul.f32.vlgmr.msra.gmra.mxu1 %v499_v30 }
  0x35   :  { %186 = vmatmul.f32.vlgmr.msra.gmra.mxu3 %v168_v55  ;;  %202 = vmatpush.msrb.mxu0 %v515_v33 }
  0x36   :  { %304 = vmatpush.msrb.mxu2 %v515_v33  ;;  %226 = vmatpush.msrb.mxu1 %v479_v26 }
  0x37   :  { %319 = vmatpush.msrb.mxu3 %v479_v26  ;;  %203 = vmatpush.msrb.mxu0 %v532_v36 }
  0x38   :  { %305 = vmatpush.msrb.mxu2 %v532_v36  ;;  %227 = vmatpush.msrb.mxu1 %v493_v29 }
  0x39   :  { %320 = vmatpush.msrb.mxu3 %v493_v29  ;;  %204 = vmatpush.msrb.mxu0 %v553_v40 }
  0x3a   :  { %306 = vmatpush.msrb.mxu2 %v553_v40  ;;  %228 = vmatpush.msrb.mxu1 %v525_v35 }
  0x3b   :  { %321 = vmatpush.msrb.mxu3 %v525_v35  ;;  %95 = vmatmul.f32.gmra.mxu0 %v75_v56 }
  0x3c   :  { %143 = vmatmul.f32.gmra.mxu2 %v123_v57  ;;  %205 = vmatpush.msrb.mxu0 %v569_v43 }
  0x3d   :  { %307 = vmatpush.msrb.mxu2 %v569_v43  ;;  %229 = vmatpush.msrb.mxu1 %v542_v38 }
  0x3e   :  { %322 = vmatpush.msrb.mxu3 %v542_v38  ;;  %118 = vmatmul.f32.gmra.mxu1 %v504_v31 }
  0x3f   :  { %189 = vmatmul.f32.gmra.mxu3 %v169_v58  ;;  %206 = vmatpush.msrb.mxu0 %v584_v46 }
  0x40   :  { %308 = vmatpush.msrb.mxu2 %v584_v46  ;;  %230 = vmatpush.msrb.mxu1 %v563_v42 }
  0x41   :  { %323 = vmatpush.msrb.mxu3 %v563_v42  ;;  %207 = vmatpush.msrb.mxu0 %v599_v49 }
  0x42   :  { %309 = vmatpush.msrb.mxu2 %v599_v49  ;;  %231 = vmatpush.msrb.mxu1 %v578_v45 }
  0x43   :  { %324 = vmatpush.msrb.mxu3 %v578_v45  ;;  %208 = vmatpush.msrb.mxu0 %v615_v52 }
  0x44   :  { %310 = vmatpush.msrb.mxu2 %v615_v52  ;;  %232 = vmatpush.msrb.mxu1 %v593_v48 }
  0x45   :  { %325 = vmatpush.msrb.mxu3 %v593_v48  ;;  %209 = vmatmul.f32.vlgmr.msrb.gmra.mxu0 %v509_v32 }
  0x46   :  { %212 = vmatmul.f32.vlgmr.msrb.gmra.mxu2 %v547_v39  ;;  %233 = vmatpush.msrb.mxu1 %v608_v51 }
  0x47   :  { %326 = vmatpush.msrb.mxu3 %v608_v51  ;;  %234 = vmatmul.f32.vlgmr.msrb.gmra.mxu1 %v216_v59 }
  0x48   :  { %237 = vmatmul.f32.vlgmr.msrb.gmra.mxu3 %v217_v60 }
  0xae   :  { %v93_v61 = vpop.f32.mrf.mxu0 }
  0xb1   :  { %v116_v62 = vpop.f32.mrf.mxu1 }
  0xb2   :  { %v117_v63 = vadd.f32 %v116_v62, %v93_v61 }
  0xb5   :  { %v141_v1 = vpop.f32.mrf.mxu2 }
  0xb6   :  { %v147_v2 = vadd.f32 %v141_v1, %v117_v63 }
  0xb8   :  { %v152_v4 = vadd.f32 %v328_v0, %v147_v2  ;;  %v187_v5 = vpop.f32.mrf.mxu3  ;;  %v96_v6 = vpop.f32.mrf.mxu0 }
  0xba   :  { %v156_v7 = vsub.f32 %v154_v3, %v152_v4 }
  0xbb   :  { %v119_v8 = vpop.f32.mrf.mxu1 }
  0xbc   :  { %159 = vst.msk [vmem:[%s722_s4] sm:$0xff] %vm158_vm0, %v156_v7  ;;  %v120_v9 = vadd.f32 %v119_v8, %v96_v6 }
  0xbf   :  { %v144_v10 = vpop.f32.mrf.mxu2 }
  0xc0   :  { %v148_v11 = vadd.f32 %v144_v10, %v120_v9 }
  0xc2   :  { %v153_v13 = vadd.f32 %v328_v0, %v148_v11  ;;  %v190_v14 = vpop.f32.mrf.mxu3  ;;  %v210_v15 = vpop.f32.mrf.mxu0 }
  0xc3   :  { %v211_v17 = vadd.f32 %v210_v15, %v187_v5 }
  0xc4   :  { %v157_v16 = vsub.f32 %v155_v12, %v153_v13  ;;  %v235_v18 = vpop.f32.mrf.mxu1 }
  0xc5   :  { %v241_v19 = vadd.f32 %v235_v18, %v211_v17 }
  0xc6   :  { %160 = vst.msk [vmem:[%s722_s4 + $0x8] sm:$0xff] %vm158_vm0, %v157_v16 }
  0xc7   :  { %v243_v21 = vadd.f32 %v328_v0, %v241_v19 }
  0xc9   :  { %v213_v22 = vpop.f32.mrf.mxu2  ;;  %v248_v23 = vsub.f32 %v291_v20, %v243_v21 }
  0xca   :  { %v214_v24 = vadd.f32 %v213_v22, %v190_v14 }
  0xcb   :  { %v238_v25 = vpop.f32.mrf.mxu3  ;;  %293 = vst.msk [vmem:[%s722_s4 + $0x10] sm:$0xff] %vm158_vm0, %v248_v23 }
  0xcc   :  { %v242_v26 = vadd.f32 %v238_v25, %v214_v24 }
  0xce   :  { %v244_v28 = vadd.f32 %v328_v0, %v242_v26 }
  0xd0   :  { %v249_v29 = vsub.f32 %v292_v27, %v244_v28 }
  0xd2   :  { %294 = vst.msk [vmem:[%s722_s4 + $0x18] sm:$0xff] %vm158_vm0, %v249_v29 }

</bundles_post_ra>
